<compile_context>
chip_gen: v6e
topology: v6e:2x2x1
jax: 0.10.0
libtpu: 0.0.40
codegen_flags: <defaults>
</compile_context>

<pallas_src>
import jax
import jax.numpy as jnp
from jax.experimental import pallas as pl
from jax.experimental.pallas import tpu as pltpu

# ----------------------------- model config --------------------------------
N_LAYER = 2
N_HEAD = 4
D_MODEL = 32
D_INNER = 64
D_HEAD = D_MODEL // N_HEAD
LN_EPS = 1e-6

N_ID = 253            # id_embedding vocab
N_CAT = 33 + 3        # category_embedding vocab
D_POS = D_MODEL // 2  # position_encoding out dim
D_EMB = D_MODEL // 4  # each embedding dim


# ----------------------------- fused kernel ---------------------------------
def _decoder_kernel(dec_ref, enc_ref, dbias_ref, ebias_ref,
                    wqkv_ref, wo_ref, asm_ref,
                    w1_ref, w2_ref, b1_ref, fsm_ref,
                    out_ref):
    """Whole N_LAYER-layer decoder forward, everything resident in VMEM.

    dec_ref   [B*T, D]            decoder input (pos-enc ++ id-emb ++ cat-emb)
    enc_ref   [B*S, D]            encoder output, batch-flattened
    dbias_ref [B*T, B*T]          additive self-attn bias (0 attend / -1e9)
    ebias_ref [B*T, B*S]          additive cross-attn bias
    wqkv_ref  [2*N_LAYER, D, 3D]  fused Q/K/V weights (self, cross per layer)
    wo_ref    [2*N_LAYER, D, D]   output-projection weights
    asm_ref   [2*N_LAYER, 6, D]   rows: bq, bk, bv, bo, ln_gamma, ln_beta
    w1_ref    [N_LAYER, D, Di]
    w2_ref    [N_LAYER, Di, D]
    b1_ref    [N_LAYER, 1, Di]
    fsm_ref   [N_LAYER, 3, D]     rows: b2, ln_gamma, ln_beta
    out_ref   [B*T, D]
    """
    x = dec_ref[...]
    enc = enc_ref[...]
    dbias = dbias_ref[...]
    ebias = ebias_ref[...]
    scale = 1.0 / (float(D_HEAD) ** 0.5)

    def layer_norm(v, g, b):
        mean = jnp.mean(v, axis=-1, keepdims=True)
        var = jnp.mean((v - mean) ** 2, axis=-1, keepdims=True)
        return (v - mean) * jax.lax.rsqrt(var + LN_EPS) * g + b

    def attention(xq, kv, bias, idx):
        wqkv = wqkv_ref[idx]     # [D, 3D]   (static index -> free)
        wo = wo_ref[idx]         # [D, D]
        sm = asm_ref[idx]        # [6, D]
        q = jnp.dot(xq, wqkv[:, :D_MODEL],
                    preferred_element_type=jnp.float32) + sm[0:1, :]
        k = jnp.dot(kv, wqkv[:, D_MODEL:2 * D_MODEL],
                    preferred_element_type=jnp.float32) + sm[1:2, :]
        v = jnp.dot(kv, wqkv[:, 2 * D_MODEL:],
                    preferred_element_type=jnp.float32) + sm[2:3, :]

        acc = jnp.zeros_like(xq)
        # Static unroll over heads; per-head output folded through the matching
        # Wo row-slice and summed -> no jnp.concatenate / lane shuffles.
        for h in range(N_HEAD):
            sl = slice(h * D_HEAD, (h + 1) * D_HEAD)
            s = jax.lax.dot_general(             # q @ k^T without transpose
                q[:, sl], k[:, sl], (((1,), (1,)), ((), ())),
                preferred_element_type=jnp.float32) * scale
            s = s + bias                         # additive mask (block-diag)
            s = s - jnp.max(s, axis=-1, keepdims=True)
            p = jnp.exp(s)
            # exact division kept for numerical parity with torch.softmax
            # (approx EUP reciprocal is negligible at a 16x16 tile)
            p = p / jnp.sum(p, axis=-1, keepdims=True)
            oh = jnp.dot(p, v[:, sl], preferred_element_type=jnp.float32)
            acc = acc + jnp.dot(oh, wo[sl, :],
                                preferred_element_type=jnp.float32)
        out = acc + sm[3:4, :] + xq              # proj bias + residual
        return layer_norm(out, sm[4:5, :], sm[5:6, :])

    def ffn(v, l):
        h = jnp.dot(v, w1_ref[l], preferred_element_type=jnp.float32) + b1_ref[l]
        h = jnp.maximum(h, 0.0)                  # ReLU
        fsm = fsm_ref[l]
        o = jnp.dot(h, w2_ref[l], preferred_element_type=jnp.float32)
        o = o + fsm[0:1, :] + v                  # bias + residual
        return layer_norm(o, fsm[1:2, :], fsm[2:3, :])

    for l in range(N_LAYER):                     # static unroll over layers
        x = attention(x, x, dbias, 2 * l)        # masked self-attention
        x = attention(x, enc, ebias, 2 * l + 1)  # cross-attention over encoder
        x = ffn(x, l)                            # position-wise FFN

    out_ref[...] = x.astype(out_ref.dtype)


# ------------------------------- wrapper -------------------------------------
def _block_diag_bias(mask):
    """[B, Tq, Tk] 1/0 mask -> [B*Tq, B*Tk] additive bias (0 / -1e9),
    block-diagonal so flattened batches never attend across each other."""
    B, Tq, Tk = mask.shape
    eye = jnp.eye(B, dtype=mask.dtype)
    full = (eye[:, None, :, None] * mask[:, :, None, :]).reshape(B * Tq, B * Tk)
    return (full - 1.0) * 1e9


def transformer_decoder(params, enc_input, position_sequence, id_sequence,
                        category_sequence, dec_mask, enc_mask):
    B, T, _ = position_sequence.shape
    S = enc_input.shape[1]

    # Embedding gathers, the K=3 position Linear and the feature concat are
    # left to XLA glue (a standalone pallas_call here costs ~1000x its compute
    # in launch overhead; see perf review).
    pos = jnp.matmul(position_sequence, params["pos_w"]) + params["pos_b"]
    ids = jnp.take(params["id_emb"], id_sequence, axis=0)
    cats = jnp.take(params["cat_emb"], category_sequence, axis=0)
    dec_in = jnp.concatenate([pos, ids, cats], axis=-1).reshape(B * T, D_MODEL)
    enc_flat = enc_input.reshape(B * S, D_MODEL)

    dbias = _block_diag_bias(dec_mask.astype(jnp.float32))
    ebias = _block_diag_bias(enc_mask.astype(jnp.float32))

    vmem = pl.BlockSpec(memory_space=pltpu.MemorySpace.VMEM)
    out_flat = pl.pallas_call(
        _decoder_kernel,
        out_shape=jax.ShapeDtypeStruct((B * T, D_MODEL), jnp.float32),
        in_specs=[vmem] * 11,
        out_specs=vmem,
    )(dec_in, enc_flat, dbias, ebias,
      params["wqkv"], params["wo"], params["attn_small"],
      params["w1"], params["w2"], params["b1"], params["ffn_small"])
    return out_flat.reshape(B, T, D_MODEL)


# ------------------------------- parameters ----------------------------------
def init_params(key):
    def nk():
        nonlocal key
        key, sub = jax.random.split(key)
        return sub

    def w(shape, scale=0.02):
        return (scale * jax.random.normal(nk(), shape)).astype(jnp.float32)

    ones = jnp.ones((1, D_MODEL), jnp.float32)
    zeros = jnp.zeros((1, D_MODEL), jnp.float32)

    wqkv, wo, asm = [], [], []
    w1, w2, b1, fsm = [], [], [], []
    for _ in range(N_LAYER):
        for _ in range(2):  # self-attn, cross-attn
            wqkv.append(w((D_MODEL, 3 * D_MODEL)))
            wo.append(w((D_MODEL, D_MODEL)))
            # rows: bq, bk, bv, bo, ln_gamma (ones), ln_beta (zeros)
            asm.append(jnp.concatenate([w((4, D_MODEL)), ones, zeros], axis=0))
        w1.append(w((D_MODEL, D_INNER)))
        w2.append(w((D_INNER, D_MODEL)))
        b1.append(w((1, D_INNER)))
        # rows: b2, ln_gamma (ones), ln_beta (zeros)
        fsm.append(jnp.concatenate([w((1, D_MODEL)), ones, zeros], axis=0))

    return {
        "pos_w": w((3, D_POS)), "pos_b": w((D_POS,)),
        "id_emb": w((N_ID, D_EMB)), "cat_emb": w((N_CAT, D_EMB)),
        "wqkv": jnp.stack(wqkv),        # [2*N_LAYER, D, 3D]
        "wo": jnp.stack(wo),            # [2*N_LAYER, D, D]
        "attn_small": jnp.stack(asm),   # [2*N_LAYER, 6, D]
        "w1": jnp.stack(w1),            # [N_LAYER, D, Di]
        "w2": jnp.stack(w2),            # [N_LAYER, Di, D]
        "b1": jnp.stack(b1),            # [N_LAYER, 1, Di]
        "ffn_small": jnp.stack(fsm),    # [N_LAYER, 3, D]
    }


# --------------------------------- main ---------------------------------------
if __name__ == "__main__":
    B, T, S = 2, 8, 8  # batch, decoder seq len, encoder seq len

    key = jax.random.PRNGKey(0)
    k_param, k_enc, k_pos, k_id, k_cat = jax.random.split(key, 5)

    params = init_params(k_param)

    enc_input = jax.random.normal(k_enc, (B, S, D_MODEL), jnp.float32)
    position_sequence = jax.random.normal(k_pos, (B, T, 3), jnp.float32)
    id_sequence = jax.random.randint(k_id, (B, T), 0, N_ID, jnp.int32)
    category_sequence = jax.random.randint(k_cat, (B, T), 0, N_CAT, jnp.int32)

    # causal self-attention mask; full cross-attention mask (module inputs)
    dec_mask = jnp.broadcast_to(
        jnp.tril(jnp.ones((T, T), jnp.float32)), (B, T, T))
    enc_mask = jnp.ones((B, T, S), jnp.float32)

    fwd = jax.jit(transformer_decoder)
    out = fwd(params, enc_input, position_sequence, id_sequence,
              category_sequence, dec_mask, enc_mask)
    jax.block_until_ready(out)
    assert out.shape == (B, T, D_MODEL)
    assert bool(jnp.all(jnp.isfinite(out)))
    print("KERNEL_OK")
</pallas_src>

<mosaic_0001>
module attributes {stable_mosaic.version = 11 : i64} {
  func.func @_decoder_kernel(%arg0: memref<16x32xf32, #tpu.memory_space<vmem>>, %arg1: memref<16x32xf32, #tpu.memory_space<vmem>>, %arg2: memref<16x16xf32, #tpu.memory_space<vmem>>, %arg3: memref<16x16xf32, #tpu.memory_space<vmem>>, %arg4: memref<4x32x96xf32, #tpu.memory_space<vmem>>, %arg5: memref<4x32x32xf32, #tpu.memory_space<vmem>>, %arg6: memref<4x6x32xf32, #tpu.memory_space<vmem>>, %arg7: memref<2x32x64xf32, #tpu.memory_space<vmem>>, %arg8: memref<2x64x32xf32, #tpu.memory_space<vmem>>, %arg9: memref<2x1x64xf32, #tpu.memory_space<vmem>>, %arg10: memref<2x3x32xf32, #tpu.memory_space<vmem>>, %arg11: memref<16x32xf32, #tpu.memory_space<vmem>>) attributes {dimension_semantics = [], scalar_prefetch = 0 : i64, scratch_operands = 0 : i64, tpu.core_type = #tpu.core_type<tc>} {
    %c0 = arith.constant 0 : index
    %c0_0 = arith.constant 0 : index
    %0 = vector.load %arg0[%c0, %c0_0] : memref<16x32xf32, #tpu.memory_space<vmem>>, vector<16x32xf32>
    %c0_1 = arith.constant 0 : index
    %c0_2 = arith.constant 0 : index
    %1 = vector.load %arg1[%c0_1, %c0_2] : memref<16x32xf32, #tpu.memory_space<vmem>>, vector<16x32xf32>
    %c0_3 = arith.constant 0 : index
    %c0_4 = arith.constant 0 : index
    %2 = vector.load %arg2[%c0_3, %c0_4] : memref<16x16xf32, #tpu.memory_space<vmem>>, vector<16x16xf32>
    %c0_5 = arith.constant 0 : index
    %c0_6 = arith.constant 0 : index
    %3 = vector.load %arg3[%c0_5, %c0_6] : memref<16x16xf32, #tpu.memory_space<vmem>>, vector<16x16xf32>
    %c0_7 = arith.constant 0 : index
    %c0_8 = arith.constant 0 : index
    %c0_9 = arith.constant 0 : index
    %4 = vector.load %arg4[%c0_7, %c0_8, %c0_9] : memref<4x32x96xf32, #tpu.memory_space<vmem>>, vector<1x32x96xf32>
    %5 = vector.shape_cast %4 : vector<1x32x96xf32> to vector<32x96xf32>
    %c0_10 = arith.constant 0 : index
    %c0_11 = arith.constant 0 : index
    %c0_12 = arith.constant 0 : index
    %6 = vector.load %arg5[%c0_10, %c0_11, %c0_12] : memref<4x32x32xf32, #tpu.memory_space<vmem>>, vector<1x32x32xf32>
    %7 = vector.shape_cast %6 : vector<1x32x32xf32> to vector<32x32xf32>
    %c0_13 = arith.constant 0 : index
    %c0_14 = arith.constant 0 : index
    %c0_15 = arith.constant 0 : index
    %8 = vector.load %arg6[%c0_13, %c0_14, %c0_15] : memref<4x6x32xf32, #tpu.memory_space<vmem>>, vector<1x6x32xf32>
    %9 = vector.shape_cast %8 : vector<1x6x32xf32> to vector<6x32xf32>
    %10 = vector.extract_strided_slice %5 {offsets = [0, 0], sizes = [32, 32], strides = [1, 1]} : vector<32x96xf32> to vector<32x32xf32>
    %cst = arith.constant dense<0.000000e+00> : vector<16x32xf32>
    %11 = tpu.matmul %0, %10, %cst {dimension_numbers = #tpu.dot_dimension_numbers<[1], [0], [0], [1], [0, 0, 1, 1], [], []>} : vector<16x32xf32>, vector<32x32xf32>, vector<16x32xf32> -> vector<16x32xf32>
    %12 = vector.extract_strided_slice %9 {offsets = [0, 0], sizes = [1, 32], strides = [1, 1]} : vector<6x32xf32> to vector<1x32xf32>
    %13 = vector.broadcast %12 : vector<1x32xf32> to vector<16x32xf32>
    %14 = arith.addf %11, %13 : vector<16x32xf32>
    %15 = vector.extract_strided_slice %5 {offsets = [0, 32], sizes = [32, 32], strides = [1, 1]} : vector<32x96xf32> to vector<32x32xf32>
    %cst_16 = arith.constant dense<0.000000e+00> : vector<16x32xf32>
    %16 = tpu.matmul %0, %15, %cst_16 {dimension_numbers = #tpu.dot_dimension_numbers<[1], [0], [0], [1], [0, 0, 1, 1], [], []>} : vector<16x32xf32>, vector<32x32xf32>, vector<16x32xf32> -> vector<16x32xf32>
    %17 = vector.extract_strided_slice %9 {offsets = [1, 0], sizes = [1, 32], strides = [1, 1]} : vector<6x32xf32> to vector<1x32xf32>
    %18 = vector.broadcast %17 : vector<1x32xf32> to vector<16x32xf32>
    %19 = arith.addf %16, %18 : vector<16x32xf32>
    %20 = vector.extract_strided_slice %5 {offsets = [0, 64], sizes = [32, 32], strides = [1, 1]} : vector<32x96xf32> to vector<32x32xf32>
    %cst_17 = arith.constant dense<0.000000e+00> : vector<16x32xf32>
    %21 = tpu.matmul %0, %20, %cst_17 {dimension_numbers = #tpu.dot_dimension_numbers<[1], [0], [0], [1], [0, 0, 1, 1], [], []>} : vector<16x32xf32>, vector<32x32xf32>, vector<16x32xf32> -> vector<16x32xf32>
    %22 = vector.extract_strided_slice %9 {offsets = [2, 0], sizes = [1, 32], strides = [1, 1]} : vector<6x32xf32> to vector<1x32xf32>
    %23 = vector.broadcast %22 : vector<1x32xf32> to vector<16x32xf32>
    %24 = arith.addf %21, %23 : vector<16x32xf32>
    %cst_18 = arith.constant 0.000000e+00 : f32
    %25 = vector.broadcast %cst_18 : f32 to vector<16x32xf32>
    %26 = vector.extract_strided_slice %14 {offsets = [0, 0], sizes = [16, 8], strides = [1, 1]} : vector<16x32xf32> to vector<16x8xf32>
    %27 = vector.extract_strided_slice %19 {offsets = [0, 0], sizes = [16, 8], strides = [1, 1]} : vector<16x32xf32> to vector<16x8xf32>
    %cst_19 = arith.constant dense<0.000000e+00> : vector<16x16xf32>
    %28 = tpu.matmul %26, %27, %cst_19 {dimension_numbers = #tpu.dot_dimension_numbers<[1], [1], [0], [0], [0, 0, 1, 0], [], []>} : vector<16x8xf32>, vector<16x8xf32>, vector<16x16xf32> -> vector<16x16xf32>
    %cst_20 = arith.constant 0.353553385 : f32
    %29 = vector.broadcast %cst_20 : f32 to vector<16x16xf32>
    %30 = arith.mulf %28, %29 : vector<16x16xf32>
    %31 = arith.addf %30, %2 : vector<16x16xf32>
    %cst_21 = arith.constant dense<0xFF800000> : vector<16xf32>
    %32 = vector.multi_reduction <maximumf>, %31, %cst_21 [1] : vector<16x16xf32> to vector<16xf32>
    %33 = vector.shape_cast %32 : vector<16xf32> to vector<16x1xf32>
    %34 = vector.broadcast %33 : vector<16x1xf32> to vector<16x16xf32>
    %35 = arith.subf %31, %34 : vector<16x16xf32>
    %36 = math.exp %35 : vector<16x16xf32>
    %cst_22 = arith.constant dense<0.000000e+00> : vector<16xf32>
    %37 = vector.multi_reduction <add>, %36, %cst_22 [1] : vector<16x16xf32> to vector<16xf32>
    %38 = vector.shape_cast %37 : vector<16xf32> to vector<16x1xf32>
    %39 = vector.broadcast %38 : vector<16x1xf32> to vector<16x16xf32>
    %40 = arith.divf %36, %39 : vector<16x16xf32>
    %41 = vector.extract_strided_slice %24 {offsets = [0, 0], sizes = [16, 8], strides = [1, 1]} : vector<16x32xf32> to vector<16x8xf32>
    %cst_23 = arith.constant dense<0.000000e+00> : vector<16x8xf32>
    %42 = tpu.matmul %40, %41, %cst_23 {dimension_numbers = #tpu.dot_dimension_numbers<[1], [0], [0], [1], [0, 0, 1, 1], [], []>} : vector<16x16xf32>, vector<16x8xf32>, vector<16x8xf32> -> vector<16x8xf32>
    %43 = vector.extract_strided_slice %7 {offsets = [0, 0], sizes = [8, 32], strides = [1, 1]} : vector<32x32xf32> to vector<8x32xf32>
    %cst_24 = arith.constant dense<0.000000e+00> : vector<16x32xf32>
    %44 = tpu.matmul %42, %43, %cst_24 {dimension_numbers = #tpu.dot_dimension_numbers<[1], [0], [0], [1], [0, 0, 1, 1], [], []>} : vector<16x8xf32>, vector<8x32xf32>, vector<16x32xf32> -> vector<16x32xf32>
    %45 = arith.addf %25, %44 : vector<16x32xf32>
    %46 = vector.extract_strided_slice %14 {offsets = [0, 8], sizes = [16, 8], strides = [1, 1]} : vector<16x32xf32> to vector<16x8xf32>
    %47 = vector.extract_strided_slice %19 {offsets = [0, 8], sizes = [16, 8], strides = [1, 1]} : vector<16x32xf32> to vector<16x8xf32>
    %cst_25 = arith.constant dense<0.000000e+00> : vector<16x16xf32>
    %48 = tpu.matmul %46, %47, %cst_25 {dimension_numbers = #tpu.dot_dimension_numbers<[1], [1], [0], [0], [0, 0, 1, 0], [], []>} : vector<16x8xf32>, vector<16x8xf32>, vector<16x16xf32> -> vector<16x16xf32>
    %cst_26 = arith.constant 0.353553385 : f32
    %49 = vector.broadcast %cst_26 : f32 to vector<16x16xf32>
    %50 = arith.mulf %48, %49 : vector<16x16xf32>
    %51 = arith.addf %50, %2 : vector<16x16xf32>
    %cst_27 = arith.constant dense<0xFF800000> : vector<16xf32>
    %52 = vector.multi_reduction <maximumf>, %51, %cst_27 [1] : vector<16x16xf32> to vector<16xf32>
    %53 = vector.shape_cast %52 : vector<16xf32> to vector<16x1xf32>
    %54 = vector.broadcast %53 : vector<16x1xf32> to vector<16x16xf32>
    %55 = arith.subf %51, %54 : vector<16x16xf32>
    %56 = math.exp %55 : vector<16x16xf32>
    %cst_28 = arith.constant dense<0.000000e+00> : vector<16xf32>
    %57 = vector.multi_reduction <add>, %56, %cst_28 [1] : vector<16x16xf32> to vector<16xf32>
    %58 = vector.shape_cast %57 : vector<16xf32> to vector<16x1xf32>
    %59 = vector.broadcast %58 : vector<16x1xf32> to vector<16x16xf32>
    %60 = arith.divf %56, %59 : vector<16x16xf32>
    %61 = vector.extract_strided_slice %24 {offsets = [0, 8], sizes = [16, 8], strides = [1, 1]} : vector<16x32xf32> to vector<16x8xf32>
    %cst_29 = arith.constant dense<0.000000e+00> : vector<16x8xf32>
    %62 = tpu.matmul %60, %61, %cst_29 {dimension_numbers = #tpu.dot_dimension_numbers<[1], [0], [0], [1], [0, 0, 1, 1], [], []>} : vector<16x16xf32>, vector<16x8xf32>, vector<16x8xf32> -> vector<16x8xf32>
    %63 = vector.extract_strided_slice %7 {offsets = [8, 0], sizes = [8, 32], strides = [1, 1]} : vector<32x32xf32> to vector<8x32xf32>
    %cst_30 = arith.constant dense<0.000000e+00> : vector<16x32xf32>
    %64 = tpu.matmul %62, %63, %cst_30 {dimension_numbers = #tpu.dot_dimension_numbers<[1], [0], [0], [1], [0, 0, 1, 1], [], []>} : vector<16x8xf32>, vector<8x32xf32>, vector<16x32xf32> -> vector<16x32xf32>
    %65 = arith.addf %45, %64 : vector<16x32xf32>
    %66 = vector.extract_strided_slice %14 {offsets = [0, 16], sizes = [16, 8], strides = [1, 1]} : vector<16x32xf32> to vector<16x8xf32>
    %67 = vector.extract_strided_slice %19 {offsets = [0, 16], sizes = [16, 8], strides = [1, 1]} : vector<16x32xf32> to vector<16x8xf32>
    %cst_31 = arith.constant dense<0.000000e+00> : vector<16x16xf32>
    %68 = tpu.matmul %66, %67, %cst_31 {dimension_numbers = #tpu.dot_dimension_numbers<[1], [1], [0], [0], [0, 0, 1, 0], [], []>} : vector<16x8xf32>, vector<16x8xf32>, vector<16x16xf32> -> vector<16x16xf32>
    %cst_32 = arith.constant 0.353553385 : f32
    %69 = vector.broadcast %cst_32 : f32 to vector<16x16xf32>
    %70 = arith.mulf %68, %69 : vector<16x16xf32>
    %71 = arith.addf %70, %2 : vector<16x16xf32>
    %cst_33 = arith.constant dense<0xFF800000> : vector<16xf32>
    %72 = vector.multi_reduction <maximumf>, %71, %cst_33 [1] : vector<16x16xf32> to vector<16xf32>
    %73 = vector.shape_cast %72 : vector<16xf32> to vector<16x1xf32>
    %74 = vector.broadcast %73 : vector<16x1xf32> to vector<16x16xf32>
    %75 = arith.subf %71, %74 : vector<16x16xf32>
    %76 = math.exp %75 : vector<16x16xf32>
    %cst_34 = arith.constant dense<0.000000e+00> : vector<16xf32>
    %77 = vector.multi_reduction <add>, %76, %cst_34 [1] : vector<16x16xf32> to vector<16xf32>
    %78 = vector.shape_cast %77 : vector<16xf32> to vector<16x1xf32>
    %79 = vector.broadcast %78 : vector<16x1xf32> to vector<16x16xf32>
    %80 = arith.divf %76, %79 : vector<16x16xf32>
    %81 = vector.extract_strided_slice %24 {offsets = [0, 16], sizes = [16, 8], strides = [1, 1]} : vector<16x32xf32> to vector<16x8xf32>
    %cst_35 = arith.constant dense<0.000000e+00> : vector<16x8xf32>
    %82 = tpu.matmul %80, %81, %cst_35 {dimension_numbers = #tpu.dot_dimension_numbers<[1], [0], [0], [1], [0, 0, 1, 1], [], []>} : vector<16x16xf32>, vector<16x8xf32>, vector<16x8xf32> -> vector<16x8xf32>
    %83 = vector.extract_strided_slice %7 {offsets = [16, 0], sizes = [8, 32], strides = [1, 1]} : vector<32x32xf32> to vector<8x32xf32>
    %cst_36 = arith.constant dense<0.000000e+00> : vector<16x32xf32>
    %84 = tpu.matmul %82, %83, %cst_36 {dimension_numbers = #tpu.dot_dimension_numbers<[1], [0], [0], [1], [0, 0, 1, 1], [], []>} : vector<16x8xf32>, vector<8x32xf32>, vector<16x32xf32> -> vector<16x32xf32>
    %85 = arith.addf %65, %84 : vector<16x32xf32>
    %86 = vector.extract_strided_slice %14 {offsets = [0, 24], sizes = [16, 8], strides = [1, 1]} : vector<16x32xf32> to vector<16x8xf32>
    %87 = vector.extract_strided_slice %19 {offsets = [0, 24], sizes = [16, 8], strides = [1, 1]} : vector<16x32xf32> to vector<16x8xf32>
    %cst_37 = arith.constant dense<0.000000e+00> : vector<16x16xf32>
    %88 = tpu.matmul %86, %87, %cst_37 {dimension_numbers = #tpu.dot_dimension_numbers<[1], [1], [0], [0], [0, 0, 1, 0], [], []>} : vector<16x8xf32>, vector<16x8xf32>, vector<16x16xf32> -> vector<16x16xf32>
    %cst_38 = arith.constant 0.353553385 : f32
    %89 = vector.broadcast %cst_38 : f32 to vector<16x16xf32>
    %90 = arith.mulf %88, %89 : vector<16x16xf32>
    %91 = arith.addf %90, %2 : vector<16x16xf32>
    %cst_39 = arith.constant dense<0xFF800000> : vector<16xf32>
    %92 = vector.multi_reduction <maximumf>, %91, %cst_39 [1] : vector<16x16xf32> to vector<16xf32>
    %93 = vector.shape_cast %92 : vector<16xf32> to vector<16x1xf32>
    %94 = vector.broadcast %93 : vector<16x1xf32> to vector<16x16xf32>
    %95 = arith.subf %91, %94 : vector<16x16xf32>
    %96 = math.exp %95 : vector<16x16xf32>
    %cst_40 = arith.constant dense<0.000000e+00> : vector<16xf32>
    %97 = vector.multi_reduction <add>, %96, %cst_40 [1] : vector<16x16xf32> to vector<16xf32>
    %98 = vector.shape_cast %97 : vector<16xf32> to vector<16x1xf32>
    %99 = vector.broadcast %98 : vector<16x1xf32> to vector<16x16xf32>
    %100 = arith.divf %96, %99 : vector<16x16xf32>
    %101 = vector.extract_strided_slice %24 {offsets = [0, 24], sizes = [16, 8], strides = [1, 1]} : vector<16x32xf32> to vector<16x8xf32>
    %cst_41 = arith.constant dense<0.000000e+00> : vector<16x8xf32>
    %102 = tpu.matmul %100, %101, %cst_41 {dimension_numbers = #tpu.dot_dimension_numbers<[1], [0], [0], [1], [0, 0, 1, 1], [], []>} : vector<16x16xf32>, vector<16x8xf32>, vector<16x8xf32> -> vector<16x8xf32>
    %103 = vector.extract_strided_slice %7 {offsets = [24, 0], sizes = [8, 32], strides = [1, 1]} : vector<32x32xf32> to vector<8x32xf32>
    %cst_42 = arith.constant dense<0.000000e+00> : vector<16x32xf32>
    %104 = tpu.matmul %102, %103, %cst_42 {dimension_numbers = #tpu.dot_dimension_numbers<[1], [0], [0], [1], [0, 0, 1, 1], [], []>} : vector<16x8xf32>, vector<8x32xf32>, vector<16x32xf32> -> vector<16x32xf32>
    %105 = arith.addf %85, %104 : vector<16x32xf32>
    %106 = vector.extract_strided_slice %9 {offsets = [3, 0], sizes = [1, 32], strides = [1, 1]} : vector<6x32xf32> to vector<1x32xf32>
    %107 = vector.broadcast %106 : vector<1x32xf32> to vector<16x32xf32>
    %108 = arith.addf %105, %107 : vector<16x32xf32>
    %109 = arith.addf %108, %0 : vector<16x32xf32>
    %110 = vector.extract_strided_slice %9 {offsets = [4, 0], sizes = [1, 32], strides = [1, 1]} : vector<6x32xf32> to vector<1x32xf32>
    %111 = vector.extract_strided_slice %9 {offsets = [5, 0], sizes = [1, 32], strides = [1, 1]} : vector<6x32xf32> to vector<1x32xf32>
    %cst_43 = arith.constant dense<0.000000e+00> : vector<16xf32>
    %112 = vector.multi_reduction <add>, %109, %cst_43 [1] : vector<16x32xf32> to vector<16xf32>
    %113 = vector.shape_cast %112 : vector<16xf32> to vector<16x1xf32>
    %cst_44 = arith.constant 3.200000e+01 : f32
    %114 = vector.broadcast %cst_44 : f32 to vector<16x1xf32>
    %115 = arith.divf %113, %114 : vector<16x1xf32>
    %116 = vector.broadcast %115 : vector<16x1xf32> to vector<16x32xf32>
    %117 = arith.subf %109, %116 : vector<16x32xf32>
    %118 = arith.mulf %117, %117 : vector<16x32xf32>
    %cst_45 = arith.constant dense<0.000000e+00> : vector<16xf32>
    %119 = vector.multi_reduction <add>, %118, %cst_45 [1] : vector<16x32xf32> to vector<16xf32>
    %120 = vector.shape_cast %119 : vector<16xf32> to vector<16x1xf32>
    %cst_46 = arith.constant 3.200000e+01 : f32
    %121 = vector.broadcast %cst_46 : f32 to vector<16x1xf32>
    %122 = arith.divf %120, %121 : vector<16x1xf32>
    %123 = vector.broadcast %115 : vector<16x1xf32> to vector<16x32xf32>
    %124 = arith.subf %109, %123 : vector<16x32xf32>
    %cst_47 = arith.constant 9.99999997E-7 : f32
    %125 = vector.broadcast %cst_47 : f32 to vector<16x1xf32>
    %126 = arith.addf %122, %125 : vector<16x1xf32>
    %127 = math.rsqrt %126 : vector<16x1xf32>
    %128 = vector.broadcast %127 : vector<16x1xf32> to vector<16x32xf32>
    %129 = arith.mulf %124, %128 : vector<16x32xf32>
    %130 = vector.broadcast %110 : vector<1x32xf32> to vector<16x32xf32>
    %131 = arith.mulf %129, %130 : vector<16x32xf32>
    %132 = vector.broadcast %111 : vector<1x32xf32> to vector<16x32xf32>
    %133 = arith.addf %131, %132 : vector<16x32xf32>
    %c1 = arith.constant 1 : index
    %c0_48 = arith.constant 0 : index
    %c0_49 = arith.constant 0 : index
    %134 = vector.load %arg4[%c1, %c0_48, %c0_49] : memref<4x32x96xf32, #tpu.memory_space<vmem>>, vector<1x32x96xf32>
    %135 = vector.shape_cast %134 : vector<1x32x96xf32> to vector<32x96xf32>
    %c1_50 = arith.constant 1 : index
    %c0_51 = arith.constant 0 : index
    %c0_52 = arith.constant 0 : index
    %136 = vector.load %arg5[%c1_50, %c0_51, %c0_52] : memref<4x32x32xf32, #tpu.memory_space<vmem>>, vector<1x32x32xf32>
    %137 = vector.shape_cast %136 : vector<1x32x32xf32> to vector<32x32xf32>
    %c1_53 = arith.constant 1 : index
    %c0_54 = arith.constant 0 : index
    %c0_55 = arith.constant 0 : index
    %138 = vector.load %arg6[%c1_53, %c0_54, %c0_55] : memref<4x6x32xf32, #tpu.memory_space<vmem>>, vector<1x6x32xf32>
    %139 = vector.shape_cast %138 : vector<1x6x32xf32> to vector<6x32xf32>
    %140 = vector.extract_strided_slice %135 {offsets = [0, 0], sizes = [32, 32], strides = [1, 1]} : vector<32x96xf32> to vector<32x32xf32>
    %cst_56 = arith.constant dense<0.000000e+00> : vector<16x32xf32>
    %141 = tpu.matmul %133, %140, %cst_56 {dimension_numbers = #tpu.dot_dimension_numbers<[1], [0], [0], [1], [0, 0, 1, 1], [], []>} : vector<16x32xf32>, vector<32x32xf32>, vector<16x32xf32> -> vector<16x32xf32>
    %142 = vector.extract_strided_slice %139 {offsets = [0, 0], sizes = [1, 32], strides = [1, 1]} : vector<6x32xf32> to vector<1x32xf32>
    %143 = vector.broadcast %142 : vector<1x32xf32> to vector<16x32xf32>
    %144 = arith.addf %141, %143 : vector<16x32xf32>
    %145 = vector.extract_strided_slice %135 {offsets = [0, 32], sizes = [32, 32], strides = [1, 1]} : vector<32x96xf32> to vector<32x32xf32>
    %cst_57 = arith.constant dense<0.000000e+00> : vector<16x32xf32>
    %146 = tpu.matmul %1, %145, %cst_57 {dimension_numbers = #tpu.dot_dimension_numbers<[1], [0], [0], [1], [0, 0, 1, 1], [], []>} : vector<16x32xf32>, vector<32x32xf32>, vector<16x32xf32> -> vector<16x32xf32>
    %147 = vector.extract_strided_slice %139 {offsets = [1, 0], sizes = [1, 32], strides = [1, 1]} : vector<6x32xf32> to vector<1x32xf32>
    %148 = vector.broadcast %147 : vector<1x32xf32> to vector<16x32xf32>
    %149 = arith.addf %146, %148 : vector<16x32xf32>
    %150 = vector.extract_strided_slice %135 {offsets = [0, 64], sizes = [32, 32], strides = [1, 1]} : vector<32x96xf32> to vector<32x32xf32>
    %cst_58 = arith.constant dense<0.000000e+00> : vector<16x32xf32>
    %151 = tpu.matmul %1, %150, %cst_58 {dimension_numbers = #tpu.dot_dimension_numbers<[1], [0], [0], [1], [0, 0, 1, 1], [], []>} : vector<16x32xf32>, vector<32x32xf32>, vector<16x32xf32> -> vector<16x32xf32>
    %152 = vector.extract_strided_slice %139 {offsets = [2, 0], sizes = [1, 32], strides = [1, 1]} : vector<6x32xf32> to vector<1x32xf32>
    %153 = vector.broadcast %152 : vector<1x32xf32> to vector<16x32xf32>
    %154 = arith.addf %151, %153 : vector<16x32xf32>
    %cst_59 = arith.constant 0.000000e+00 : f32
    %155 = vector.broadcast %cst_59 : f32 to vector<16x32xf32>
    %156 = vector.extract_strided_slice %144 {offsets = [0, 0], sizes = [16, 8], strides = [1, 1]} : vector<16x32xf32> to vector<16x8xf32>
    %157 = vector.extract_strided_slice %149 {offsets = [0, 0], sizes = [16, 8], strides = [1, 1]} : vector<16x32xf32> to vector<16x8xf32>
    %cst_60 = arith.constant dense<0.000000e+00> : vector<16x16xf32>
    %158 = tpu.matmul %156, %157, %cst_60 {dimension_numbers = #tpu.dot_dimension_numbers<[1], [1], [0], [0], [0, 0, 1, 0], [], []>} : vector<16x8xf32>, vector<16x8xf32>, vector<16x16xf32> -> vector<16x16xf32>
    %cst_61 = arith.constant 0.353553385 : f32
    %159 = vector.broadcast %cst_61 : f32 to vector<16x16xf32>
    %160 = arith.mulf %158, %159 : vector<16x16xf32>
    %161 = arith.addf %160, %3 : vector<16x16xf32>
    %cst_62 = arith.constant dense<0xFF800000> : vector<16xf32>
    %162 = vector.multi_reduction <maximumf>, %161, %cst_62 [1] : vector<16x16xf32> to vector<16xf32>
    %163 = vector.shape_cast %162 : vector<16xf32> to vector<16x1xf32>
    %164 = vector.broadcast %163 : vector<16x1xf32> to vector<16x16xf32>
    %165 = arith.subf %161, %164 : vector<16x16xf32>
    %166 = math.exp %165 : vector<16x16xf32>
    %cst_63 = arith.constant dense<0.000000e+00> : vector<16xf32>
    %167 = vector.multi_reduction <add>, %166, %cst_63 [1] : vector<16x16xf32> to vector<16xf32>
    %168 = vector.shape_cast %167 : vector<16xf32> to vector<16x1xf32>
    %169 = vector.broadcast %168 : vector<16x1xf32> to vector<16x16xf32>
    %170 = arith.divf %166, %169 : vector<16x16xf32>
    %171 = vector.extract_strided_slice %154 {offsets = [0, 0], sizes = [16, 8], strides = [1, 1]} : vector<16x32xf32> to vector<16x8xf32>
    %cst_64 = arith.constant dense<0.000000e+00> : vector<16x8xf32>
    %172 = tpu.matmul %170, %171, %cst_64 {dimension_numbers = #tpu.dot_dimension_numbers<[1], [0], [0], [1], [0, 0, 1, 1], [], []>} : vector<16x16xf32>, vector<16x8xf32>, vector<16x8xf32> -> vector<16x8xf32>
    %173 = vector.extract_strided_slice %137 {offsets = [0, 0], sizes = [8, 32], strides = [1, 1]} : vector<32x32xf32> to vector<8x32xf32>
    %cst_65 = arith.constant dense<0.000000e+00> : vector<16x32xf32>
    %174 = tpu.matmul %172, %173, %cst_65 {dimension_numbers = #tpu.dot_dimension_numbers<[1], [0], [0], [1], [0, 0, 1, 1], [], []>} : vector<16x8xf32>, vector<8x32xf32>, vector<16x32xf32> -> vector<16x32xf32>
    %175 = arith.addf %155, %174 : vector<16x32xf32>
    %176 = vector.extract_strided_slice %144 {offsets = [0, 8], sizes = [16, 8], strides = [1, 1]} : vector<16x32xf32> to vector<16x8xf32>
    %177 = vector.extract_strided_slice %149 {offsets = [0, 8], sizes = [16, 8], strides = [1, 1]} : vector<16x32xf32> to vector<16x8xf32>
    %cst_66 = arith.constant dense<0.000000e+00> : vector<16x16xf32>
    %178 = tpu.matmul %176, %177, %cst_66 {dimension_numbers = #tpu.dot_dimension_numbers<[1], [1], [0], [0], [0, 0, 1, 0], [], []>} : vector<16x8xf32>, vector<16x8xf32>, vector<16x16xf32> -> vector<16x16xf32>
    %cst_67 = arith.constant 0.353553385 : f32
    %179 = vector.broadcast %cst_67 : f32 to vector<16x16xf32>
    %180 = arith.mulf %178, %179 : vector<16x16xf32>
    %181 = arith.addf %180, %3 : vector<16x16xf32>
    %cst_68 = arith.constant dense<0xFF800000> : vector<16xf32>
    %182 = vector.multi_reduction <maximumf>, %181, %cst_68 [1] : vector<16x16xf32> to vector<16xf32>
    %183 = vector.shape_cast %182 : vector<16xf32> to vector<16x1xf32>
    %184 = vector.broadcast %183 : vector<16x1xf32> to vector<16x16xf32>
    %185 = arith.subf %181, %184 : vector<16x16xf32>
    %186 = math.exp %185 : vector<16x16xf32>
    %cst_69 = arith.constant dense<0.000000e+00> : vector<16xf32>
    %187 = vector.multi_reduction <add>, %186, %cst_69 [1] : vector<16x16xf32> to vector<16xf32>
    %188 = vector.shape_cast %187 : vector<16xf32> to vector<16x1xf32>
    %189 = vector.broadcast %188 : vector<16x1xf32> to vector<16x16xf32>
    %190 = arith.divf %186, %189 : vector<16x16xf32>
    %191 = vector.extract_strided_slice %154 {offsets = [0, 8], sizes = [16, 8], strides = [1, 1]} : vector<16x32xf32> to vector<16x8xf32>
    %cst_70 = arith.constant dense<0.000000e+00> : vector<16x8xf32>
    %192 = tpu.matmul %190, %191, %cst_70 {dimension_numbers = #tpu.dot_dimension_numbers<[1], [0], [0], [1], [0, 0, 1, 1], [], []>} : vector<16x16xf32>, vector<16x8xf32>, vector<16x8xf32> -> vector<16x8xf32>
    %193 = vector.extract_strided_slice %137 {offsets = [8, 0], sizes = [8, 32], strides = [1, 1]} : vector<32x32xf32> to vector<8x32xf32>
    %cst_71 = arith.constant dense<0.000000e+00> : vector<16x32xf32>
    %194 = tpu.matmul %192, %193, %cst_71 {dimension_numbers = #tpu.dot_dimension_numbers<[1], [0], [0], [1], [0, 0, 1, 1], [], []>} : vector<16x8xf32>, vector<8x32xf32>, vector<16x32xf32> -> vector<16x32xf32>
    %195 = arith.addf %175, %194 : vector<16x32xf32>
    %196 = vector.extract_strided_slice %144 {offsets = [0, 16], sizes = [16, 8], strides = [1, 1]} : vector<16x32xf32> to vector<16x8xf32>
    %197 = vector.extract_strided_slice %149 {offsets = [0, 16], sizes = [16, 8], strides = [1, 1]} : vector<16x32xf32> to vector<16x8xf32>
    %cst_72 = arith.constant dense<0.000000e+00> : vector<16x16xf32>
    %198 = tpu.matmul %196, %197, %cst_72 {dimension_numbers = #tpu.dot_dimension_numbers<[1], [1], [0], [0], [0, 0, 1, 0], [], []>} : vector<16x8xf32>, vector<16x8xf32>, vector<16x16xf32> -> vector<16x16xf32>
    %cst_73 = arith.constant 0.353553385 : f32
    %199 = vector.broadcast %cst_73 : f32 to vector<16x16xf32>
    %200 = arith.mulf %198, %199 : vector<16x16xf32>
    %201 = arith.addf %200, %3 : vector<16x16xf32>
    %cst_74 = arith.constant dense<0xFF800000> : vector<16xf32>
    %202 = vector.multi_reduction <maximumf>, %201, %cst_74 [1] : vector<16x16xf32> to vector<16xf32>
    %203 = vector.shape_cast %202 : vector<16xf32> to vector<16x1xf32>
    %204 = vector.broadcast %203 : vector<16x1xf32> to vector<16x16xf32>
    %205 = arith.subf %201, %204 : vector<16x16xf32>
    %206 = math.exp %205 : vector<16x16xf32>
    %cst_75 = arith.constant dense<0.000000e+00> : vector<16xf32>
    %207 = vector.multi_reduction <add>, %206, %cst_75 [1] : vector<16x16xf32> to vector<16xf32>
    %208 = vector.shape_cast %207 : vector<16xf32> to vector<16x1xf32>
    %209 = vector.broadcast %208 : vector<16x1xf32> to vector<16x16xf32>
    %210 = arith.divf %206, %209 : vector<16x16xf32>
    %211 = vector.extract_strided_slice %154 {offsets = [0, 16], sizes = [16, 8], strides = [1, 1]} : vector<16x32xf32> to vector<16x8xf32>
    %cst_76 = arith.constant dense<0.000000e+00> : vector<16x8xf32>
    %212 = tpu.matmul %210, %211, %cst_76 {dimension_numbers = #tpu.dot_dimension_numbers<[1], [0], [0], [1], [0, 0, 1, 1], [], []>} : vector<16x16xf32>, vector<16x8xf32>, vector<16x8xf32> -> vector<16x8xf32>
    %213 = vector.extract_strided_slice %137 {offsets = [16, 0], sizes = [8, 32], strides = [1, 1]} : vector<32x32xf32> to vector<8x32xf32>
    %cst_77 = arith.constant dense<0.000000e+00> : vector<16x32xf32>
    %214 = tpu.matmul %212, %213, %cst_77 {dimension_numbers = #tpu.dot_dimension_numbers<[1], [0], [0], [1], [0, 0, 1, 1], [], []>} : vector<16x8xf32>, vector<8x32xf32>, vector<16x32xf32> -> vector<16x32xf32>
    %215 = arith.addf %195, %214 : vector<16x32xf32>
    %216 = vector.extract_strided_slice %144 {offsets = [0, 24], sizes = [16, 8], strides = [1, 1]} : vector<16x32xf32> to vector<16x8xf32>
    %217 = vector.extract_strided_slice %149 {offsets = [0, 24], sizes = [16, 8], strides = [1, 1]} : vector<16x32xf32> to vector<16x8xf32>
    %cst_78 = arith.constant dense<0.000000e+00> : vector<16x16xf32>
    %218 = tpu.matmul %216, %217, %cst_78 {dimension_numbers = #tpu.dot_dimension_numbers<[1], [1], [0], [0], [0, 0, 1, 0], [], []>} : vector<16x8xf32>, vector<16x8xf32>, vector<16x16xf32> -> vector<16x16xf32>
    %cst_79 = arith.constant 0.353553385 : f32
    %219 = vector.broadcast %cst_79 : f32 to vector<16x16xf32>
    %220 = arith.mulf %218, %219 : vector<16x16xf32>
    %221 = arith.addf %220, %3 : vector<16x16xf32>
    %cst_80 = arith.constant dense<0xFF800000> : vector<16xf32>
    %222 = vector.multi_reduction <maximumf>, %221, %cst_80 [1] : vector<16x16xf32> to vector<16xf32>
    %223 = vector.shape_cast %222 : vector<16xf32> to vector<16x1xf32>
    %224 = vector.broadcast %223 : vector<16x1xf32> to vector<16x16xf32>
    %225 = arith.subf %221, %224 : vector<16x16xf32>
    %226 = math.exp %225 : vector<16x16xf32>
    %cst_81 = arith.constant dense<0.000000e+00> : vector<16xf32>
    %227 = vector.multi_reduction <add>, %226, %cst_81 [1] : vector<16x16xf32> to vector<16xf32>
    %228 = vector.shape_cast %227 : vector<16xf32> to vector<16x1xf32>
    %229 = vector.broadcast %228 : vector<16x1xf32> to vector<16x16xf32>
    %230 = arith.divf %226, %229 : vector<16x16xf32>
    %231 = vector.extract_strided_slice %154 {offsets = [0, 24], sizes = [16, 8], strides = [1, 1]} : vector<16x32xf32> to vector<16x8xf32>
    %cst_82 = arith.constant dense<0.000000e+00> : vector<16x8xf32>
    %232 = tpu.matmul %230, %231, %cst_82 {dimension_numbers = #tpu.dot_dimension_numbers<[1], [0], [0], [1], [0, 0, 1, 1], [], []>} : vector<16x16xf32>, vector<16x8xf32>, vector<16x8xf32> -> vector<16x8xf32>
    %233 = vector.extract_strided_slice %137 {offsets = [24, 0], sizes = [8, 32], strides = [1, 1]} : vector<32x32xf32> to vector<8x32xf32>
    %cst_83 = arith.constant dense<0.000000e+00> : vector<16x32xf32>
    %234 = tpu.matmul %232, %233, %cst_83 {dimension_numbers = #tpu.dot_dimension_numbers<[1], [0], [0], [1], [0, 0, 1, 1], [], []>} : vector<16x8xf32>, vector<8x32xf32>, vector<16x32xf32> -> vector<16x32xf32>
    %235 = arith.addf %215, %234 : vector<16x32xf32>
    %236 = vector.extract_strided_slice %139 {offsets = [3, 0], sizes = [1, 32], strides = [1, 1]} : vector<6x32xf32> to vector<1x32xf32>
    %237 = vector.broadcast %236 : vector<1x32xf32> to vector<16x32xf32>
    %238 = arith.addf %235, %237 : vector<16x32xf32>
    %239 = arith.addf %238, %133 : vector<16x32xf32>
    %240 = vector.extract_strided_slice %139 {offsets = [4, 0], sizes = [1, 32], strides = [1, 1]} : vector<6x32xf32> to vector<1x32xf32>
    %241 = vector.extract_strided_slice %139 {offsets = [5, 0], sizes = [1, 32], strides = [1, 1]} : vector<6x32xf32> to vector<1x32xf32>
    %cst_84 = arith.constant dense<0.000000e+00> : vector<16xf32>
    %242 = vector.multi_reduction <add>, %239, %cst_84 [1] : vector<16x32xf32> to vector<16xf32>
    %243 = vector.shape_cast %242 : vector<16xf32> to vector<16x1xf32>
    %cst_85 = arith.constant 3.200000e+01 : f32
    %244 = vector.broadcast %cst_85 : f32 to vector<16x1xf32>
    %245 = arith.divf %243, %244 : vector<16x1xf32>
    %246 = vector.broadcast %245 : vector<16x1xf32> to vector<16x32xf32>
    %247 = arith.subf %239, %246 : vector<16x32xf32>
    %248 = arith.mulf %247, %247 : vector<16x32xf32>
    %cst_86 = arith.constant dense<0.000000e+00> : vector<16xf32>
    %249 = vector.multi_reduction <add>, %248, %cst_86 [1] : vector<16x32xf32> to vector<16xf32>
    %250 = vector.shape_cast %249 : vector<16xf32> to vector<16x1xf32>
    %cst_87 = arith.constant 3.200000e+01 : f32
    %251 = vector.broadcast %cst_87 : f32 to vector<16x1xf32>
    %252 = arith.divf %250, %251 : vector<16x1xf32>
    %253 = vector.broadcast %245 : vector<16x1xf32> to vector<16x32xf32>
    %254 = arith.subf %239, %253 : vector<16x32xf32>
    %cst_88 = arith.constant 9.99999997E-7 : f32
    %255 = vector.broadcast %cst_88 : f32 to vector<16x1xf32>
    %256 = arith.addf %252, %255 : vector<16x1xf32>
    %257 = math.rsqrt %256 : vector<16x1xf32>
    %258 = vector.broadcast %257 : vector<16x1xf32> to vector<16x32xf32>
    %259 = arith.mulf %254, %258 : vector<16x32xf32>
    %260 = vector.broadcast %240 : vector<1x32xf32> to vector<16x32xf32>
    %261 = arith.mulf %259, %260 : vector<16x32xf32>
    %262 = vector.broadcast %241 : vector<1x32xf32> to vector<16x32xf32>
    %263 = arith.addf %261, %262 : vector<16x32xf32>
    %c0_89 = arith.constant 0 : index
    %c0_90 = arith.constant 0 : index
    %c0_91 = arith.constant 0 : index
    %264 = vector.load %arg7[%c0_89, %c0_90, %c0_91] : memref<2x32x64xf32, #tpu.memory_space<vmem>>, vector<1x32x64xf32>
    %265 = vector.shape_cast %264 : vector<1x32x64xf32> to vector<32x64xf32>
    %cst_92 = arith.constant dense<0.000000e+00> : vector<16x64xf32>
    %266 = tpu.matmul %263, %265, %cst_92 {dimension_numbers = #tpu.dot_dimension_numbers<[1], [0], [0], [1], [0, 0, 1, 1], [], []>} : vector<16x32xf32>, vector<32x64xf32>, vector<16x64xf32> -> vector<16x64xf32>
    %c0_93 = arith.constant 0 : index
    %c0_94 = arith.constant 0 : index
    %c0_95 = arith.constant 0 : index
    %267 = vector.load %arg9[%c0_93, %c0_94, %c0_95] : memref<2x1x64xf32, #tpu.memory_space<vmem>>, vector<1x1x64xf32>
    %268 = vector.shape_cast %267 : vector<1x1x64xf32> to vector<1x64xf32>
    %269 = vector.broadcast %268 : vector<1x64xf32> to vector<16x64xf32>
    %270 = arith.addf %266, %269 : vector<16x64xf32>
    %cst_96 = arith.constant 0.000000e+00 : f32
    %271 = vector.broadcast %cst_96 : f32 to vector<16x64xf32>
    %272 = arith.maximumf %270, %271 : vector<16x64xf32>
    %c0_97 = arith.constant 0 : index
    %c0_98 = arith.constant 0 : index
    %c0_99 = arith.constant 0 : index
    %273 = vector.load %arg10[%c0_97, %c0_98, %c0_99] : memref<2x3x32xf32, #tpu.memory_space<vmem>>, vector<1x3x32xf32>
    %274 = vector.shape_cast %273 : vector<1x3x32xf32> to vector<3x32xf32>
    %c0_100 = arith.constant 0 : index
    %c0_101 = arith.constant 0 : index
    %c0_102 = arith.constant 0 : index
    %275 = vector.load %arg8[%c0_100, %c0_101, %c0_102] : memref<2x64x32xf32, #tpu.memory_space<vmem>>, vector<1x64x32xf32>
    %276 = vector.shape_cast %275 : vector<1x64x32xf32> to vector<64x32xf32>
    %cst_103 = arith.constant dense<0.000000e+00> : vector<16x32xf32>
    %277 = tpu.matmul %272, %276, %cst_103 {dimension_numbers = #tpu.dot_dimension_numbers<[1], [0], [0], [1], [0, 0, 1, 1], [], []>} : vector<16x64xf32>, vector<64x32xf32>, vector<16x32xf32> -> vector<16x32xf32>
    %278 = vector.extract_strided_slice %274 {offsets = [0, 0], sizes = [1, 32], strides = [1, 1]} : vector<3x32xf32> to vector<1x32xf32>
    %279 = vector.broadcast %278 : vector<1x32xf32> to vector<16x32xf32>
    %280 = arith.addf %277, %279 : vector<16x32xf32>
    %281 = arith.addf %280, %263 : vector<16x32xf32>
    %282 = vector.extract_strided_slice %274 {offsets = [1, 0], sizes = [1, 32], strides = [1, 1]} : vector<3x32xf32> to vector<1x32xf32>
    %283 = vector.extract_strided_slice %274 {offsets = [2, 0], sizes = [1, 32], strides = [1, 1]} : vector<3x32xf32> to vector<1x32xf32>
    %cst_104 = arith.constant dense<0.000000e+00> : vector<16xf32>
    %284 = vector.multi_reduction <add>, %281, %cst_104 [1] : vector<16x32xf32> to vector<16xf32>
    %285 = vector.shape_cast %284 : vector<16xf32> to vector<16x1xf32>
    %cst_105 = arith.constant 3.200000e+01 : f32
    %286 = vector.broadcast %cst_105 : f32 to vector<16x1xf32>
    %287 = arith.divf %285, %286 : vector<16x1xf32>
    %288 = vector.broadcast %287 : vector<16x1xf32> to vector<16x32xf32>
    %289 = arith.subf %281, %288 : vector<16x32xf32>
    %290 = arith.mulf %289, %289 : vector<16x32xf32>
    %cst_106 = arith.constant dense<0.000000e+00> : vector<16xf32>
    %291 = vector.multi_reduction <add>, %290, %cst_106 [1] : vector<16x32xf32> to vector<16xf32>
    %292 = vector.shape_cast %291 : vector<16xf32> to vector<16x1xf32>
    %cst_107 = arith.constant 3.200000e+01 : f32
    %293 = vector.broadcast %cst_107 : f32 to vector<16x1xf32>
    %294 = arith.divf %292, %293 : vector<16x1xf32>
    %295 = vector.broadcast %287 : vector<16x1xf32> to vector<16x32xf32>
    %296 = arith.subf %281, %295 : vector<16x32xf32>
    %cst_108 = arith.constant 9.99999997E-7 : f32
    %297 = vector.broadcast %cst_108 : f32 to vector<16x1xf32>
    %298 = arith.addf %294, %297 : vector<16x1xf32>
    %299 = math.rsqrt %298 : vector<16x1xf32>
    %300 = vector.broadcast %299 : vector<16x1xf32> to vector<16x32xf32>
    %301 = arith.mulf %296, %300 : vector<16x32xf32>
    %302 = vector.broadcast %282 : vector<1x32xf32> to vector<16x32xf32>
    %303 = arith.mulf %301, %302 : vector<16x32xf32>
    %304 = vector.broadcast %283 : vector<1x32xf32> to vector<16x32xf32>
    %305 = arith.addf %303, %304 : vector<16x32xf32>
    %c2 = arith.constant 2 : index
    %c0_109 = arith.constant 0 : index
    %c0_110 = arith.constant 0 : index
    %306 = vector.load %arg4[%c2, %c0_109, %c0_110] : memref<4x32x96xf32, #tpu.memory_space<vmem>>, vector<1x32x96xf32>
    %307 = vector.shape_cast %306 : vector<1x32x96xf32> to vector<32x96xf32>
    %c2_111 = arith.constant 2 : index
    %c0_112 = arith.constant 0 : index
    %c0_113 = arith.constant 0 : index
    %308 = vector.load %arg5[%c2_111, %c0_112, %c0_113] : memref<4x32x32xf32, #tpu.memory_space<vmem>>, vector<1x32x32xf32>
    %309 = vector.shape_cast %308 : vector<1x32x32xf32> to vector<32x32xf32>
    %c2_114 = arith.constant 2 : index
    %c0_115 = arith.constant 0 : index
    %c0_116 = arith.constant 0 : index
    %310 = vector.load %arg6[%c2_114, %c0_115, %c0_116] : memref<4x6x32xf32, #tpu.memory_space<vmem>>, vector<1x6x32xf32>
    %311 = vector.shape_cast %310 : vector<1x6x32xf32> to vector<6x32xf32>
    %312 = vector.extract_strided_slice %307 {offsets = [0, 0], sizes = [32, 32], strides = [1, 1]} : vector<32x96xf32> to vector<32x32xf32>
    %cst_117 = arith.constant dense<0.000000e+00> : vector<16x32xf32>
    %313 = tpu.matmul %305, %312, %cst_117 {dimension_numbers = #tpu.dot_dimension_numbers<[1], [0], [0], [1], [0, 0, 1, 1], [], []>} : vector<16x32xf32>, vector<32x32xf32>, vector<16x32xf32> -> vector<16x32xf32>
    %314 = vector.extract_strided_slice %311 {offsets = [0, 0], sizes = [1, 32], strides = [1, 1]} : vector<6x32xf32> to vector<1x32xf32>
    %315 = vector.broadcast %314 : vector<1x32xf32> to vector<16x32xf32>
    %316 = arith.addf %313, %315 : vector<16x32xf32>
    %317 = vector.extract_strided_slice %307 {offsets = [0, 32], sizes = [32, 32], strides = [1, 1]} : vector<32x96xf32> to vector<32x32xf32>
    %cst_118 = arith.constant dense<0.000000e+00> : vector<16x32xf32>
    %318 = tpu.matmul %305, %317, %cst_118 {dimension_numbers = #tpu.dot_dimension_numbers<[1], [0], [0], [1], [0, 0, 1, 1], [], []>} : vector<16x32xf32>, vector<32x32xf32>, vector<16x32xf32> -> vector<16x32xf32>
    %319 = vector.extract_strided_slice %311 {offsets = [1, 0], sizes = [1, 32], strides = [1, 1]} : vector<6x32xf32> to vector<1x32xf32>
    %320 = vector.broadcast %319 : vector<1x32xf32> to vector<16x32xf32>
    %321 = arith.addf %318, %320 : vector<16x32xf32>
    %322 = vector.extract_strided_slice %307 {offsets = [0, 64], sizes = [32, 32], strides = [1, 1]} : vector<32x96xf32> to vector<32x32xf32>
    %cst_119 = arith.constant dense<0.000000e+00> : vector<16x32xf32>
    %323 = tpu.matmul %305, %322, %cst_119 {dimension_numbers = #tpu.dot_dimension_numbers<[1], [0], [0], [1], [0, 0, 1, 1], [], []>} : vector<16x32xf32>, vector<32x32xf32>, vector<16x32xf32> -> vector<16x32xf32>
    %324 = vector.extract_strided_slice %311 {offsets = [2, 0], sizes = [1, 32], strides = [1, 1]} : vector<6x32xf32> to vector<1x32xf32>
    %325 = vector.broadcast %324 : vector<1x32xf32> to vector<16x32xf32>
    %326 = arith.addf %323, %325 : vector<16x32xf32>
    %cst_120 = arith.constant 0.000000e+00 : f32
    %327 = vector.broadcast %cst_120 : f32 to vector<16x32xf32>
    %328 = vector.extract_strided_slice %316 {offsets = [0, 0], sizes = [16, 8], strides = [1, 1]} : vector<16x32xf32> to vector<16x8xf32>
    %329 = vector.extract_strided_slice %321 {offsets = [0, 0], sizes = [16, 8], strides = [1, 1]} : vector<16x32xf32> to vector<16x8xf32>
    %cst_121 = arith.constant dense<0.000000e+00> : vector<16x16xf32>
    %330 = tpu.matmul %328, %329, %cst_121 {dimension_numbers = #tpu.dot_dimension_numbers<[1], [1], [0], [0], [0, 0, 1, 0], [], []>} : vector<16x8xf32>, vector<16x8xf32>, vector<16x16xf32> -> vector<16x16xf32>
    %cst_122 = arith.constant 0.353553385 : f32
    %331 = vector.broadcast %cst_122 : f32 to vector<16x16xf32>
    %332 = arith.mulf %330, %331 : vector<16x16xf32>
    %333 = arith.addf %332, %2 : vector<16x16xf32>
    %cst_123 = arith.constant dense<0xFF800000> : vector<16xf32>
    %334 = vector.multi_reduction <maximumf>, %333, %cst_123 [1] : vector<16x16xf32> to vector<16xf32>
    %335 = vector.shape_cast %334 : vector<16xf32> to vector<16x1xf32>
    %336 = vector.broadcast %335 : vector<16x1xf32> to vector<16x16xf32>
    %337 = arith.subf %333, %336 : vector<16x16xf32>
    %338 = math.exp %337 : vector<16x16xf32>
    %cst_124 = arith.constant dense<0.000000e+00> : vector<16xf32>
    %339 = vector.multi_reduction <add>, %338, %cst_124 [1] : vector<16x16xf32> to vector<16xf32>
    %340 = vector.shape_cast %339 : vector<16xf32> to vector<16x1xf32>
    %341 = vector.broadcast %340 : vector<16x1xf32> to vector<16x16xf32>
    %342 = arith.divf %338, %341 : vector<16x16xf32>
    %343 = vector.extract_strided_slice %326 {offsets = [0, 0], sizes = [16, 8], strides = [1, 1]} : vector<16x32xf32> to vector<16x8xf32>
    %cst_125 = arith.constant dense<0.000000e+00> : vector<16x8xf32>
    %344 = tpu.matmul %342, %343, %cst_125 {dimension_numbers = #tpu.dot_dimension_numbers<[1], [0], [0], [1], [0, 0, 1, 1], [], []>} : vector<16x16xf32>, vector<16x8xf32>, vector<16x8xf32> -> vector<16x8xf32>
    %345 = vector.extract_strided_slice %309 {offsets = [0, 0], sizes = [8, 32], strides = [1, 1]} : vector<32x32xf32> to vector<8x32xf32>
    %cst_126 = arith.constant dense<0.000000e+00> : vector<16x32xf32>
    %346 = tpu.matmul %344, %345, %cst_126 {dimension_numbers = #tpu.dot_dimension_numbers<[1], [0], [0], [1], [0, 0, 1, 1], [], []>} : vector<16x8xf32>, vector<8x32xf32>, vector<16x32xf32> -> vector<16x32xf32>
    %347 = arith.addf %327, %346 : vector<16x32xf32>
    %348 = vector.extract_strided_slice %316 {offsets = [0, 8], sizes = [16, 8], strides = [1, 1]} : vector<16x32xf32> to vector<16x8xf32>
    %349 = vector.extract_strided_slice %321 {offsets = [0, 8], sizes = [16, 8], strides = [1, 1]} : vector<16x32xf32> to vector<16x8xf32>
    %cst_127 = arith.constant dense<0.000000e+00> : vector<16x16xf32>
    %350 = tpu.matmul %348, %349, %cst_127 {dimension_numbers = #tpu.dot_dimension_numbers<[1], [1], [0], [0], [0, 0, 1, 0], [], []>} : vector<16x8xf32>, vector<16x8xf32>, vector<16x16xf32> -> vector<16x16xf32>
    %cst_128 = arith.constant 0.353553385 : f32
    %351 = vector.broadcast %cst_128 : f32 to vector<16x16xf32>
    %352 = arith.mulf %350, %351 : vector<16x16xf32>
    %353 = arith.addf %352, %2 : vector<16x16xf32>
    %cst_129 = arith.constant dense<0xFF800000> : vector<16xf32>
    %354 = vector.multi_reduction <maximumf>, %353, %cst_129 [1] : vector<16x16xf32> to vector<16xf32>
    %355 = vector.shape_cast %354 : vector<16xf32> to vector<16x1xf32>
    %356 = vector.broadcast %355 : vector<16x1xf32> to vector<16x16xf32>
    %357 = arith.subf %353, %356 : vector<16x16xf32>
    %358 = math.exp %357 : vector<16x16xf32>
    %cst_130 = arith.constant dense<0.000000e+00> : vector<16xf32>
    %359 = vector.multi_reduction <add>, %358, %cst_130 [1] : vector<16x16xf32> to vector<16xf32>
    %360 = vector.shape_cast %359 : vector<16xf32> to vector<16x1xf32>
    %361 = vector.broadcast %360 : vector<16x1xf32> to vector<16x16xf32>
    %362 = arith.divf %358, %361 : vector<16x16xf32>
    %363 = vector.extract_strided_slice %326 {offsets = [0, 8], sizes = [16, 8], strides = [1, 1]} : vector<16x32xf32> to vector<16x8xf32>
    %cst_131 = arith.constant dense<0.000000e+00> : vector<16x8xf32>
    %364 = tpu.matmul %362, %363, %cst_131 {dimension_numbers = #tpu.dot_dimension_numbers<[1], [0], [0], [1], [0, 0, 1, 1], [], []>} : vector<16x16xf32>, vector<16x8xf32>, vector<16x8xf32> -> vector<16x8xf32>
    %365 = vector.extract_strided_slice %309 {offsets = [8, 0], sizes = [8, 32], strides = [1, 1]} : vector<32x32xf32> to vector<8x32xf32>
    %cst_132 = arith.constant dense<0.000000e+00> : vector<16x32xf32>
    %366 = tpu.matmul %364, %365, %cst_132 {dimension_numbers = #tpu.dot_dimension_numbers<[1], [0], [0], [1], [0, 0, 1, 1], [], []>} : vector<16x8xf32>, vector<8x32xf32>, vector<16x32xf32> -> vector<16x32xf32>
    %367 = arith.addf %347, %366 : vector<16x32xf32>
    %368 = vector.extract_strided_slice %316 {offsets = [0, 16], sizes = [16, 8], strides = [1, 1]} : vector<16x32xf32> to vector<16x8xf32>
    %369 = vector.extract_strided_slice %321 {offsets = [0, 16], sizes = [16, 8], strides = [1, 1]} : vector<16x32xf32> to vector<16x8xf32>
    %cst_133 = arith.constant dense<0.000000e+00> : vector<16x16xf32>
    %370 = tpu.matmul %368, %369, %cst_133 {dimension_numbers = #tpu.dot_dimension_numbers<[1], [1], [0], [0], [0, 0, 1, 0], [], []>} : vector<16x8xf32>, vector<16x8xf32>, vector<16x16xf32> -> vector<16x16xf32>
    %cst_134 = arith.constant 0.353553385 : f32
    %371 = vector.broadcast %cst_134 : f32 to vector<16x16xf32>
    %372 = arith.mulf %370, %371 : vector<16x16xf32>
    %373 = arith.addf %372, %2 : vector<16x16xf32>
    %cst_135 = arith.constant dense<0xFF800000> : vector<16xf32>
    %374 = vector.multi_reduction <maximumf>, %373, %cst_135 [1] : vector<16x16xf32> to vector<16xf32>
    %375 = vector.shape_cast %374 : vector<16xf32> to vector<16x1xf32>
    %376 = vector.broadcast %375 : vector<16x1xf32> to vector<16x16xf32>
    %377 = arith.subf %373, %376 : vector<16x16xf32>
    %378 = math.exp %377 : vector<16x16xf32>
    %cst_136 = arith.constant dense<0.000000e+00> : vector<16xf32>
    %379 = vector.multi_reduction <add>, %378, %cst_136 [1] : vector<16x16xf32> to vector<16xf32>
    %380 = vector.shape_cast %379 : vector<16xf32> to vector<16x1xf32>
    %381 = vector.broadcast %380 : vector<16x1xf32> to vector<16x16xf32>
    %382 = arith.divf %378, %381 : vector<16x16xf32>
    %383 = vector.extract_strided_slice %326 {offsets = [0, 16], sizes = [16, 8], strides = [1, 1]} : vector<16x32xf32> to vector<16x8xf32>
    %cst_137 = arith.constant dense<0.000000e+00> : vector<16x8xf32>
    %384 = tpu.matmul %382, %383, %cst_137 {dimension_numbers = #tpu.dot_dimension_numbers<[1], [0], [0], [1], [0, 0, 1, 1], [], []>} : vector<16x16xf32>, vector<16x8xf32>, vector<16x8xf32> -> vector<16x8xf32>
    %385 = vector.extract_strided_slice %309 {offsets = [16, 0], sizes = [8, 32], strides = [1, 1]} : vector<32x32xf32> to vector<8x32xf32>
    %cst_138 = arith.constant dense<0.000000e+00> : vector<16x32xf32>
    %386 = tpu.matmul %384, %385, %cst_138 {dimension_numbers = #tpu.dot_dimension_numbers<[1], [0], [0], [1], [0, 0, 1, 1], [], []>} : vector<16x8xf32>, vector<8x32xf32>, vector<16x32xf32> -> vector<16x32xf32>
    %387 = arith.addf %367, %386 : vector<16x32xf32>
    %388 = vector.extract_strided_slice %316 {offsets = [0, 24], sizes = [16, 8], strides = [1, 1]} : vector<16x32xf32> to vector<16x8xf32>
    %389 = vector.extract_strided_slice %321 {offsets = [0, 24], sizes = [16, 8], strides = [1, 1]} : vector<16x32xf32> to vector<16x8xf32>
    %cst_139 = arith.constant dense<0.000000e+00> : vector<16x16xf32>
    %390 = tpu.matmul %388, %389, %cst_139 {dimension_numbers = #tpu.dot_dimension_numbers<[1], [1], [0], [0], [0, 0, 1, 0], [], []>} : vector<16x8xf32>, vector<16x8xf32>, vector<16x16xf32> -> vector<16x16xf32>
    %cst_140 = arith.constant 0.353553385 : f32
    %391 = vector.broadcast %cst_140 : f32 to vector<16x16xf32>
    %392 = arith.mulf %390, %391 : vector<16x16xf32>
    %393 = arith.addf %392, %2 : vector<16x16xf32>
    %cst_141 = arith.constant dense<0xFF800000> : vector<16xf32>
    %394 = vector.multi_reduction <maximumf>, %393, %cst_141 [1] : vector<16x16xf32> to vector<16xf32>
    %395 = vector.shape_cast %394 : vector<16xf32> to vector<16x1xf32>
    %396 = vector.broadcast %395 : vector<16x1xf32> to vector<16x16xf32>
    %397 = arith.subf %393, %396 : vector<16x16xf32>
    %398 = math.exp %397 : vector<16x16xf32>
    %cst_142 = arith.constant dense<0.000000e+00> : vector<16xf32>
    %399 = vector.multi_reduction <add>, %398, %cst_142 [1] : vector<16x16xf32> to vector<16xf32>
    %400 = vector.shape_cast %399 : vector<16xf32> to vector<16x1xf32>
    %401 = vector.broadcast %400 : vector<16x1xf32> to vector<16x16xf32>
    %402 = arith.divf %398, %401 : vector<16x16xf32>
    %403 = vector.extract_strided_slice %326 {offsets = [0, 24], sizes = [16, 8], strides = [1, 1]} : vector<16x32xf32> to vector<16x8xf32>
    %cst_143 = arith.constant dense<0.000000e+00> : vector<16x8xf32>
    %404 = tpu.matmul %402, %403, %cst_143 {dimension_numbers = #tpu.dot_dimension_numbers<[1], [0], [0], [1], [0, 0, 1, 1], [], []>} : vector<16x16xf32>, vector<16x8xf32>, vector<16x8xf32> -> vector<16x8xf32>
    %405 = vector.extract_strided_slice %309 {offsets = [24, 0], sizes = [8, 32], strides = [1, 1]} : vector<32x32xf32> to vector<8x32xf32>
    %cst_144 = arith.constant dense<0.000000e+00> : vector<16x32xf32>
    %406 = tpu.matmul %404, %405, %cst_144 {dimension_numbers = #tpu.dot_dimension_numbers<[1], [0], [0], [1], [0, 0, 1, 1], [], []>} : vector<16x8xf32>, vector<8x32xf32>, vector<16x32xf32> -> vector<16x32xf32>
    %407 = arith.addf %387, %406 : vector<16x32xf32>
    %408 = vector.extract_strided_slice %311 {offsets = [3, 0], sizes = [1, 32], strides = [1, 1]} : vector<6x32xf32> to vector<1x32xf32>
    %409 = vector.broadcast %408 : vector<1x32xf32> to vector<16x32xf32>
    %410 = arith.addf %407, %409 : vector<16x32xf32>
    %411 = arith.addf %410, %305 : vector<16x32xf32>
    %412 = vector.extract_strided_slice %311 {offsets = [4, 0], sizes = [1, 32], strides = [1, 1]} : vector<6x32xf32> to vector<1x32xf32>
    %413 = vector.extract_strided_slice %311 {offsets = [5, 0], sizes = [1, 32], strides = [1, 1]} : vector<6x32xf32> to vector<1x32xf32>
    %cst_145 = arith.constant dense<0.000000e+00> : vector<16xf32>
    %414 = vector.multi_reduction <add>, %411, %cst_145 [1] : vector<16x32xf32> to vector<16xf32>
    %415 = vector.shape_cast %414 : vector<16xf32> to vector<16x1xf32>
    %cst_146 = arith.constant 3.200000e+01 : f32
    %416 = vector.broadcast %cst_146 : f32 to vector<16x1xf32>
    %417 = arith.divf %415, %416 : vector<16x1xf32>
    %418 = vector.broadcast %417 : vector<16x1xf32> to vector<16x32xf32>
    %419 = arith.subf %411, %418 : vector<16x32xf32>
    %420 = arith.mulf %419, %419 : vector<16x32xf32>
    %cst_147 = arith.constant dense<0.000000e+00> : vector<16xf32>
    %421 = vector.multi_reduction <add>, %420, %cst_147 [1] : vector<16x32xf32> to vector<16xf32>
    %422 = vector.shape_cast %421 : vector<16xf32> to vector<16x1xf32>
    %cst_148 = arith.constant 3.200000e+01 : f32
    %423 = vector.broadcast %cst_148 : f32 to vector<16x1xf32>
    %424 = arith.divf %422, %423 : vector<16x1xf32>
    %425 = vector.broadcast %417 : vector<16x1xf32> to vector<16x32xf32>
    %426 = arith.subf %411, %425 : vector<16x32xf32>
    %cst_149 = arith.constant 9.99999997E-7 : f32
    %427 = vector.broadcast %cst_149 : f32 to vector<16x1xf32>
    %428 = arith.addf %424, %427 : vector<16x1xf32>
    %429 = math.rsqrt %428 : vector<16x1xf32>
    %430 = vector.broadcast %429 : vector<16x1xf32> to vector<16x32xf32>
    %431 = arith.mulf %426, %430 : vector<16x32xf32>
    %432 = vector.broadcast %412 : vector<1x32xf32> to vector<16x32xf32>
    %433 = arith.mulf %431, %432 : vector<16x32xf32>
    %434 = vector.broadcast %413 : vector<1x32xf32> to vector<16x32xf32>
    %435 = arith.addf %433, %434 : vector<16x32xf32>
    %c3 = arith.constant 3 : index
    %c0_150 = arith.constant 0 : index
    %c0_151 = arith.constant 0 : index
    %436 = vector.load %arg4[%c3, %c0_150, %c0_151] : memref<4x32x96xf32, #tpu.memory_space<vmem>>, vector<1x32x96xf32>
    %437 = vector.shape_cast %436 : vector<1x32x96xf32> to vector<32x96xf32>
    %c3_152 = arith.constant 3 : index
    %c0_153 = arith.constant 0 : index
    %c0_154 = arith.constant 0 : index
    %438 = vector.load %arg5[%c3_152, %c0_153, %c0_154] : memref<4x32x32xf32, #tpu.memory_space<vmem>>, vector<1x32x32xf32>
    %439 = vector.shape_cast %438 : vector<1x32x32xf32> to vector<32x32xf32>
    %c3_155 = arith.constant 3 : index
    %c0_156 = arith.constant 0 : index
    %c0_157 = arith.constant 0 : index
    %440 = vector.load %arg6[%c3_155, %c0_156, %c0_157] : memref<4x6x32xf32, #tpu.memory_space<vmem>>, vector<1x6x32xf32>
    %441 = vector.shape_cast %440 : vector<1x6x32xf32> to vector<6x32xf32>
    %442 = vector.extract_strided_slice %437 {offsets = [0, 0], sizes = [32, 32], strides = [1, 1]} : vector<32x96xf32> to vector<32x32xf32>
    %cst_158 = arith.constant dense<0.000000e+00> : vector<16x32xf32>
    %443 = tpu.matmul %435, %442, %cst_158 {dimension_numbers = #tpu.dot_dimension_numbers<[1], [0], [0], [1], [0, 0, 1, 1], [], []>} : vector<16x32xf32>, vector<32x32xf32>, vector<16x32xf32> -> vector<16x32xf32>
    %444 = vector.extract_strided_slice %441 {offsets = [0, 0], sizes = [1, 32], strides = [1, 1]} : vector<6x32xf32> to vector<1x32xf32>
    %445 = vector.broadcast %444 : vector<1x32xf32> to vector<16x32xf32>
    %446 = arith.addf %443, %445 : vector<16x32xf32>
    %447 = vector.extract_strided_slice %437 {offsets = [0, 32], sizes = [32, 32], strides = [1, 1]} : vector<32x96xf32> to vector<32x32xf32>
    %cst_159 = arith.constant dense<0.000000e+00> : vector<16x32xf32>
    %448 = tpu.matmul %1, %447, %cst_159 {dimension_numbers = #tpu.dot_dimension_numbers<[1], [0], [0], [1], [0, 0, 1, 1], [], []>} : vector<16x32xf32>, vector<32x32xf32>, vector<16x32xf32> -> vector<16x32xf32>
    %449 = vector.extract_strided_slice %441 {offsets = [1, 0], sizes = [1, 32], strides = [1, 1]} : vector<6x32xf32> to vector<1x32xf32>
    %450 = vector.broadcast %449 : vector<1x32xf32> to vector<16x32xf32>
    %451 = arith.addf %448, %450 : vector<16x32xf32>
    %452 = vector.extract_strided_slice %437 {offsets = [0, 64], sizes = [32, 32], strides = [1, 1]} : vector<32x96xf32> to vector<32x32xf32>
    %cst_160 = arith.constant dense<0.000000e+00> : vector<16x32xf32>
    %453 = tpu.matmul %1, %452, %cst_160 {dimension_numbers = #tpu.dot_dimension_numbers<[1], [0], [0], [1], [0, 0, 1, 1], [], []>} : vector<16x32xf32>, vector<32x32xf32>, vector<16x32xf32> -> vector<16x32xf32>
    %454 = vector.extract_strided_slice %441 {offsets = [2, 0], sizes = [1, 32], strides = [1, 1]} : vector<6x32xf32> to vector<1x32xf32>
    %455 = vector.broadcast %454 : vector<1x32xf32> to vector<16x32xf32>
    %456 = arith.addf %453, %455 : vector<16x32xf32>
    %cst_161 = arith.constant 0.000000e+00 : f32
    %457 = vector.broadcast %cst_161 : f32 to vector<16x32xf32>
    %458 = vector.extract_strided_slice %446 {offsets = [0, 0], sizes = [16, 8], strides = [1, 1]} : vector<16x32xf32> to vector<16x8xf32>
    %459 = vector.extract_strided_slice %451 {offsets = [0, 0], sizes = [16, 8], strides = [1, 1]} : vector<16x32xf32> to vector<16x8xf32>
    %cst_162 = arith.constant dense<0.000000e+00> : vector<16x16xf32>
    %460 = tpu.matmul %458, %459, %cst_162 {dimension_numbers = #tpu.dot_dimension_numbers<[1], [1], [0], [0], [0, 0, 1, 0], [], []>} : vector<16x8xf32>, vector<16x8xf32>, vector<16x16xf32> -> vector<16x16xf32>
    %cst_163 = arith.constant 0.353553385 : f32
    %461 = vector.broadcast %cst_163 : f32 to vector<16x16xf32>
    %462 = arith.mulf %460, %461 : vector<16x16xf32>
    %463 = arith.addf %462, %3 : vector<16x16xf32>
    %cst_164 = arith.constant dense<0xFF800000> : vector<16xf32>
    %464 = vector.multi_reduction <maximumf>, %463, %cst_164 [1] : vector<16x16xf32> to vector<16xf32>
    %465 = vector.shape_cast %464 : vector<16xf32> to vector<16x1xf32>
    %466 = vector.broadcast %465 : vector<16x1xf32> to vector<16x16xf32>
    %467 = arith.subf %463, %466 : vector<16x16xf32>
    %468 = math.exp %467 : vector<16x16xf32>
    %cst_165 = arith.constant dense<0.000000e+00> : vector<16xf32>
    %469 = vector.multi_reduction <add>, %468, %cst_165 [1] : vector<16x16xf32> to vector<16xf32>
    %470 = vector.shape_cast %469 : vector<16xf32> to vector<16x1xf32>
    %471 = vector.broadcast %470 : vector<16x1xf32> to vector<16x16xf32>
    %472 = arith.divf %468, %471 : vector<16x16xf32>
    %473 = vector.extract_strided_slice %456 {offsets = [0, 0], sizes = [16, 8], strides = [1, 1]} : vector<16x32xf32> to vector<16x8xf32>
    %cst_166 = arith.constant dense<0.000000e+00> : vector<16x8xf32>
    %474 = tpu.matmul %472, %473, %cst_166 {dimension_numbers = #tpu.dot_dimension_numbers<[1], [0], [0], [1], [0, 0, 1, 1], [], []>} : vector<16x16xf32>, vector<16x8xf32>, vector<16x8xf32> -> vector<16x8xf32>
    %475 = vector.extract_strided_slice %439 {offsets = [0, 0], sizes = [8, 32], strides = [1, 1]} : vector<32x32xf32> to vector<8x32xf32>
    %cst_167 = arith.constant dense<0.000000e+00> : vector<16x32xf32>
    %476 = tpu.matmul %474, %475, %cst_167 {dimension_numbers = #tpu.dot_dimension_numbers<[1], [0], [0], [1], [0, 0, 1, 1], [], []>} : vector<16x8xf32>, vector<8x32xf32>, vector<16x32xf32> -> vector<16x32xf32>
    %477 = arith.addf %457, %476 : vector<16x32xf32>
    %478 = vector.extract_strided_slice %446 {offsets = [0, 8], sizes = [16, 8], strides = [1, 1]} : vector<16x32xf32> to vector<16x8xf32>
    %479 = vector.extract_strided_slice %451 {offsets = [0, 8], sizes = [16, 8], strides = [1, 1]} : vector<16x32xf32> to vector<16x8xf32>
    %cst_168 = arith.constant dense<0.000000e+00> : vector<16x16xf32>
    %480 = tpu.matmul %478, %479, %cst_168 {dimension_numbers = #tpu.dot_dimension_numbers<[1], [1], [0], [0], [0, 0, 1, 0], [], []>} : vector<16x8xf32>, vector<16x8xf32>, vector<16x16xf32> -> vector<16x16xf32>
    %cst_169 = arith.constant 0.353553385 : f32
    %481 = vector.broadcast %cst_169 : f32 to vector<16x16xf32>
    %482 = arith.mulf %480, %481 : vector<16x16xf32>
    %483 = arith.addf %482, %3 : vector<16x16xf32>
    %cst_170 = arith.constant dense<0xFF800000> : vector<16xf32>
    %484 = vector.multi_reduction <maximumf>, %483, %cst_170 [1] : vector<16x16xf32> to vector<16xf32>
    %485 = vector.shape_cast %484 : vector<16xf32> to vector<16x1xf32>
    %486 = vector.broadcast %485 : vector<16x1xf32> to vector<16x16xf32>
    %487 = arith.subf %483, %486 : vector<16x16xf32>
    %488 = math.exp %487 : vector<16x16xf32>
    %cst_171 = arith.constant dense<0.000000e+00> : vector<16xf32>
    %489 = vector.multi_reduction <add>, %488, %cst_171 [1] : vector<16x16xf32> to vector<16xf32>
    %490 = vector.shape_cast %489 : vector<16xf32> to vector<16x1xf32>
    %491 = vector.broadcast %490 : vector<16x1xf32> to vector<16x16xf32>
    %492 = arith.divf %488, %491 : vector<16x16xf32>
    %493 = vector.extract_strided_slice %456 {offsets = [0, 8], sizes = [16, 8], strides = [1, 1]} : vector<16x32xf32> to vector<16x8xf32>
    %cst_172 = arith.constant dense<0.000000e+00> : vector<16x8xf32>
    %494 = tpu.matmul %492, %493, %cst_172 {dimension_numbers = #tpu.dot_dimension_numbers<[1], [0], [0], [1], [0, 0, 1, 1], [], []>} : vector<16x16xf32>, vector<16x8xf32>, vector<16x8xf32> -> vector<16x8xf32>
    %495 = vector.extract_strided_slice %439 {offsets = [8, 0], sizes = [8, 32], strides = [1, 1]} : vector<32x32xf32> to vector<8x32xf32>
    %cst_173 = arith.constant dense<0.000000e+00> : vector<16x32xf32>
    %496 = tpu.matmul %494, %495, %cst_173 {dimension_numbers = #tpu.dot_dimension_numbers<[1], [0], [0], [1], [0, 0, 1, 1], [], []>} : vector<16x8xf32>, vector<8x32xf32>, vector<16x32xf32> -> vector<16x32xf32>
    %497 = arith.addf %477, %496 : vector<16x32xf32>
    %498 = vector.extract_strided_slice %446 {offsets = [0, 16], sizes = [16, 8], strides = [1, 1]} : vector<16x32xf32> to vector<16x8xf32>
    %499 = vector.extract_strided_slice %451 {offsets = [0, 16], sizes = [16, 8], strides = [1, 1]} : vector<16x32xf32> to vector<16x8xf32>
    %cst_174 = arith.constant dense<0.000000e+00> : vector<16x16xf32>
    %500 = tpu.matmul %498, %499, %cst_174 {dimension_numbers = #tpu.dot_dimension_numbers<[1], [1], [0], [0], [0, 0, 1, 0], [], []>} : vector<16x8xf32>, vector<16x8xf32>, vector<16x16xf32> -> vector<16x16xf32>
    %cst_175 = arith.constant 0.353553385 : f32
    %501 = vector.broadcast %cst_175 : f32 to vector<16x16xf32>
    %502 = arith.mulf %500, %501 : vector<16x16xf32>
    %503 = arith.addf %502, %3 : vector<16x16xf32>
    %cst_176 = arith.constant dense<0xFF800000> : vector<16xf32>
    %504 = vector.multi_reduction <maximumf>, %503, %cst_176 [1] : vector<16x16xf32> to vector<16xf32>
    %505 = vector.shape_cast %504 : vector<16xf32> to vector<16x1xf32>
    %506 = vector.broadcast %505 : vector<16x1xf32> to vector<16x16xf32>
    %507 = arith.subf %503, %506 : vector<16x16xf32>
    %508 = math.exp %507 : vector<16x16xf32>
    %cst_177 = arith.constant dense<0.000000e+00> : vector<16xf32>
    %509 = vector.multi_reduction <add>, %508, %cst_177 [1] : vector<16x16xf32> to vector<16xf32>
    %510 = vector.shape_cast %509 : vector<16xf32> to vector<16x1xf32>
    %511 = vector.broadcast %510 : vector<16x1xf32> to vector<16x16xf32>
    %512 = arith.divf %508, %511 : vector<16x16xf32>
    %513 = vector.extract_strided_slice %456 {offsets = [0, 16], sizes = [16, 8], strides = [1, 1]} : vector<16x32xf32> to vector<16x8xf32>
    %cst_178 = arith.constant dense<0.000000e+00> : vector<16x8xf32>
    %514 = tpu.matmul %512, %513, %cst_178 {dimension_numbers = #tpu.dot_dimension_numbers<[1], [0], [0], [1], [0, 0, 1, 1], [], []>} : vector<16x16xf32>, vector<16x8xf32>, vector<16x8xf32> -> vector<16x8xf32>
    %515 = vector.extract_strided_slice %439 {offsets = [16, 0], sizes = [8, 32], strides = [1, 1]} : vector<32x32xf32> to vector<8x32xf32>
    %cst_179 = arith.constant dense<0.000000e+00> : vector<16x32xf32>
    %516 = tpu.matmul %514, %515, %cst_179 {dimension_numbers = #tpu.dot_dimension_numbers<[1], [0], [0], [1], [0, 0, 1, 1], [], []>} : vector<16x8xf32>, vector<8x32xf32>, vector<16x32xf32> -> vector<16x32xf32>
    %517 = arith.addf %497, %516 : vector<16x32xf32>
    %518 = vector.extract_strided_slice %446 {offsets = [0, 24], sizes = [16, 8], strides = [1, 1]} : vector<16x32xf32> to vector<16x8xf32>
    %519 = vector.extract_strided_slice %451 {offsets = [0, 24], sizes = [16, 8], strides = [1, 1]} : vector<16x32xf32> to vector<16x8xf32>
    %cst_180 = arith.constant dense<0.000000e+00> : vector<16x16xf32>
    %520 = tpu.matmul %518, %519, %cst_180 {dimension_numbers = #tpu.dot_dimension_numbers<[1], [1], [0], [0], [0, 0, 1, 0], [], []>} : vector<16x8xf32>, vector<16x8xf32>, vector<16x16xf32> -> vector<16x16xf32>
    %cst_181 = arith.constant 0.353553385 : f32
    %521 = vector.broadcast %cst_181 : f32 to vector<16x16xf32>
    %522 = arith.mulf %520, %521 : vector<16x16xf32>
    %523 = arith.addf %522, %3 : vector<16x16xf32>
    %cst_182 = arith.constant dense<0xFF800000> : vector<16xf32>
    %524 = vector.multi_reduction <maximumf>, %523, %cst_182 [1] : vector<16x16xf32> to vector<16xf32>
    %525 = vector.shape_cast %524 : vector<16xf32> to vector<16x1xf32>
    %526 = vector.broadcast %525 : vector<16x1xf32> to vector<16x16xf32>
    %527 = arith.subf %523, %526 : vector<16x16xf32>
    %528 = math.exp %527 : vector<16x16xf32>
    %cst_183 = arith.constant dense<0.000000e+00> : vector<16xf32>
    %529 = vector.multi_reduction <add>, %528, %cst_183 [1] : vector<16x16xf32> to vector<16xf32>
    %530 = vector.shape_cast %529 : vector<16xf32> to vector<16x1xf32>
    %531 = vector.broadcast %530 : vector<16x1xf32> to vector<16x16xf32>
    %532 = arith.divf %528, %531 : vector<16x16xf32>
    %533 = vector.extract_strided_slice %456 {offsets = [0, 24], sizes = [16, 8], strides = [1, 1]} : vector<16x32xf32> to vector<16x8xf32>
    %cst_184 = arith.constant dense<0.000000e+00> : vector<16x8xf32>
    %534 = tpu.matmul %532, %533, %cst_184 {dimension_numbers = #tpu.dot_dimension_numbers<[1], [0], [0], [1], [0, 0, 1, 1], [], []>} : vector<16x16xf32>, vector<16x8xf32>, vector<16x8xf32> -> vector<16x8xf32>
    %535 = vector.extract_strided_slice %439 {offsets = [24, 0], sizes = [8, 32], strides = [1, 1]} : vector<32x32xf32> to vector<8x32xf32>
    %cst_185 = arith.constant dense<0.000000e+00> : vector<16x32xf32>
    %536 = tpu.matmul %534, %535, %cst_185 {dimension_numbers = #tpu.dot_dimension_numbers<[1], [0], [0], [1], [0, 0, 1, 1], [], []>} : vector<16x8xf32>, vector<8x32xf32>, vector<16x32xf32> -> vector<16x32xf32>
    %537 = arith.addf %517, %536 : vector<16x32xf32>
    %538 = vector.extract_strided_slice %441 {offsets = [3, 0], sizes = [1, 32], strides = [1, 1]} : vector<6x32xf32> to vector<1x32xf32>
    %539 = vector.broadcast %538 : vector<1x32xf32> to vector<16x32xf32>
    %540 = arith.addf %537, %539 : vector<16x32xf32>
    %541 = arith.addf %540, %435 : vector<16x32xf32>
    %542 = vector.extract_strided_slice %441 {offsets = [4, 0], sizes = [1, 32], strides = [1, 1]} : vector<6x32xf32> to vector<1x32xf32>
    %543 = vector.extract_strided_slice %441 {offsets = [5, 0], sizes = [1, 32], strides = [1, 1]} : vector<6x32xf32> to vector<1x32xf32>
    %cst_186 = arith.constant dense<0.000000e+00> : vector<16xf32>
    %544 = vector.multi_reduction <add>, %541, %cst_186 [1] : vector<16x32xf32> to vector<16xf32>
    %545 = vector.shape_cast %544 : vector<16xf32> to vector<16x1xf32>
    %cst_187 = arith.constant 3.200000e+01 : f32
    %546 = vector.broadcast %cst_187 : f32 to vector<16x1xf32>
    %547 = arith.divf %545, %546 : vector<16x1xf32>
    %548 = vector.broadcast %547 : vector<16x1xf32> to vector<16x32xf32>
    %549 = arith.subf %541, %548 : vector<16x32xf32>
    %550 = arith.mulf %549, %549 : vector<16x32xf32>
    %cst_188 = arith.constant dense<0.000000e+00> : vector<16xf32>
    %551 = vector.multi_reduction <add>, %550, %cst_188 [1] : vector<16x32xf32> to vector<16xf32>
    %552 = vector.shape_cast %551 : vector<16xf32> to vector<16x1xf32>
    %cst_189 = arith.constant 3.200000e+01 : f32
    %553 = vector.broadcast %cst_189 : f32 to vector<16x1xf32>
    %554 = arith.divf %552, %553 : vector<16x1xf32>
    %555 = vector.broadcast %547 : vector<16x1xf32> to vector<16x32xf32>
    %556 = arith.subf %541, %555 : vector<16x32xf32>
    %cst_190 = arith.constant 9.99999997E-7 : f32
    %557 = vector.broadcast %cst_190 : f32 to vector<16x1xf32>
    %558 = arith.addf %554, %557 : vector<16x1xf32>
    %559 = math.rsqrt %558 : vector<16x1xf32>
    %560 = vector.broadcast %559 : vector<16x1xf32> to vector<16x32xf32>
    %561 = arith.mulf %556, %560 : vector<16x32xf32>
    %562 = vector.broadcast %542 : vector<1x32xf32> to vector<16x32xf32>
    %563 = arith.mulf %561, %562 : vector<16x32xf32>
    %564 = vector.broadcast %543 : vector<1x32xf32> to vector<16x32xf32>
    %565 = arith.addf %563, %564 : vector<16x32xf32>
    %c1_191 = arith.constant 1 : index
    %c0_192 = arith.constant 0 : index
    %c0_193 = arith.constant 0 : index
    %566 = vector.load %arg7[%c1_191, %c0_192, %c0_193] : memref<2x32x64xf32, #tpu.memory_space<vmem>>, vector<1x32x64xf32>
    %567 = vector.shape_cast %566 : vector<1x32x64xf32> to vector<32x64xf32>
    %cst_194 = arith.constant dense<0.000000e+00> : vector<16x64xf32>
    %568 = tpu.matmul %565, %567, %cst_194 {dimension_numbers = #tpu.dot_dimension_numbers<[1], [0], [0], [1], [0, 0, 1, 1], [], []>} : vector<16x32xf32>, vector<32x64xf32>, vector<16x64xf32> -> vector<16x64xf32>
    %c1_195 = arith.constant 1 : index
    %c0_196 = arith.constant 0 : index
    %c0_197 = arith.constant 0 : index
    %569 = vector.load %arg9[%c1_195, %c0_196, %c0_197] : memref<2x1x64xf32, #tpu.memory_space<vmem>>, vector<1x1x64xf32>
    %570 = vector.shape_cast %569 : vector<1x1x64xf32> to vector<1x64xf32>
    %571 = vector.broadcast %570 : vector<1x64xf32> to vector<16x64xf32>
    %572 = arith.addf %568, %571 : vector<16x64xf32>
    %cst_198 = arith.constant 0.000000e+00 : f32
    %573 = vector.broadcast %cst_198 : f32 to vector<16x64xf32>
    %574 = arith.maximumf %572, %573 : vector<16x64xf32>
    %c1_199 = arith.constant 1 : index
    %c0_200 = arith.constant 0 : index
    %c0_201 = arith.constant 0 : index
    %575 = vector.load %arg10[%c1_199, %c0_200, %c0_201] : memref<2x3x32xf32, #tpu.memory_space<vmem>>, vector<1x3x32xf32>
    %576 = vector.shape_cast %575 : vector<1x3x32xf32> to vector<3x32xf32>
    %c1_202 = arith.constant 1 : index
    %c0_203 = arith.constant 0 : index
    %c0_204 = arith.constant 0 : index
    %577 = vector.load %arg8[%c1_202, %c0_203, %c0_204] : memref<2x64x32xf32, #tpu.memory_space<vmem>>, vector<1x64x32xf32>
    %578 = vector.shape_cast %577 : vector<1x64x32xf32> to vector<64x32xf32>
    %cst_205 = arith.constant dense<0.000000e+00> : vector<16x32xf32>
    %579 = tpu.matmul %574, %578, %cst_205 {dimension_numbers = #tpu.dot_dimension_numbers<[1], [0], [0], [1], [0, 0, 1, 1], [], []>} : vector<16x64xf32>, vector<64x32xf32>, vector<16x32xf32> -> vector<16x32xf32>
    %580 = vector.extract_strided_slice %576 {offsets = [0, 0], sizes = [1, 32], strides = [1, 1]} : vector<3x32xf32> to vector<1x32xf32>
    %581 = vector.broadcast %580 : vector<1x32xf32> to vector<16x32xf32>
    %582 = arith.addf %579, %581 : vector<16x32xf32>
    %583 = arith.addf %582, %565 : vector<16x32xf32>
    %584 = vector.extract_strided_slice %576 {offsets = [1, 0], sizes = [1, 32], strides = [1, 1]} : vector<3x32xf32> to vector<1x32xf32>
    %585 = vector.extract_strided_slice %576 {offsets = [2, 0], sizes = [1, 32], strides = [1, 1]} : vector<3x32xf32> to vector<1x32xf32>
    %cst_206 = arith.constant dense<0.000000e+00> : vector<16xf32>
    %586 = vector.multi_reduction <add>, %583, %cst_206 [1] : vector<16x32xf32> to vector<16xf32>
    %587 = vector.shape_cast %586 : vector<16xf32> to vector<16x1xf32>
    %cst_207 = arith.constant 3.200000e+01 : f32
    %588 = vector.broadcast %cst_207 : f32 to vector<16x1xf32>
    %589 = arith.divf %587, %588 : vector<16x1xf32>
    %590 = vector.broadcast %589 : vector<16x1xf32> to vector<16x32xf32>
    %591 = arith.subf %583, %590 : vector<16x32xf32>
    %592 = arith.mulf %591, %591 : vector<16x32xf32>
    %cst_208 = arith.constant dense<0.000000e+00> : vector<16xf32>
    %593 = vector.multi_reduction <add>, %592, %cst_208 [1] : vector<16x32xf32> to vector<16xf32>
    %594 = vector.shape_cast %593 : vector<16xf32> to vector<16x1xf32>
    %cst_209 = arith.constant 3.200000e+01 : f32
    %595 = vector.broadcast %cst_209 : f32 to vector<16x1xf32>
    %596 = arith.divf %594, %595 : vector<16x1xf32>
    %597 = vector.broadcast %589 : vector<16x1xf32> to vector<16x32xf32>
    %598 = arith.subf %583, %597 : vector<16x32xf32>
    %cst_210 = arith.constant 9.99999997E-7 : f32
    %599 = vector.broadcast %cst_210 : f32 to vector<16x1xf32>
    %600 = arith.addf %596, %599 : vector<16x1xf32>
    %601 = math.rsqrt %600 : vector<16x1xf32>
    %602 = vector.broadcast %601 : vector<16x1xf32> to vector<16x32xf32>
    %603 = arith.mulf %598, %602 : vector<16x32xf32>
    %604 = vector.broadcast %584 : vector<1x32xf32> to vector<16x32xf32>
    %605 = arith.mulf %603, %604 : vector<16x32xf32>
    %606 = vector.broadcast %585 : vector<1x32xf32> to vector<16x32xf32>
    %607 = arith.addf %605, %606 : vector<16x32xf32>
    %c0_211 = arith.constant 0 : index
    %c0_212 = arith.constant 0 : index
    %608 = vector.load %arg11[%c0_211, %c0_212] : memref<16x32xf32, #tpu.memory_space<vmem>>, vector<16x32xf32>
    tpu.vector_store %arg11[%c0_211, %c0_212], %607 {strides = array<i32>} : memref<16x32xf32, #tpu.memory_space<vmem>>, vector<16x32xf32>,
    return
  }
}

</mosaic_0001>

<bundles_post_ra>
// kernel: transformer_decoder.1
= control target key start
LH: loop header
LB: loop body
LE: loop exit
PB: predicated region body
PF: predicated region fallthrough
CT: control target
= control target key end

     0   :  { %vm60_vm0 = vcmask 261120   ;;  %s7560_s21 = smov 96   ;;  %s8678_s0 = inlined_call_operand.vmem [shape: f32[16,32], index: 0, kind: input, shape index: {}]   ;;  %s8679_s1 = inlined_call_operand.vmem [shape: f32[16,32], index: 1, kind: input, shape index: {}]   ;;  %s8680_s2 = inlined_call_operand.vmem [shape: f32[16,16], index: 2, kind: input, shape index: {}]   ;;  %s8681_s3 = inlined_call_operand.vmem [shape: f32[16,16], index: 3, kind: input, shape index: {}]   ;;  %s8682_s4 = inlined_call_operand.vmem [shape: f32[4,32,96], index: 4, kind: input, shape index: {}]   ;;  %s8683_s5 = inlined_call_operand.vmem [shape: f32[4,32,32], index: 5, kind: input, shape index: {}]   ;;  %s8684_s6 = inlined_call_operand.vmem [shape: f32[4,6,32], index: 6, kind: input, shape index: {}]   ;;  %s8685_s7 = inlined_call_operand.vmem [shape: f32[2,32,64], index: 7, kind: input, shape index: {}]   ;;  %s8686_s8 = inlined_call_operand.vmem [shape: f32[2,64,32], index: 8, kind: input, shape index: {}]   ;;  %s8687_s9 = inlined_call_operand.vmem [shape: f32[2,1,64], index: 9, kind: input, shape index: {}]   ;;  %s8688_s10 = inlined_call_operand.vmem [shape: f32[2,3,32], index: 10, kind: input, shape index: {}]   ;;  %s8689_s11 = inlined_call_operand.hbm [shape: f32[16,32], index: 11, kind: output, shape index: {}]  }
   0x1   :  { %v7631_v0 = vld [vmem:[%s8682_s4 + $0x18] sm:$0xff]  ;;  %v7636_v1 = vld [vmem:[%s8682_s4 + $0x8] sm:$0xff]  ;;  %v7645_v2 = vld [vmem:[%s8678_s0] sm:$0xff] }
   0x2   :  { %156 = vrot.lane.b32.xlu0 %v7631_v0, %s7560_s21  ;;  %152 = vrot.lane.b32.xlu1 %v7636_v1, %s7560_s21  ;;  %v49_v3 = vld [vmem:[%s8682_s4 + $0x10] sm:$0xff]  ;;  %v47_v4 = vld [vmem:[%s8682_s4] sm:$0xff] }
   0x3   :  { %6876 = vmatprep.subr.mxu0 %v7631_v0  ;;  %6895 = vmatprep.mubr.msk.f32.mxu1 %vm60_vm0, %v7645_v2 }
   0x4   :  { %16 = vsyncpa [#allocation3], 0  ;;  %6877 = vmatpush3.msra.mxu0 %v7631_v0  ;;  %6884 = vmatprep.mubr.msk.f32.mxu0 %vm60_vm0, %v7645_v2  ;;  %v7666_v5 = vld [vmem:[%s8678_s0 + $0x8] sm:$0xff]  ;;  %v56_v10 = vlaneseq  ;;  %v7682_v13 = vld [vmem:[%s8684_s6] sm:$0x3f]  ;;  %vm328_vm1 = vcmask 64512  }
   0x5   :  { %6878 = vmatprep.subr.mxu0 %v49_v3  ;;  %s7561_s12 = smov 120   ;;  %s7562_s13 = smov 64   ;;  %v7736_v34 = vld [vmem:[%s8680_s2 + $0x8] sm:$0xff]  ;;  %vm420_vm2 = vcmask 130048   ;;  %v7741_v37 = vld [vmem:[%s8680_s2] sm:$0xff]  ;;  %vm3091_vm3 = vcmask 523264  }
   0x6   :  { %154 = vrot.lane.b32.xlu0 %v49_v3, %s7560_s21  ;;  %150 = vrot.lane.b32.xlu1 %v47_v4, %s7560_s21  ;;  %v7674_v11 = vshrl.u32 %v56_v10, 7  ;;  %s7563_s18 = smov 112   ;;  %s7564_s19 = smov 104  }
   0x7   :  { %6879 = vmatpush3.msra.mxu0 %v49_v3 }
   0x8   :  { %6880 = vmatprep.subr.mxu0 %v7636_v1  ;;  %v7677_v12 = vsub.s32 0, %v7674_v11  ;;  %v7693_v19 = vsub.s32 1, %v7674_v11  ;;  %v7752_v57 = vsub.s32 2, %v7674_v11 }
   0x9   :  { %6881 = vmatpush3.msra.mxu0 %v7636_v1 }
   0xa   :  { %6882 = vmatprep.subr.mxu0 %v47_v4  ;;  %v59_v14 = vrot.slane %v7682_v13, %v7677_v12  ;;  %v145_v20 = vrot.slane %v7682_v13, %v7693_v19  ;;  %v240_v59 = vrot.slane %v7682_v13, %v7752_v57 }
   0xb   :  { %6883 = vmatpush3.msra.mxu0 %v47_v4 }
   0xc   :  { %6885 = vmatmul.mubr.msk.f32.vlgmr.msra.gmra.mxu0 %vm60_vm0, %v7666_v5 }
   0xd   :  { %6906 = vmatprep.mubr.msk.f32.mxu0 %vm60_vm0, %v7645_v2 }
  0x74   :  { %v157_v6 = vpop.permute.xlu0 %156  ;;  %v153_v7 = vpop.permute.xlu1 %152 }
  0x75   :  { %6887 = vmatprep.subr.mxu1 %v157_v6 }
  0x76   :  { %6888 = vmatpush3.msra.mxu1 %v157_v6 }
  0x78   :  { %v155_v8 = vpop.permute.xlu0 %154  ;;  %v151_v9 = vpop.permute.xlu1 %150 }
  0x79   :  { %6889 = vmatprep.subr.mxu1 %v155_v8 }
  0x7a   :  { %6890 = vmatpush3.msra.mxu1 %v155_v8 }
  0x7b   :  { %6891 = vmatprep.subr.mxu1 %v153_v7 }
  0x7c   :  { %6892 = vmatpush3.msra.mxu1 %v153_v7 }
  0x7d   :  { %6893 = vmatprep.subr.mxu1 %v151_v9 }
  0x7e   :  { %6894 = vmatpush3.msra.mxu1 %v151_v9 }
  0x7f   :  { %6896 = vmatmul.mubr.msk.f32.vlgmr.msra.gmra.mxu1 %vm60_vm0, %v7666_v5 }
  0xcc   :  { %v6886_v15 = vpop.f32.mrf.mxu0 }
  0xcd   :  { %v7686_v16 = vadd.f32 %v6886_v15, %v59_v14 }
  0xce   :  { %v133_v17 = vpop.f32.mrf.mxu0 }
  0xcf   :  { %v7688_v18 = vadd.f32 %v133_v17, %v59_v14 }
  0xd1   :  { %6913 = vmatprep.mubr.msk.f32.mxu1 %vm328_vm1, %v7688_v18 }
 0x13f   :  { %v6897_v21 = vpop.f32.mrf.mxu1 }
 0x140   :  { %v7697_v22 = vadd.f32 %v6897_v21, %v145_v20 }
 0x141   :  { %v228_v23 = vpop.f32.mrf.mxu1 }
 0x142   :  { %v7699_v24 = vadd.f32 %v228_v23, %v145_v20  ;;  %530 = vrot.lane.b32.xlu0 %v7697_v22, %s7561_s12  ;;  %6909 = vmatprep.subr.msk.mxu1 %vm328_vm1, %v7697_v22 }
 0x143   :  { %6910 = vmatpush3.xpose.msk.msra.mxu1 %vm328_vm1, %v7697_v22 }
 0x144   :  { %528 = vrot.lane.b32.xlu1 %v7699_v24, %s7561_s12  ;;  %6911 = vmatprep.subr.msk.mxu1 %vm328_vm1, %v7699_v24 }
 0x146   :  { %524 = vrot.lane.b32.xlu0 %v7688_v18, %s7561_s12 }
 0x147   :  { %6912 = vmatpush3.xpose.msk.msra.mxu1 %vm328_vm1, %v7699_v24 }
 0x148   :  { %526 = vrot.lane.b32.xlu1 %v7686_v16, %s7561_s12 }
 0x14a   :  { %6914 = vmatmul.mubr.msk.f32.vlgmr.msra.gmra.mxu1 %vm328_vm1, %v7686_v16  ;;  %247 = vrot.lane.b32.xlu0 %v7631_v0, %s7562_s13 }
 0x14c   :  { %245 = vrot.lane.b32.xlu1 %v49_v3, %s7562_s13 }
 0x14e   :  { %243 = vrot.lane.b32.xlu0 %v7636_v1, %s7562_s13 }
 0x150   :  { %241 = vrot.lane.b32.xlu1 %v47_v4, %s7562_s13 }
 0x1b4   :  { %v531_v25 = vpop.permute.xlu0 %530 }
 0x1b5   :  { %6923 = vmatprep.subr.msk.mxu1 %vm328_vm1, %v531_v25 }
 0x1b6   :  { %v529_v26 = vpop.permute.xlu1 %528  ;;  %6924 = vmatpush3.xpose.msk.msra.mxu1 %vm328_vm1, %v531_v25 }
 0x1b7   :  { %6925 = vmatprep.subr.msk.mxu1 %vm328_vm1, %v529_v26 }
 0x1b8   :  { %v525_v27 = vpop.permute.xlu0 %524 }
 0x1b9   :  { %6927 = vmatprep.mubr.msk.f32.mxu1 %vm328_vm1, %v525_v27 }
 0x1ba   :  { %v527_v28 = vpop.permute.xlu1 %526  ;;  %6926 = vmatpush3.xpose.msk.msra.mxu1 %vm328_vm1, %v529_v26 }
 0x1bc   :  { %v248_v29 = vpop.permute.xlu0 %247 }
 0x1bd   :  { %6928 = vmatmul.mubr.msk.f32.vlgmr.msra.gmra.mxu1 %vm328_vm1, %v527_v28  ;;  %6898 = vmatprep.subr.mxu0 %v248_v29 }
 0x1be   :  { %v246_v30 = vpop.permute.xlu1 %245  ;;  %6899 = vmatpush3.msra.mxu0 %v248_v29 }
 0x1bf   :  { %6900 = vmatprep.subr.mxu0 %v246_v30 }
 0x1c0   :  { %6901 = vmatpush3.msra.mxu0 %v246_v30  ;;  %v244_v31 = vpop.permute.xlu0 %243 }
 0x1c1   :  { %6902 = vmatprep.subr.mxu0 %v244_v31 }
 0x1c2   :  { %v242_v32 = vpop.permute.xlu1 %241  ;;  %6903 = vmatpush3.msra.mxu0 %v244_v31 }
 0x1c3   :  { %6904 = vmatprep.subr.mxu0 %v242_v32 }
 0x1c4   :  { %6905 = vmatpush3.msra.mxu0 %v242_v32 }
 0x1c5   :  { %6907 = vmatmul.mubr.msk.f32.vlgmr.msra.gmra.mxu0 %vm60_vm0, %v7666_v5 }
 0x20a   :  { %v6915_v33 = vpop.f32.mrf.mxu1 }
 0x20b   :  { %v417_v35 = vmul.f32 0.35355338, %v6915_v33 }
 0x20c   :  { %v407_v36 = vpop.f32.mrf.mxu1 }
 0x20d   :  { %v416_v38 = vmul.f32 0.35355338, %v407_v36  ;;  %v419_v39 = vadd.f32 %v417_v35, %v7736_v34  ;;  %v51_v35 = vld [vmem:[%s8683_s5] sm:$0xff] }
 0x20f   :  { %v424_v40 = vsel %vm420_vm2, %v419_v39, -inf  ;;  %v418_v41 = vadd.f32 %v416_v38, %v7741_v37 }
 0x210   :  { %425 = vmax.xlane.f32.xlu1 %v424_v40 }
 0x211   :  { %v421_v42 = vsel %vm420_vm2, %v418_v41, -inf }
 0x212   :  { %422 = vmax.xlane.f32.xlu0 %v421_v42 }
 0x27d   :  { %v6929_v43 = vpop.f32.mrf.mxu1 }
 0x27e   :  { %v616_v45 = vmul.f32 0.35355338, %v6929_v43 }
 0x27f   :  { %v606_v44 = vpop.f32.mrf.mxu1 }
 0x280   :  { %v615_v46 = vmul.f32 0.35355338, %v606_v44  ;;  %v618_v49 = vadd.f32 %v616_v45, %v7736_v34 }
 0x282   :  { %v617_v47 = vadd.f32 %v615_v46, %v7741_v37  ;;  %v622_v50 = vsel %vm420_vm2, %v618_v49, -inf }
 0x284   :  { %v619_v48 = vsel %vm420_vm2, %v617_v47, -inf }
 0x285   :  { %620 = vmax.xlane.f32.xlu0 %v619_v48  ;;  %v6908_v58 = vpop.f32.mrf.mxu0 }
 0x286   :  { %v7756_v60 = vadd.f32 %v6908_v58, %v240_v59 }
 0x287   :  { %v319_v1 = vpop.f32.mrf.mxu0 }
 0x288   :  { %6916 = vmatprep.subr.mxu0 %v7756_v60  ;;  %v7762_v3 = vadd.f32 %v319_v1, %v240_v59 }
 0x289   :  { %623 = vmax.xlane.f32.xlu0 %v622_v50  ;;  %6917 = vmatpush3.msra.mxu0 %v7756_v60 }
 0x28a   :  { %6918 = vmatprep.subr.mxu0 %v7762_v3 }
 0x28b   :  { %6919 = vmatpush3.msra.mxu0 %v7762_v3 }
 0x299   :  { %v426_v51 = vpop.xlane.xlu1 %425 }
 0x29a   :  { %v428_v52 = vsub.f32 %v419_v39, %v426_v51 }
 0x29b   :  { %v423_v53 = vpop.xlane.xlu0 %422 }
 0x29c   :  { %v431_v54 = vmul.f32 1.442695, %v428_v52  ;;  %v427_v55 = vsub.f32 %v418_v41, %v423_v53 }
 0x29e   :  { %7380 = vpow2.f32 %v431_v54  ;;  %v429_v56 = vmul.f32 1.442695, %v427_v55 }
 0x2a0   :  { %7382 = vpow2.f32 %v429_v56 }
 0x2ab   :  { %v7381_v61 = vpop.eup %7380 }
 0x2ac   :  { %v436_v62 = vsel %vm420_vm2, %v7381_v61, 0.0 }
 0x2ad   :  { %v7383_v63 = vpop.eup %7382  ;;  %437 = vadd.xlane.f32.xlu0 %v436_v62 }
 0x2ae   :  { %v433_v0 = vsel %vm420_vm2, %v7383_v63, 0.0 }
 0x2af   :  { %434 = vadd.xlane.f32.xlu1 %v433_v0 }
 0x30e   :  { %v621_v4 = vpop.xlane.xlu0 %620 }
 0x30f   :  { %v625_v6 = vsub.f32 %v617_v47, %v621_v4 }
 0x311   :  { %v627_v7 = vmul.f32 1.442695, %v625_v6 }
 0x312   :  { %v624_v8 = vpop.xlane.xlu0 %623 }
 0x313   :  { %7384 = vpow2.f32 %v627_v7  ;;  %v626_v9 = vsub.f32 %v618_v49, %v624_v8 }
 0x315   :  { %v629_v10 = vmul.f32 1.442695, %v626_v9 }
 0x317   :  { %7386 = vpow2.f32 %v629_v10 }
 0x320   :  { %v7385_v14 = vpop.eup %7384 }
 0x321   :  { %v631_v15 = vsel %vm420_vm2, %v7385_v14, 0.0 }
 0x322   :  { %632 = vadd.xlane.f32.xlu1 %v631_v15 }
 0x324   :  { %v7387_v17 = vpop.eup %7386 }
 0x325   :  { %v634_v20 = vsel %vm420_vm2, %v7387_v17, 0.0 }
 0x326   :  { %635 = vadd.xlane.f32.xlu0 %v634_v20 }
 0x333   :  { %645 = vrot.lane.b32.xlu1 %v7756_v60, %s7561_s12 }
 0x336   :  { %v438_v21 = vpop.xlane.xlu0 %437 }
 0x337   :  { %898 = vrot.lane.b32.xlu1 %v7697_v22, %s7563_s18  ;;  %7388 = vrcp.f32 %v438_v21 }
 0x338   :  { %v435_v23 = vpop.xlane.xlu1 %434 }
 0x339   :  { %7390 = vrcp.f32 %v435_v23 }
 0x33b   :  { %896 = vrot.lane.b32.xlu1 %v7699_v24, %s7563_s18 }
 0x33c   :  { %643 = vrot.lane.b32.xlu0 %v7762_v3, %s7561_s12 }
 0x33f   :  { %894 = vrot.lane.b32.xlu1 %v7686_v16, %s7563_s18 }
 0x340   :  { %892 = vrot.lane.b32.xlu0 %v7688_v18, %s7563_s18 }
 0x343   :  { %1183 = vrot.lane.b32.xlu1 %v7699_v24, %s7564_s19 }
 0x344   :  { %1185 = vrot.lane.b32.xlu0 %v7697_v22, %s7564_s19  ;;  %v7389_v25 = vpop.eup %7388 }
 0x345   :  { %v442_v28 = vmul.f32 %v7389_v25, %v7381_v61 }
 0x346   :  { %v7391_v26 = vpop.eup %7390 }
 0x347   :  { %1181 = vrot.lane.b32.xlu1 %v7686_v16, %s7564_s19  ;;  %v440_v27 = vmul.f32 %v7391_v26, %v7383_v63  ;;  %v52_v16 = vld [vmem:[%s8683_s5 + $0x8] sm:$0xff] }
 0x348   :  { %1179 = vrot.lane.b32.xlu0 %v7688_v18, %s7564_s19 }
 0x349   :  { %6920 = vmatprep.mubr.msk.f32.mxu0 %vm420_vm2, %v440_v27 }
 0x34a   :  { %6921 = vmatmul.mubr.msk.f32.vlgmr.msra.gmra.mxu0 %vm420_vm2, %v442_v28 }
 0x3ab   :  { %v633_v29 = vpop.xlane.xlu1 %632 }
 0x3ac   :  { %7392 = vrcp.f32 %v633_v29 }
 0x3af   :  { %v646_v24 = vpop.permute.xlu1 %645  ;;  %v636_v30 = vpop.xlane.xlu0 %635 }
 0x3b0   :  { %7394 = vrcp.f32 %v636_v30  ;;  %6930 = vmatprep.subr.mxu0 %v646_v24 }
 0x3b1   :  { %6931 = vmatpush3.msra.mxu0 %v646_v24 }
 0x3b3   :  { %v644_v22 = vpop.permute.xlu0 %643  ;;  %v899_v39 = vpop.permute.xlu1 %898 }
 0x3b4   :  { %6932 = vmatprep.subr.mxu0 %v644_v22 }
 0x3b5   :  { %6933 = vmatpush3.msra.mxu0 %v644_v22 }
 0x3b6   :  { %6937 = vmatprep.subr.mxu0 %v52_v16 }
 0x3b7   :  { %v893_v42 = vpop.permute.xlu0 %892  ;;  %v897_v43 = vpop.permute.xlu1 %896 }
 0x3b9   :  { %v7393_v18 = vpop.eup %7392 }
 0x3ba   :  { %v638_v31 = vmul.f32 %v7393_v18, %v7385_v14 }
 0x3bb   :  { %v1186_v44 = vpop.permute.xlu0 %1185  ;;  %v895_v45 = vpop.permute.xlu1 %894 }
 0x3bc   :  { %6934 = vmatprep.mubr.msk.f32.mxu0 %vm420_vm2, %v638_v31 }
 0x3bd   :  { %v7395_v32 = vpop.eup %7394 }
 0x3be   :  { %v640_v33 = vmul.f32 %v7395_v32, %v7387_v17 }
 0x3bf   :  { %v1180_v46 = vpop.permute.xlu0 %1179  ;;  %v1184_v47 = vpop.permute.xlu1 %1183 }
 0x3c0   :  { %6935 = vmatmul.mubr.msk.f32.vlgmr.msra.gmra.mxu0 %vm420_vm2, %v640_v33 }
 0x3c1   :  { %6938 = vmatpush3.msra.mxu0 %v52_v16 }
 0x3c2   :  { %6942 = vmatprep.subr.mxu0 %v51_v35 }
 0x3c3   :  { %v1182_v48 = vpop.permute.xlu1 %1181 }
 0x40a   :  { %v6922_v36 = vpop.f32.mrf.mxu0 }
 0x40c   :  { %v515_v38 = vpop.f32.mrf.mxu0 }
 0x480   :  { %v6936_v40 = vpop.f32.mrf.mxu0 }
 0x482   :  { %v721_v41 = vpop.f32.mrf.mxu0 }
 0x483   :  { %6939 = vmatprep.mubr.msk.f32.mxu0 %vm328_vm1, %v721_v41 }
 0x484   :  { %6940 = vmatmul.mubr.msk.f32.vlgmr.msra.gmra.mxu0 %vm328_vm1, %v6936_v40 }
 0x485   :  { %6943 = vmatpush3.msra.mxu0 %v51_v35  ;;  %6944 = vmatprep.mubr.msk.f32.mxu0 %vm328_vm1, %v515_v38  ;;  %v53_v35 = vld [vmem:[%s8683_s5 + $0x10] sm:$0xff] }
 0x486   :  { %6947 = vmatprep.subr.msk.mxu0 %vm328_vm1, %v899_v39 }
 0x488   :  { %6945 = vmatmul.mubr.msk.f32.vlgmr.msra.gmra.mxu0 %vm328_vm1, %v6922_v36 }
 0x489   :  { %6948 = vmatpush3.xpose.msk.msra.mxu0 %vm328_vm1, %v899_v39  ;;  %6951 = vmatprep.mubr.msk.f32.mxu0 %vm328_vm1, %v893_v42 }
 0x48a   :  { %6949 = vmatprep.subr.msk.mxu0 %vm328_vm1, %v897_v43 }
 0x48d   :  { %6950 = vmatpush3.xpose.msk.msra.mxu0 %vm328_vm1, %v897_v43 }
 0x48e   :  { %6966 = vmatprep.subr.msk.mxu0 %vm328_vm1, %v1186_v44 }
 0x490   :  { %6952 = vmatmul.mubr.msk.f32.vlgmr.msra.gmra.mxu0 %vm328_vm1, %v895_v45 }
 0x491   :  { %6967 = vmatpush3.xpose.msk.msra.mxu0 %vm328_vm1, %v1186_v44  ;;  %6970 = vmatprep.mubr.msk.f32.mxu0 %vm328_vm1, %v1180_v46 }
 0x492   :  { %6968 = vmatprep.subr.msk.mxu0 %vm328_vm1, %v1184_v47 }
 0x495   :  { %6969 = vmatpush3.xpose.msk.msra.mxu0 %vm328_vm1, %v1184_v47 }
 0x498   :  { %6971 = vmatmul.mubr.msk.f32.vlgmr.msra.gmra.mxu0 %vm328_vm1, %v1182_v48 }
 0x544   :  { %v6941_v49 = vpop.f32.mrf.mxu0 }
 0x546   :  { %v802_v50 = vpop.f32.mrf.mxu0 }
 0x548   :  { %v6946_v51 = vpop.f32.mrf.mxu0 }
 0x549   :  { %v7814_v52 = vadd.f32 %v6946_v51, %v6941_v49 }
 0x54a   :  { %v883_v53 = vpop.f32.mrf.mxu0 }
 0x54b   :  { %v7816_v54 = vadd.f32 %v883_v53, %v802_v50 }
 0x550   :  { %v6953_v55 = vpop.f32.mrf.mxu0 }
 0x551   :  { %v984_v56 = vmul.f32 0.35355338, %v6953_v55 }
 0x552   :  { %v974_v58 = vpop.f32.mrf.mxu0 }
 0x553   :  { %v983_v59 = vmul.f32 0.35355338, %v974_v58  ;;  %v986_v61 = vadd.f32 %v984_v56, %v7736_v34 }
 0x555   :  { %v990_v62 = vsel %vm420_vm2, %v986_v61, -inf  ;;  %v985_v63 = vadd.f32 %v983_v59, %v7741_v37 }
 0x556   :  { %991 = vmax.xlane.f32.xlu1 %v990_v62 }
 0x557   :  { %v987_v0 = vsel %vm420_vm2, %v985_v63, -inf }
 0x558   :  { %988 = vmax.xlane.f32.xlu0 %v987_v0  ;;  %v6972_v1 = vpop.f32.mrf.mxu0  ;;  %v7857_v0 = vld [vmem:[%s8682_s4 + $0x38] sm:$0xff] }
 0x559   :  { %v1271_v24 = vmul.f32 0.35355338, %v6972_v1  ;;  %6985 = vmatprep.subr.mxu0 %v7857_v0 }
 0x55a   :  { %v1261_v4 = vpop.f32.mrf.mxu0  ;;  %6986 = vmatpush3.msra.mxu0 %v7857_v0 }
 0x55b   :  { %v1270_v6 = vmul.f32 0.35355338, %v1261_v4  ;;  %v1273_v16 = vadd.f32 %v1271_v24, %v7736_v34 }
 0x55d   :  { %v1272_v7 = vadd.f32 %v1270_v6, %v7741_v37  ;;  %v1277_v18 = vsel %vm420_vm2, %v1273_v16, -inf }
 0x55f   :  { %v1274_v8 = vsel %vm420_vm2, %v1272_v7, -inf }
 0x567   :  { %1011 = vrot.lane.b32.xlu1 %v7756_v60, %s7563_s18 }
 0x58b   :  { %1275 = vmax.xlane.f32.xlu1 %v1274_v8 }
 0x5df   :  { %v992_v9 = vpop.xlane.xlu1 %991 }
 0x5e0   :  { %v994_v10 = vsub.f32 %v986_v61, %v992_v9 }
 0x5e1   :  { %v989_v14 = vpop.xlane.xlu0 %988 }
 0x5e2   :  { %v997_v15 = vmul.f32 1.442695, %v994_v10  ;;  %v993_v17 = vsub.f32 %v985_v63, %v989_v14 }
 0x5e3   :  { %v1012_v20 = vpop.permute.xlu1 %1011 }
 0x5e4   :  { %7396 = vpow2.f32 %v997_v15  ;;  %v995_v21 = vmul.f32 1.442695, %v993_v17  ;;  %6954 = vmatprep.subr.mxu1 %v1012_v20 }
 0x5e5   :  { %6955 = vmatpush3.msra.mxu1 %v1012_v20  ;;  %v7875_v20 = vld [vmem:[%s8682_s4 + $0x30] sm:$0xff] }
 0x5e6   :  { %7398 = vpow2.f32 %v995_v21  ;;  %6987 = vmatprep.subr.mxu0 %v7875_v20 }
 0x5e7   :  { %6988 = vmatpush3.msra.mxu0 %v7875_v20 }
 0x5f1   :  { %v7397_v23 = vpop.eup %7396 }
 0x5f2   :  { %v1002_v25 = vsel %vm420_vm2, %v7397_v23, 0.0 }
 0x5f3   :  { %v7399_v26 = vpop.eup %7398  ;;  %1003 = vadd.xlane.f32.xlu0 %v1002_v25 }
 0x5f4   :  { %v999_v37 = vsel %vm420_vm2, %v7399_v26, 0.0 }
 0x5f7   :  { %1000 = vadd.xlane.f32.xlu0 %v999_v37 }
 0x60d   :  { %1009 = vrot.lane.b32.xlu0 %v7762_v3, %s7563_s18 }
 0x614   :  { %v1276_v27 = vpop.xlane.xlu1 %1275 }
 0x615   :  { %v1280_v28 = vsub.f32 %v1272_v7, %v1276_v27 }
 0x617   :  { %v1282_v29 = vmul.f32 1.442695, %v1280_v28 }
 0x619   :  { %7400 = vpow2.f32 %v1282_v29 }
 0x626   :  { %v7401_v30 = vpop.eup %7400 }
 0x627   :  { %v1286_v22 = vsel %vm420_vm2, %v7401_v30, 0.0 }
 0x628   :  { %1287 = vadd.xlane.f32.xlu1 %v1286_v22 }
 0x62c   :  { %1278 = vmax.xlane.f32.xlu0 %v1277_v18 }
 0x639   :  { %1298 = vrot.lane.b32.xlu1 %v7756_v60, %s7564_s19 }
 0x67c   :  { %v1004_v31 = vpop.xlane.xlu0 %1003 }
 0x67d   :  { %7402 = vrcp.f32 %v1004_v31 }
 0x680   :  { %v1001_v32 = vpop.xlane.xlu0 %1000 }
 0x681   :  { %7404 = vrcp.f32 %v1001_v32 }
 0x684   :  { %v1010_v33 = vpop.permute.xlu0 %1009 }
 0x685   :  { %6956 = vmatprep.subr.mxu1 %v1010_v33 }
 0x686   :  { %6957 = vmatpush3.msra.mxu1 %v1010_v33 }
 0x687   :  { %6961 = vmatprep.subr.mxu1 %v53_v35 }
 0x68a   :  { %v7403_v34 = vpop.eup %7402 }
 0x68b   :  { %v1008_v39 = vmul.f32 %v7403_v34, %v7397_v23 }
 0x68e   :  { %v7405_v36 = vpop.eup %7404 }
 0x68f   :  { %v1006_v38 = vmul.f32 %v7405_v36, %v7399_v26 }
 0x691   :  { %6958 = vmatprep.mubr.msk.f32.mxu1 %vm420_vm2, %v1006_v38 }
 0x692   :  { %6959 = vmatmul.mubr.msk.f32.vlgmr.msra.gmra.mxu1 %vm420_vm2, %v1008_v39 }
 0x693   :  { %6962 = vmatpush3.msra.mxu1 %v53_v35 }
 0x6b1   :  { %v1288_v60 = vpop.xlane.xlu1 %1287 }
 0x6b5   :  { %v1299_v40 = vpop.permute.xlu1 %1298  ;;  %v1279_v41 = vpop.xlane.xlu0 %1278 }
 0x6b6   :  { %v1281_v42 = vsub.f32 %v1273_v16, %v1279_v41  ;;  %6973 = vmatprep.subr.mxu1 %v1299_v40  ;;  %v41_v16 = vld [vmem:[%s8679_s1] sm:$0xff] }
 0x6b8   :  { %v1284_v43 = vmul.f32 1.442695, %v1281_v42 }
 0x6ba   :  { %7406 = vpow2.f32 %v1284_v43  ;;  %v7918_v43 = vsub.s32 5, %v7674_v11 }
 0x6bb   :  { %7408 = vrcp.f32 %v1288_v60  ;;  %v7908_v60 = vld [vmem:[%s8679_s1 + $0x8] sm:$0xff] }
 0x6c7   :  { %v7407_v44 = vpop.eup %7406 }
 0x6c8   :  { %v1289_v45 = vsel %vm420_vm2, %v7407_v44, 0.0  ;;  %v7409_v46 = vpop.eup %7408 }
 0x6c9   :  { %1290 = vadd.xlane.f32.xlu0 %v1289_v45  ;;  %v1293_v50 = vmul.f32 %v7409_v46, %v7401_v30 }
 0x6df   :  { %1296 = vrot.lane.b32.xlu0 %v7762_v3, %s7564_s19  ;;  %v54_v3 = vld [vmem:[%s8683_s5 + $0x18] sm:$0xff] }
 0x752   :  { %v6960_v47 = vpop.f32.mrf.mxu1  ;;  %v1291_v48 = vpop.xlane.xlu0 %1290 }
 0x753   :  { %7410 = vrcp.f32 %v1291_v48  ;;  %v1510_v48 = vrot.slane %v7682_v13, %v7918_v43 }
 0x754   :  { %v1087_v49 = vpop.f32.mrf.mxu1 }
 0x755   :  { %6963 = vmatprep.mubr.msk.f32.mxu1 %vm328_vm1, %v1087_v49 }
 0x756   :  { %6964 = vmatmul.mubr.msk.f32.vlgmr.msra.gmra.mxu1 %vm328_vm1, %v6960_v47  ;;  %v1297_v51 = vpop.permute.xlu0 %1296 }
 0x757   :  { %6974 = vmatpush3.msra.mxu1 %v1299_v40  ;;  %6977 = vmatprep.mubr.msk.f32.mxu1 %vm420_vm2, %v1293_v50  ;;  %v7913_v40 = vsub.s32 4, %v7674_v11 }
 0x758   :  { %6975 = vmatprep.subr.mxu1 %v1297_v51 }
 0x759   :  { %6976 = vmatpush3.msra.mxu1 %v1297_v51  ;;  %v1504_v42 = vrot.slane %v7682_v13, %v7913_v40 }
 0x75a   :  { %6980 = vmatprep.subr.mxu1 %v54_v3 }
 0x760   :  { %v7411_v53 = vpop.eup %7410 }
 0x761   :  { %v1295_v55 = vmul.f32 %v7411_v53, %v7407_v44 }
 0x763   :  { %6978 = vmatmul.mubr.msk.f32.vlgmr.msra.gmra.mxu1 %vm420_vm2, %v1295_v55 }
 0x764   :  { %6981 = vmatpush3.msra.mxu1 %v54_v3 }
 0x816   :  { %v6965_v56 = vpop.f32.mrf.mxu1 }
 0x817   :  { %v1178_v58 = vadd.f32 %v6965_v56, %v7814_v52  ;;  %v7862_v52 = vsub.s32 3, %v7674_v11  ;;  %v7934_v11 = vld [vmem:[%s8684_s6 + $0x8] sm:$0x3f] }
 0x818   :  { %v1168_v59 = vpop.f32.mrf.mxu1 }
 0x819   :  { %v1177_v61 = vadd.f32 %v1168_v59, %v7816_v54  ;;  %v1469_v54 = vrot.slane %v7682_v13, %v7862_v52  ;;  %v1613_v13 = vrot.slane %v7934_v11, %v7693_v19 }
 0x823   :  { %v6979_v62 = vpop.f32.mrf.mxu1 }
 0x825   :  { %v1374_v63 = vpop.f32.mrf.mxu1 }
 0x826   :  { %6982 = vmatprep.mubr.msk.f32.mxu1 %vm328_vm1, %v1374_v63 }
 0x827   :  { %6983 = vmatmul.mubr.msk.f32.vlgmr.msra.gmra.mxu1 %vm328_vm1, %v6979_v62 }
 0x828   :  { %7004 = vmatprep.mubr.msk.f32.mxu1 %vm60_vm0, %v41_v16 }
 0x8e7   :  { %v6984_v1 = vpop.f32.mrf.mxu1 }
 0x8e8   :  { %v1465_v4 = vadd.f32 %v6984_v1, %v1178_v58  ;;  %v1528_v58 = vrot.slane %v7934_v11, %v7677_v12 }
 0x8e9   :  { %v1455_v6 = vpop.f32.mrf.mxu1 }
 0x8ea   :  { %v1471_v7 = vadd.f32 %v1469_v54, %v1465_v4  ;;  %v1464_v8 = vadd.f32 %v1455_v6, %v1177_v61 }
 0x8ec   :  { %v1470_v9 = vadd.f32 %v1469_v54, %v1464_v8  ;;  %v1473_v10 = vadd.f32 %v1471_v7, %v7666_v5  ;;  %v7880_v5 = vld [vmem:[%s8682_s4 + $0x28] sm:$0xff] }
 0x8ed   :  { %6989 = vmatprep.subr.mxu0 %v7880_v5 }
 0x8ee   :  { %v1477_v14 = vsel %vm60_vm0, %v1473_v10, 0.0  ;;  %v1472_v15 = vadd.f32 %v1470_v9, %v7645_v2  ;;  %6990 = vmatpush3.msra.mxu0 %v7880_v5  ;;  %v7891_v2 = vld [vmem:[%s8682_s4 + $0x20] sm:$0xff] }
 0x8ef   :  { %1478 = vadd.xlane.f32.xlu0 %v1477_v14  ;;  %6991 = vmatprep.subr.mxu0 %v7891_v2  ;;  %v7987_v14 = vld [vmem:[%s8681_s3 + $0x8] sm:$0xff] }
 0x8f0   :  { %v1474_v17 = vsel %vm60_vm0, %v1472_v15, 0.0  ;;  %6992 = vmatpush3.msra.mxu0 %v7891_v2 }
 0x8f1   :  { %1475 = vadd.xlane.f32.xlu1 %v1474_v17 }
 0x902   :  { %1624 = vrot.lane.b32.xlu1 %v7857_v0, %s7560_s21 }
 0x906   :  { %1620 = vrot.lane.b32.xlu1 %v7880_v5, %s7560_s21 }
 0x978   :  { %v1479_v21 = vpop.xlane.xlu0 %1478 }
 0x979   :  { %v1482_v23 = vmul.f32 0.03125, %v1479_v21 }
 0x97a   :  { %v1476_v25 = vpop.xlane.xlu1 %1475 }
 0x97b   :  { %v1484_v26 = vsub.f32 %v1473_v10, %v1482_v23  ;;  %v1481_v37 = vmul.f32 0.03125, %v1476_v25 }
 0x97d   :  { %v1483_v27 = vsub.f32 %v1472_v15, %v1481_v37  ;;  %v1486_v28 = vmul.f32 %v1484_v26, %v1484_v26 }
 0x97e   :  { %v1625_v29 = vpop.permute.xlu1 %1624 }
 0x97f   :  { %v1490_v24 = vsel %vm60_vm0, %v1486_v28, 0.0  ;;  %v1485_v30 = vmul.f32 %v1483_v27, %v1483_v27  ;;  %6996 = vmatprep.subr.mxu1 %v1625_v29 }
 0x980   :  { %1491 = vadd.xlane.f32.xlu0 %v1490_v24  ;;  %6997 = vmatpush3.msra.mxu1 %v1625_v29 }
 0x981   :  { %v1487_v22 = vsel %vm60_vm0, %v1485_v30, 0.0 }
 0x982   :  { %1488 = vadd.xlane.f32.xlu1 %v1487_v22  ;;  %v1621_v18 = vpop.permute.xlu1 %1620 }
 0x993   :  { %1618 = vrot.lane.b32.xlu1 %v7891_v2, %s7560_s21 }
 0x996   :  { %1622 = vrot.lane.b32.xlu0 %v7875_v20, %s7560_s21 }
 0xa09   :  { %v1492_v31 = vpop.xlane.xlu0 %1491 }
 0xa0a   :  { %v1494_v32 = vmul.f32 0.03125, %v1492_v31 }
 0xa0b   :  { %v1489_v33 = vpop.xlane.xlu1 %1488 }
 0xa0c   :  { %v1496_v35 = vadd.f32 1e-06, %v1494_v32  ;;  %v1493_v34 = vmul.f32 0.03125, %v1489_v33 }
 0xa0d   :  { %v1623_v36 = vpop.permute.xlu0 %1622 }
 0xa0e   :  { %7412 = vrsqrt.f32 %v1496_v35  ;;  %v1495_v38 = vadd.f32 1e-06, %v1493_v34  ;;  %6998 = vmatprep.subr.mxu1 %v1623_v36  ;;  %v1714_v34 = vrot.slane %v7934_v11, %v7752_v57 }
 0xa0f   :  { %6999 = vmatpush3.msra.mxu1 %v1623_v36  ;;  %v1619_v39 = vpop.permute.xlu1 %1618 }
 0xa10   :  { %7414 = vrsqrt.f32 %v1495_v38  ;;  %7000 = vmatprep.subr.mxu1 %v1621_v18 }
 0xa11   :  { %7001 = vmatpush3.msra.mxu1 %v1621_v18 }
 0xa12   :  { %7002 = vmatprep.subr.mxu1 %v1619_v39 }
 0xa13   :  { %7003 = vmatpush3.msra.mxu1 %v1619_v39 }
 0xa14   :  { %7005 = vmatmul.mubr.msk.f32.vlgmr.msra.gmra.mxu1 %vm60_vm0, %v7908_v60 }
 0xa1b   :  { %v7413_v41 = vpop.eup %7412 }
 0xa1c   :  { %v1500_v44 = vmul.f32 %v7413_v41, %v1484_v26 }
 0xa1d   :  { %v7415_v45 = vpop.eup %7414 }
 0xa1e   :  { %v1499_v46 = vmul.f32 %v7415_v45, %v1483_v27  ;;  %v1506_v47 = vmul.f32 %v1504_v42, %v1500_v44 }
 0xa20   :  { %v1505_v49 = vmul.f32 %v1504_v42, %v1499_v46  ;;  %v7924_v51 = vadd.f32 %v1510_v48, %v1506_v47 }
 0xa22   :  { %v7922_v50 = vadd.f32 %v1510_v48, %v1505_v49 }
 0xa24   :  { %6993 = vmatprep.mubr.msk.f32.mxu0 %vm60_vm0, %v7922_v50 }
 0xa25   :  { %6994 = vmatmul.mubr.msk.f32.vlgmr.msra.gmra.mxu0 %vm60_vm0, %v7924_v51 }
 0xa26   :  { %7015 = vmatprep.mubr.msk.f32.mxu0 %vm60_vm0, %v41_v16 }
 0xad4   :  { %v7006_v53 = vpop.f32.mrf.mxu1 }
 0xad5   :  { %v7938_v55 = vadd.f32 %v7006_v53, %v1613_v13 }
 0xad6   :  { %v1702_v3 = vpop.f32.mrf.mxu1 }
 0xad7   :  { %2002 = vrot.lane.b32.xlu0 %v7938_v55, %s7561_s12  ;;  %7018 = vmatprep.subr.msk.mxu1 %vm328_vm1, %v7938_v55  ;;  %v7944_v56 = vadd.f32 %v1702_v3, %v1613_v13 }
 0xad8   :  { %7019 = vmatpush3.xpose.msk.msra.mxu1 %vm328_vm1, %v7938_v55 }
 0xad9   :  { %2000 = vrot.lane.b32.xlu1 %v7944_v56, %s7561_s12  ;;  %7020 = vmatprep.subr.msk.mxu1 %vm328_vm1, %v7944_v56 }
 0xadc   :  { %7021 = vmatpush3.xpose.msk.msra.mxu1 %vm328_vm1, %v7944_v56 }
 0xae5   :  { %v6995_v59 = vpop.f32.mrf.mxu0 }
 0xae6   :  { %v7956_v61 = vadd.f32 %v6995_v59, %v1528_v58 }
 0xae7   :  { %v1601_v62 = vpop.f32.mrf.mxu0 }
 0xae8   :  { %v7958_v63 = vadd.f32 %v1601_v62, %v1528_v58  ;;  %1998 = vrot.lane.b32.xlu1 %v7956_v61, %s7561_s12 }
 0xaea   :  { %7022 = vmatprep.mubr.msk.f32.mxu1 %vm328_vm1, %v7958_v63  ;;  %1996 = vrot.lane.b32.xlu0 %v7958_v63, %s7561_s12 }
 0xaeb   :  { %7023 = vmatmul.mubr.msk.f32.vlgmr.msra.gmra.mxu1 %vm328_vm1, %v7956_v61 }
 0xaec   :  { %1719 = vrot.lane.b32.xlu1 %v7875_v20, %s7562_s13  ;;  %v7992_v20 = vld [vmem:[%s8681_s3] sm:$0xff] }
 0xaee   :  { %1721 = vrot.lane.b32.xlu0 %v7857_v0, %s7562_s13 }
 0xaf0   :  { %1715 = vrot.lane.b32.xlu1 %v7891_v2, %s7562_s13 }
 0xaf2   :  { %1717 = vrot.lane.b32.xlu0 %v7880_v5, %s7562_s13 }
 0xb49   :  { %v2003_v54 = vpop.permute.xlu0 %2002 }
 0xb4a   :  { %7032 = vmatprep.subr.msk.mxu1 %vm328_vm1, %v2003_v54 }
 0xb4b   :  { %7033 = vmatpush3.xpose.msk.msra.mxu1 %vm328_vm1, %v2003_v54  ;;  %v2001_v1 = vpop.permute.xlu1 %2000 }
 0xb4c   :  { %7034 = vmatprep.subr.msk.mxu1 %vm328_vm1, %v2001_v1 }
 0xb4f   :  { %7035 = vmatpush3.xpose.msk.msra.mxu1 %vm328_vm1, %v2001_v1 }
 0xb5a   :  { %v1999_v4 = vpop.permute.xlu1 %1998 }
 0xb5c   :  { %v1997_v6 = vpop.permute.xlu0 %1996 }
 0xb5d   :  { %7036 = vmatprep.mubr.msk.f32.mxu1 %vm328_vm1, %v1997_v6 }
 0xb5e   :  { %7037 = vmatmul.mubr.msk.f32.vlgmr.msra.gmra.mxu1 %vm328_vm1, %v1999_v4  ;;  %v1720_v0 = vpop.permute.xlu1 %1719 }
 0xb60   :  { %v1722_v7 = vpop.permute.xlu0 %1721 }
 0xb61   :  { %7007 = vmatprep.subr.mxu0 %v1722_v7 }
 0xb62   :  { %7008 = vmatpush3.msra.mxu0 %v1722_v7  ;;  %v1716_v9 = vpop.permute.xlu1 %1715 }
 0xb63   :  { %7009 = vmatprep.subr.mxu0 %v1720_v0 }
 0xb64   :  { %v1718_v8 = vpop.permute.xlu0 %1717  ;;  %7010 = vmatpush3.msra.mxu0 %v1720_v0 }
 0xb65   :  { %7011 = vmatprep.subr.mxu0 %v1718_v8 }
 0xb66   :  { %7012 = vmatpush3.msra.mxu0 %v1718_v8 }
 0xb67   :  { %7013 = vmatprep.subr.mxu0 %v1716_v9 }
 0xb68   :  { %7014 = vmatpush3.msra.mxu0 %v1716_v9 }
 0xb69   :  { %7016 = vmatmul.mubr.msk.f32.vlgmr.msra.gmra.mxu0 %vm60_vm0, %v7908_v60 }
 0xbab   :  { %v7024_v10 = vpop.f32.mrf.mxu1 }
 0xbac   :  { %v1890_v15 = vmul.f32 0.35355338, %v7024_v10 }
 0xbad   :  { %v1880_v17 = vpop.f32.mrf.mxu1 }
 0xbae   :  { %v1889_v5 = vmul.f32 0.35355338, %v1880_v17  ;;  %v1892_v2 = vadd.f32 %v1890_v15, %v7987_v14 }
 0xbb0   :  { %v1896_v21 = vsel %vm420_vm2, %v1892_v2, -inf  ;;  %v1891_v23 = vadd.f32 %v1889_v5, %v7992_v20 }
 0xbb1   :  { %1897 = vmax.xlane.f32.xlu1 %v1896_v21 }
 0xbb2   :  { %v1893_v25 = vsel %vm420_vm2, %v1891_v23, -inf }
 0xbb3   :  { %1894 = vmax.xlane.f32.xlu0 %v1893_v25 }
 0xc1e   :  { %v7038_v26 = vpop.f32.mrf.mxu1 }
 0xc1f   :  { %v2088_v27 = vmul.f32 0.35355338, %v7038_v26 }
 0xc20   :  { %v2078_v37 = vpop.f32.mrf.mxu1 }
 0xc21   :  { %v2087_v28 = vmul.f32 0.35355338, %v2078_v37  ;;  %v2090_v30 = vadd.f32 %v2088_v27, %v7987_v14 }
 0xc23   :  { %v2089_v29 = vadd.f32 %v2087_v28, %v7992_v20  ;;  %v2094_v22 = vsel %vm420_vm2, %v2090_v30, -inf }
 0xc25   :  { %v2091_v24 = vsel %vm420_vm2, %v2089_v29, -inf }
 0xc26   :  { %2092 = vmax.xlane.f32.xlu0 %v2091_v24 }
 0xc29   :  { %v7017_v36 = vpop.f32.mrf.mxu0 }
 0xc2a   :  { %2095 = vmax.xlane.f32.xlu0 %v2094_v22  ;;  %v8004_v38 = vadd.f32 %v7017_v36, %v1714_v34 }
 0xc2b   :  { %v1793_v44 = vpop.f32.mrf.mxu0 }
 0xc2c   :  { %7025 = vmatprep.subr.mxu0 %v8004_v38  ;;  %v8010_v45 = vadd.f32 %v1793_v44, %v1714_v34 }
 0xc2d   :  { %7026 = vmatpush3.msra.mxu0 %v8004_v38 }
 0xc2e   :  { %7027 = vmatprep.subr.mxu0 %v8010_v45 }
 0xc2f   :  { %7028 = vmatpush3.msra.mxu0 %v8010_v45 }
 0xc3a   :  { %v1898_v16 = vpop.xlane.xlu1 %1897 }
 0xc3b   :  { %v1900_v18 = vsub.f32 %v1892_v2, %v1898_v16 }
 0xc3c   :  { %v1895_v31 = vpop.xlane.xlu0 %1894 }
 0xc3d   :  { %v1903_v32 = vmul.f32 1.442695, %v1900_v18  ;;  %v1899_v33 = vsub.f32 %v1891_v23, %v1895_v31 }
 0xc3f   :  { %7416 = vpow2.f32 %v1903_v32  ;;  %v1901_v35 = vmul.f32 1.442695, %v1899_v33 }
 0xc41   :  { %7418 = vpow2.f32 %v1901_v35 }
 0xc4c   :  { %v7417_v39 = vpop.eup %7416 }
 0xc4d   :  { %v1908_v60 = vsel %vm420_vm2, %v7417_v39, 0.0 }
 0xc4e   :  { %v7419_v41 = vpop.eup %7418  ;;  %1909 = vadd.xlane.f32.xlu0 %v1908_v60 }
 0xc4f   :  { %v1905_v42 = vsel %vm420_vm2, %v7419_v41, 0.0 }
 0xc50   :  { %1906 = vadd.xlane.f32.xlu1 %v1905_v42 }
 0xcaf   :  { %v2093_v46 = vpop.xlane.xlu0 %2092 }
 0xcb0   :  { %v2097_v47 = vsub.f32 %v2089_v29, %v2093_v46 }
 0xcb2   :  { %v2099_v48 = vmul.f32 1.442695, %v2097_v47 }
 0xcb3   :  { %v2096_v49 = vpop.xlane.xlu0 %2095 }
 0xcb4   :  { %7420 = vpow2.f32 %v2099_v48  ;;  %v2098_v13 = vsub.f32 %v2090_v30, %v2096_v49 }
 0xcb6   :  { %v2101_v53 = vmul.f32 1.442695, %v2098_v13 }
 0xcb8   :  { %7422 = vpow2.f32 %v2101_v53 }
 0xcc1   :  { %v7421_v3 = vpop.eup %7420 }
 0xcc2   :  { %v2103_v58 = vsel %vm420_vm2, %v7421_v3, 0.0 }
 0xcc3   :  { %2104 = vadd.xlane.f32.xlu1 %v2103_v58 }
 0xcc5   :  { %v7423_v59 = vpop.eup %7422 }
 0xcc6   :  { %v2106_v62 = vsel %vm420_vm2, %v7423_v59, 0.0 }
 0xcc7   :  { %2107 = vadd.xlane.f32.xlu0 %v2106_v62 }
 0xcd4   :  { %2117 = vrot.lane.b32.xlu1 %v8004_v38, %s7561_s12 }
 0xcd7   :  { %v1910_v54 = vpop.xlane.xlu0 %1909 }
 0xcd8   :  { %2370 = vrot.lane.b32.xlu1 %v7938_v55, %s7563_s18  ;;  %7424 = vrcp.f32 %v1910_v54 }
 0xcd9   :  { %v1907_v1 = vpop.xlane.xlu1 %1906 }
 0xcda   :  { %7426 = vrcp.f32 %v1907_v1 }
 0xcdc   :  { %2368 = vrot.lane.b32.xlu1 %v7944_v56, %s7563_s18 }
 0xcdd   :  { %2115 = vrot.lane.b32.xlu0 %v8010_v45, %s7561_s12 }
 0xce0   :  { %2366 = vrot.lane.b32.xlu1 %v7956_v61, %s7563_s18 }
 0xce1   :  { %2364 = vrot.lane.b32.xlu0 %v7958_v63, %s7563_s18 }
 0xce4   :  { %2655 = vrot.lane.b32.xlu1 %v7944_v56, %s7564_s19  ;;  %v6435_v56 = vld [vmem:[%s8683_s5 + $0x20] sm:$0xff] }
 0xce5   :  { %2657 = vrot.lane.b32.xlu0 %v7938_v55, %s7564_s19  ;;  %v7425_v4 = vpop.eup %7424  ;;  %7051 = vmatprep.subr.mxu1 %v6435_v56 }
 0xce6   :  { %v1914_v7 = vmul.f32 %v7425_v4, %v7417_v39  ;;  %7052 = vmatpush3.msra.mxu1 %v6435_v56 }
 0xce7   :  { %v7427_v6 = vpop.eup %7426 }
 0xce8   :  { %2653 = vrot.lane.b32.xlu1 %v7956_v61, %s7564_s19  ;;  %v1912_v0 = vmul.f32 %v7427_v6, %v7419_v41 }
 0xce9   :  { %2651 = vrot.lane.b32.xlu0 %v7958_v63, %s7564_s19  ;;  %v6436_v63 = vld [vmem:[%s8683_s5 + $0x28] sm:$0xff] }
 0xcea   :  { %7029 = vmatprep.mubr.msk.f32.mxu0 %vm420_vm2, %v1912_v0 }
 0xceb   :  { %7030 = vmatmul.mubr.msk.f32.vlgmr.msra.gmra.mxu0 %vm420_vm2, %v1914_v7 }
 0xd4c   :  { %v2105_v55 = vpop.xlane.xlu1 %2104 }
 0xd4d   :  { %7428 = vrcp.f32 %v2105_v55 }
 0xd50   :  { %v2118_v8 = vpop.permute.xlu1 %2117  ;;  %v2108_v9 = vpop.xlane.xlu0 %2107 }
 0xd51   :  { %7430 = vrcp.f32 %v2108_v9  ;;  %7039 = vmatprep.subr.mxu0 %v2118_v8 }
 0xd52   :  { %7040 = vmatpush3.msra.mxu0 %v2118_v8 }
 0xd54   :  { %v2116_v61 = vpop.permute.xlu0 %2115  ;;  %v2371_v2 = vpop.permute.xlu1 %2370 }
 0xd55   :  { %7041 = vmatprep.subr.mxu0 %v2116_v61 }
 0xd56   :  { %7042 = vmatpush3.msra.mxu0 %v2116_v61 }
 0xd57   :  { %7046 = vmatprep.subr.mxu0 %v6436_v63 }
 0xd58   :  { %v2365_v25 = vpop.permute.xlu0 %2364  ;;  %v2369_v37 = vpop.permute.xlu1 %2368 }
 0xd5a   :  { %v7429_v10 = vpop.eup %7428 }
 0xd5b   :  { %v2110_v15 = vmul.f32 %v7429_v10, %v7421_v3 }
 0xd5c   :  { %v2658_v28 = vpop.permute.xlu0 %2657  ;;  %v2367_v29 = vpop.permute.xlu1 %2366 }
 0xd5d   :  { %7043 = vmatprep.mubr.msk.f32.mxu0 %vm420_vm2, %v2110_v15  ;;  %v6437_v15 = vld [vmem:[%s8683_s5 + $0x30] sm:$0xff] }
 0xd5e   :  { %v7431_v17 = vpop.eup %7430 }
 0xd5f   :  { %v2112_v5 = vmul.f32 %v7431_v17, %v7423_v59 }
 0xd60   :  { %v2652_v24 = vpop.permute.xlu0 %2651  ;;  %v2656_v30 = vpop.permute.xlu1 %2655 }
 0xd61   :  { %7044 = vmatmul.mubr.msk.f32.vlgmr.msra.gmra.mxu0 %vm420_vm2, %v2112_v5 }
 0xd62   :  { %7047 = vmatpush3.msra.mxu0 %v6436_v63 }
 0xd63   :  { %7056 = vmatprep.subr.msk.mxu0 %vm328_vm1, %v2371_v2 }
 0xd64   :  { %v2654_v22 = vpop.permute.xlu1 %2653 }
 0xdab   :  { %v7031_v21 = vpop.f32.mrf.mxu0 }
 0xdad   :  { %v1987_v23 = vpop.f32.mrf.mxu0 }
 0xdae   :  { %7053 = vmatprep.mubr.msk.f32.mxu1 %vm328_vm1, %v1987_v23 }
 0xdaf   :  { %7054 = vmatmul.mubr.msk.f32.vlgmr.msra.gmra.mxu1 %vm328_vm1, %v7031_v21 }
 0xe21   :  { %v7045_v26 = vpop.f32.mrf.mxu0 }
 0xe23   :  { %v2193_v27 = vpop.f32.mrf.mxu0 }
 0xe24   :  { %7048 = vmatprep.mubr.msk.f32.mxu0 %vm328_vm1, %v2193_v27 }
 0xe25   :  { %7049 = vmatmul.mubr.msk.f32.vlgmr.msra.gmra.mxu0 %vm328_vm1, %v7045_v26 }
 0xe26   :  { %7057 = vmatpush3.xpose.msk.msra.mxu0 %vm328_vm1, %v2371_v2  ;;  %7060 = vmatprep.mubr.msk.f32.mxu0 %vm328_vm1, %v2365_v25 }
 0xe27   :  { %7058 = vmatprep.subr.msk.mxu0 %vm328_vm1, %v2369_v37 }
 0xe2a   :  { %7059 = vmatpush3.xpose.msk.msra.mxu0 %vm328_vm1, %v2369_v37 }
 0xe2b   :  { %7075 = vmatprep.subr.msk.mxu0 %vm328_vm1, %v2658_v28 }
 0xe2d   :  { %7061 = vmatmul.mubr.msk.f32.vlgmr.msra.gmra.mxu0 %vm328_vm1, %v2367_v29 }
 0xe2e   :  { %7076 = vmatpush3.xpose.msk.msra.mxu0 %vm328_vm1, %v2658_v28  ;;  %7079 = vmatprep.mubr.msk.f32.mxu0 %vm328_vm1, %v2652_v24 }
 0xe2f   :  { %7077 = vmatprep.subr.msk.mxu0 %vm328_vm1, %v2656_v30 }
 0xe32   :  { %7078 = vmatpush3.xpose.msk.msra.mxu0 %vm328_vm1, %v2656_v30 }
 0xe35   :  { %7080 = vmatmul.mubr.msk.f32.vlgmr.msra.gmra.mxu0 %vm328_vm1, %v2654_v22 }
 0xe6f   :  { %v7055_v28 = vpop.f32.mrf.mxu1 }
 0xe71   :  { %v2355_v29 = vpop.f32.mrf.mxu1 }
 0xee5   :  { %v8062_v16 = vpop.f32.mrf.mxu0 }
 0xee7   :  { %v8064_v18 = vpop.f32.mrf.mxu0 }
 0xeed   :  { %v7062_v31 = vpop.f32.mrf.mxu0 }
 0xeee   :  { %v2456_v32 = vmul.f32 0.35355338, %v7062_v31 }
 0xeef   :  { %v2446_v33 = vpop.f32.mrf.mxu0 }
 0xef0   :  { %v2455_v35 = vmul.f32 0.35355338, %v2446_v33  ;;  %v2458_v34 = vadd.f32 %v2456_v32, %v7987_v14 }
 0xef2   :  { %v2462_v36 = vsel %vm420_vm2, %v2458_v34, -inf  ;;  %v2457_v39 = vadd.f32 %v2455_v35, %v7992_v20 }
 0xef3   :  { %2463 = vmax.xlane.f32.xlu1 %v2462_v36  ;;  %v2361_v36 = vadd.f32 %v7055_v28, %v8062_v16 }
 0xef4   :  { %v2459_v60 = vsel %vm420_vm2, %v2457_v39, -inf }
 0xef5   :  { %2460 = vmax.xlane.f32.xlu0 %v2459_v60  ;;  %v7081_v41 = vpop.f32.mrf.mxu0  ;;  %v2356_v60 = vadd.f32 %v2355_v29, %v8064_v18 }
 0xef6   :  { %v2743_v7 = vmul.f32 0.35355338, %v7081_v41 }
 0xef7   :  { %v2733_v42 = vpop.f32.mrf.mxu0 }
 0xef8   :  { %v2742_v44 = vmul.f32 0.35355338, %v2733_v42  ;;  %v2745_v8 = vadd.f32 %v2743_v7, %v7987_v14 }
 0xefa   :  { %v2744_v46 = vadd.f32 %v2742_v44, %v7992_v20  ;;  %v2749_v9 = vsel %vm420_vm2, %v2745_v8, -inf }
 0xefc   :  { %v2746_v47 = vsel %vm420_vm2, %v2744_v46, -inf }
 0xf04   :  { %2483 = vrot.lane.b32.xlu1 %v8004_v38, %s7563_s18 }
 0xf28   :  { %2747 = vmax.xlane.f32.xlu1 %v2746_v47 }
 0xf7c   :  { %v2464_v48 = vpop.xlane.xlu1 %2463 }
 0xf7d   :  { %v2466_v49 = vsub.f32 %v2458_v34, %v2464_v48  ;;  %v6438_v34 = vld [vmem:[%s8683_s5 + $0x38] sm:$0xff]  ;;  %v2941_v48 = vrot.slane %v7934_v11, %v7862_v52 }
 0xf7e   :  { %v2461_v13 = vpop.xlane.xlu0 %2460 }
 0xf7f   :  { %v2469_v53 = vmul.f32 1.442695, %v2466_v49  ;;  %v2465_v3 = vsub.f32 %v2457_v39, %v2461_v13 }
 0xf80   :  { %v2484_v58 = vpop.permute.xlu1 %2483 }
 0xf81   :  { %7432 = vpow2.f32 %v2469_v53  ;;  %v2467_v59 = vmul.f32 1.442695, %v2465_v3  ;;  %7063 = vmatprep.subr.mxu1 %v2484_v58 }
 0xf82   :  { %7064 = vmatpush3.msra.mxu1 %v2484_v58 }
 0xf83   :  { %7434 = vpow2.f32 %v2467_v59 }
 0xf8e   :  { %v7433_v62 = vpop.eup %7432 }
 0xf8f   :  { %v2474_v54 = vsel %vm420_vm2, %v7433_v62, 0.0 }
 0xf90   :  { %v7435_v1 = vpop.eup %7434  ;;  %2475 = vadd.xlane.f32.xlu0 %v2474_v54 }
 0xf91   :  { %v2471_v20 = vsel %vm420_vm2, %v7435_v1, 0.0 }
 0xf94   :  { %2472 = vadd.xlane.f32.xlu0 %v2471_v20 }
 0xfaa   :  { %2481 = vrot.lane.b32.xlu0 %v8010_v45, %s7563_s18 }
 0xfb1   :  { %v2748_v4 = vpop.xlane.xlu1 %2747 }
 0xfb2   :  { %v2752_v6 = vsub.f32 %v2744_v46, %v2748_v4 }
 0xfb4   :  { %v2754_v0 = vmul.f32 1.442695, %v2752_v6 }
 0xfb6   :  { %7436 = vpow2.f32 %v2754_v0 }
 0xfc3   :  { %v7437_v56 = vpop.eup %7436 }
 0xfc4   :  { %v2758_v55 = vsel %vm420_vm2, %v7437_v56, 0.0 }
 0xfc5   :  { %2759 = vadd.xlane.f32.xlu1 %v2758_v55 }
 0xfc9   :  { %2750 = vmax.xlane.f32.xlu0 %v2749_v9  ;;  %v2986_v9 = vld [vmem:[%s8685_s7 + $0x10] sm:$0xff] }
 0xfd6   :  { %2770 = vrot.lane.b32.xlu1 %v8004_v38, %s7564_s19 }
0x1019   :  { %v2476_v61 = vpop.xlane.xlu0 %2475 }
0x101a   :  { %7438 = vrcp.f32 %v2476_v61  ;;  %v2985_v61 = vld [vmem:[%s8685_s7 + $0x8] sm:$0xff] }
0x101d   :  { %v2473_v63 = vpop.xlane.xlu0 %2472 }
0x101e   :  { %7440 = vrcp.f32 %v2473_v63  ;;  %v2984_v63 = vld [vmem:[%s8685_s7] sm:$0xff] }
0x1021   :  { %v2482_v10 = vpop.permute.xlu0 %2481 }
0x1022   :  { %7065 = vmatprep.subr.mxu1 %v2482_v10 }
0x1023   :  { %7066 = vmatpush3.msra.mxu1 %v2482_v10  ;;  %v3086_v10 = vld [vmem:[%s8686_s8 + $0x38] sm:$0xff] }
0x1024   :  { %7070 = vmatprep.subr.mxu1 %v6437_v15 }
0x1027   :  { %v7439_v14 = vpop.eup %7438 }
0x1028   :  { %v2480_v2 = vmul.f32 %v7439_v14, %v7433_v62  ;;  %v3084_v14 = vld [vmem:[%s8686_s8 + $0x28] sm:$0xff] }
0x102b   :  { %v7441_v17 = vpop.eup %7440 }
0x102c   :  { %v2478_v5 = vmul.f32 %v7441_v17, %v7435_v1  ;;  %v3083_v17 = vld [vmem:[%s8686_s8 + $0x20] sm:$0xff] }
0x102e   :  { %7067 = vmatprep.mubr.msk.f32.mxu1 %vm420_vm2, %v2478_v5 }
0x102f   :  { %7068 = vmatmul.mubr.msk.f32.vlgmr.msra.gmra.mxu1 %vm420_vm2, %v2480_v2 }
0x1030   :  { %7071 = vmatpush3.msra.mxu1 %v6437_v15  ;;  %v3085_v15 = vld [vmem:[%s8686_s8 + $0x30] sm:$0xff] }
0x104e   :  { %v2760_v38 = vpop.xlane.xlu1 %2759 }
0x1052   :  { %v2771_v21 = vpop.permute.xlu1 %2770  ;;  %v2751_v23 = vpop.xlane.xlu0 %2750 }
0x1053   :  { %v2753_v25 = vsub.f32 %v2745_v8, %v2751_v23  ;;  %7082 = vmatprep.subr.mxu1 %v2771_v21 }
0x1055   :  { %v2756_v26 = vmul.f32 1.442695, %v2753_v25 }
0x1057   :  { %7442 = vpow2.f32 %v2756_v26 }
0x1058   :  { %7444 = vrcp.f32 %v2760_v38 }
0x1064   :  { %v7443_v37 = vpop.eup %7442 }
0x1065   :  { %v2761_v27 = vsel %vm420_vm2, %v7443_v37, 0.0  ;;  %v7445_v24 = vpop.eup %7444 }
0x1066   :  { %2762 = vadd.xlane.f32.xlu0 %v2761_v27  ;;  %v2765_v32 = vmul.f32 %v7445_v24, %v7437_v56 }
0x107c   :  { %2768 = vrot.lane.b32.xlu0 %v8010_v45, %s7564_s19 }
0x10ef   :  { %v7069_v30 = vpop.f32.mrf.mxu1  ;;  %v2763_v22 = vpop.xlane.xlu0 %2762 }
0x10f0   :  { %7446 = vrcp.f32 %v2763_v22 }
0x10f1   :  { %v2559_v31 = vpop.f32.mrf.mxu1 }
0x10f2   :  { %7072 = vmatprep.mubr.msk.f32.mxu1 %vm328_vm1, %v2559_v31 }
0x10f3   :  { %7073 = vmatmul.mubr.msk.f32.vlgmr.msra.gmra.mxu1 %vm328_vm1, %v7069_v30  ;;  %v2769_v33 = vpop.permute.xlu0 %2768  ;;  %v2981_v30 = vrot.slane %v7934_v11, %v7918_v43 }
0x10f4   :  { %7083 = vmatpush3.msra.mxu1 %v2771_v21  ;;  %7086 = vmatprep.mubr.msk.f32.mxu1 %vm420_vm2, %v2765_v32 }
0x10f5   :  { %7084 = vmatprep.subr.mxu1 %v2769_v33 }
0x10f6   :  { %7085 = vmatpush3.msra.mxu1 %v2769_v33  ;;  %v3082_v33 = vld [vmem:[%s8686_s8 + $0x18] sm:$0xff] }
0x10f7   :  { %7089 = vmatprep.subr.mxu1 %v6438_v34 }
0x10fd   :  { %v7447_v45 = vpop.eup %7446 }
0x10fe   :  { %v2767_v35 = vmul.f32 %v7447_v45, %v7443_v37  ;;  %v2975_v37 = vrot.slane %v7934_v11, %v7913_v40  ;;  %v3081_v45 = vld [vmem:[%s8686_s8 + $0x10] sm:$0xff]  ;;  %v3080_v11 = vld [vmem:[%s8686_s8 + $0x8] sm:$0xff] }
0x1100   :  { %7087 = vmatmul.mubr.msk.f32.vlgmr.msra.gmra.mxu1 %vm420_vm2, %v2767_v35  ;;  %v3079_v35 = vld [vmem:[%s8686_s8] sm:$0xff] }
0x1101   :  { %7090 = vmatpush3.msra.mxu1 %v6438_v34  ;;  %v6478_v34 = vld [vmem:[%s8687_s9] ss:$0 sm:$0xff] }
0x1102   :  { %7105 = vmatprep.subr.mxu1 %v3086_v10 }
0x11b3   :  { %v7074_v39 = vpop.f32.mrf.mxu1 }
0x11b4   :  { %v2650_v41 = vadd.f32 %v7074_v39, %v2361_v36 }
0x11b5   :  { %v2640_v42 = vpop.f32.mrf.mxu1 }
0x11b6   :  { %v2649_v44 = vadd.f32 %v2640_v42, %v2356_v60 }
0x11c0   :  { %v7088_v46 = vpop.f32.mrf.mxu1 }
0x11c2   :  { %v2846_v47 = vpop.f32.mrf.mxu1 }
0x11c3   :  { %7091 = vmatprep.mubr.msk.f32.mxu1 %vm328_vm1, %v2846_v47 }
0x11c4   :  { %7092 = vmatmul.mubr.msk.f32.vlgmr.msra.gmra.mxu1 %vm328_vm1, %v7088_v46  ;;  %v8160_v46 = vld [vmem:[%s8688_s10] sm:$0x7] }
0x11c5   :  { %7106 = vmatpush3.msra.mxu1 %v3086_v10  ;;  %v3090_v47 = vrot.slane %v8160_v46, %v7677_v12 }
0x11c6   :  { %7107 = vmatprep.subr.mxu1 %v3085_v15 }
0x11c7   :  { %7108 = vmatpush3.msra.mxu1 %v3085_v15 }
0x11c8   :  { %7109 = vmatprep.subr.mxu1 %v3084_v14 }
0x11c9   :  { %7110 = vmatpush3.msra.mxu1 %v3084_v14 }
0x11ca   :  { %7111 = vmatprep.subr.mxu1 %v3083_v17 }
0x11cb   :  { %7112 = vmatpush3.msra.mxu1 %v3083_v17 }
0x11cc   :  { %7113 = vmatprep.subr.mxu1 %v3082_v33 }
0x11cd   :  { %7114 = vmatpush3.msra.mxu1 %v3082_v33 }
0x11ce   :  { %7115 = vmatprep.subr.mxu1 %v3081_v45 }
0x11cf   :  { %7116 = vmatpush3.msra.mxu1 %v3081_v45  ;;  %v8211_v45 = vld [vmem:[%s8684_s6 + $0x10] sm:$0x3f] }
0x11d0   :  { %7117 = vmatprep.subr.mxu1 %v3080_v11 }
0x11d1   :  { %7118 = vmatpush3.msra.mxu1 %v3080_v11  ;;  %v3408_v11 = vrot.slane %v8211_v45, %v7752_v57 }
0x11d2   :  { %7119 = vmatprep.subr.mxu1 %v3079_v35 }
0x11d3   :  { %7120 = vmatpush3.msra.mxu1 %v3079_v35 }
0x1284   :  { %v7093_v49 = vpop.f32.mrf.mxu1 }
0x1285   :  { %v2937_v13 = vadd.f32 %v7093_v49, %v2650_v41 }
0x1286   :  { %v2927_v53 = vpop.f32.mrf.mxu1 }
0x1287   :  { %v2943_v3 = vadd.f32 %v2941_v48, %v2937_v13  ;;  %v2936_v16 = vadd.f32 %v2927_v53, %v2649_v44 }
0x1289   :  { %v2942_v58 = vadd.f32 %v2941_v48, %v2936_v16  ;;  %v2945_v18 = vadd.f32 %v2943_v3, %v7924_v51 }
0x128b   :  { %v2949_v59 = vsel %vm60_vm0, %v2945_v18, 0.0  ;;  %v2944_v62 = vadd.f32 %v2942_v58, %v7922_v50  ;;  %v2987_v50 = vld [vmem:[%s8685_s7 + $0x18] sm:$0xff] }
0x128c   :  { %2950 = vadd.xlane.f32.xlu0 %v2949_v59  ;;  %7094 = vmatprep.subr.mxu0 %v2987_v50  ;;  %v6486_v59 = vld [vmem:[%s8682_s4 + $0x58] sm:$0xff] }
0x128d   :  { %v2946_v54 = vsel %vm60_vm0, %v2944_v62, 0.0  ;;  %7095 = vmatpush3.msra.mxu0 %v2987_v50 }
0x128e   :  { %2947 = vadd.xlane.f32.xlu1 %v2946_v54  ;;  %7096 = vmatprep.subr.mxu0 %v2986_v9  ;;  %v6484_v54 = vld [vmem:[%s8682_s4 + $0x48] sm:$0xff] }
0x128f   :  { %7097 = vmatpush3.msra.mxu0 %v2986_v9 }
0x1290   :  { %7098 = vmatprep.subr.mxu0 %v2985_v61 }
0x1291   :  { %7099 = vmatpush3.msra.mxu0 %v2985_v61 }
0x1292   :  { %7100 = vmatprep.subr.mxu0 %v2984_v63 }
0x1293   :  { %7101 = vmatpush3.msra.mxu0 %v2984_v63 }
0x1294   :  { %7124 = vmatprep.subr.mxu0 %v6486_v59 }
0x1315   :  { %v2951_v1 = vpop.xlane.xlu0 %2950 }
0x1316   :  { %v2953_v20 = vmul.f32 0.03125, %v2951_v1  ;;  %v6483_v1 = vld [vmem:[%s8682_s4 + $0x40] sm:$0xff] }
0x1317   :  { %v2948_v4 = vpop.xlane.xlu1 %2947 }
0x1318   :  { %v2955_v6 = vsub.f32 %v2945_v18, %v2953_v20  ;;  %v2952_v0 = vmul.f32 0.03125, %v2948_v4 }
0x131a   :  { %v2954_v7 = vsub.f32 %v2944_v62, %v2952_v0  ;;  %v2957_v56 = vmul.f32 %v2955_v6, %v2955_v6  ;;  %v6485_v62 = vld [vmem:[%s8682_s4 + $0x50] sm:$0xff] }
0x131c   :  { %v2961_v55 = vsel %vm60_vm0, %v2957_v56, 0.0  ;;  %v2956_v8 = vmul.f32 %v2954_v7, %v2954_v7 }
0x131d   :  { %2962 = vadd.xlane.f32.xlu0 %v2961_v55 }
0x131e   :  { %v2958_v51 = vsel %vm60_vm0, %v2956_v8, 0.0 }
0x131f   :  { %2959 = vadd.xlane.f32.xlu1 %v2958_v51 }
0x13a6   :  { %v2963_v5 = vpop.xlane.xlu0 %2962 }
0x13a7   :  { %v2965_v2 = vmul.f32 0.03125, %v2963_v5 }
0x13a8   :  { %v2960_v38 = vpop.xlane.xlu1 %2959 }
0x13a9   :  { %v2967_v21 = vadd.f32 1e-06, %v2965_v2  ;;  %v2964_v23 = vmul.f32 0.03125, %v2960_v38 }
0x13ab   :  { %7448 = vrsqrt.f32 %v2967_v21  ;;  %v2966_v25 = vadd.f32 1e-06, %v2964_v23 }
0x13ad   :  { %7450 = vrsqrt.f32 %v2966_v25  ;;  %v3204_v25 = vrot.slane %v8160_v46, %v7693_v19 }
0x13b8   :  { %v7449_v26 = vpop.eup %7448 }
0x13b9   :  { %v2971_v27 = vmul.f32 %v7449_v26, %v2955_v6 }
0x13ba   :  { %v7451_v28 = vpop.eup %7450 }
0x13bb   :  { %v2970_v29 = vmul.f32 %v7451_v28, %v2954_v7  ;;  %v2977_v24 = vmul.f32 %v2975_v37, %v2971_v27 }
0x13bd   :  { %v2976_v22 = vmul.f32 %v2975_v37, %v2970_v29  ;;  %v2983_v32 = vadd.f32 %v2981_v30, %v2977_v24  ;;  %v3210_v24 = vrot.slane %v8160_v46, %v7752_v57  ;;  %v3313_v46 = vrot.slane %v8211_v45, %v7693_v19 }
0x13bf   :  { %v2982_v31 = vadd.f32 %v2981_v30, %v2976_v22 }
0x13c1   :  { %7102 = vmatprep.mubr.msk.f32.mxu0 %vm60_vm0, %v2982_v31 }
0x13c2   :  { %7103 = vmatmul.mubr.msk.f32.vlgmr.msra.gmra.mxu0 %vm60_vm0, %v2983_v32 }
0x13c3   :  { %7125 = vmatpush3.msra.mxu0 %v6486_v59 }
0x13c4   :  { %7126 = vmatprep.subr.mxu0 %v6485_v62 }
0x13c5   :  { %7127 = vmatpush3.msra.mxu0 %v6485_v62 }
0x13c6   :  { %7128 = vmatprep.subr.mxu0 %v6484_v54 }
0x13c7   :  { %7129 = vmatpush3.msra.mxu0 %v6484_v54 }
0x13c8   :  { %7130 = vmatprep.subr.mxu0 %v6483_v1 }
0x13c9   :  { %7131 = vmatpush3.msra.mxu0 %v6483_v1 }
0x1482   :  { %v7104_v36 = vpop.f32.mrf.mxu0 }
0x1483   :  { %v3073_v39 = vadd.f32 %v7104_v36, %v6478_v34  ;;  %v3228_v36 = vrot.slane %v8211_v45, %v7677_v12 }
0x1484   :  { %v3067_v60 = vpop.f32.mrf.mxu0 }
0x1485   :  { %v3068_v41 = vadd.f32 %v6478_v34, %v3067_v60  ;;  %v3077_v44 = vmax.f32 %v3073_v39, 0.0 }
0x1487   :  { %v3076_v42 = vmax.f32 %v3068_v41, 0.0 }
0x1489   :  { %7121 = vmatprep.mubr.msk.f32.mxu1 %vm3091_vm3, %v3076_v42 }
0x148a   :  { %7122 = vmatmul.mubr.msk.f32.vlgmr.msra.gmra.mxu1 %vm3091_vm3, %v3077_v44 }
0x154a   :  { %v7123_v48 = vpop.f32.mrf.mxu1 }
0x154b   :  { %v3170_v49 = vadd.f32 %v7123_v48, %v3090_v47 }
0x154c   :  { %v3164_v13 = vpop.f32.mrf.mxu1 }
0x154d   :  { %v3165_v53 = vadd.f32 %v3164_v13, %v3090_v47  ;;  %v3174_v3 = vadd.f32 %v3170_v49, %v2983_v32 }
0x154f   :  { %v3178_v16 = vsel %vm60_vm0, %v3174_v3, 0.0  ;;  %v3173_v58 = vadd.f32 %v3165_v53, %v2982_v31 }
0x1550   :  { %3179 = vadd.xlane.f32.xlu0 %v3178_v16 }
0x1551   :  { %v3175_v18 = vsel %vm60_vm0, %v3173_v58, 0.0 }
0x1552   :  { %3176 = vadd.xlane.f32.xlu1 %v3175_v18  ;;  %v8250_v18 = vld [vmem:[%s8680_s2 + $0x8] sm:$0xff] }
0x15d9   :  { %v3180_v20 = vpop.xlane.xlu0 %3179 }
0x15da   :  { %v3182_v4 = vmul.f32 0.03125, %v3180_v20 }
0x15db   :  { %v3177_v6 = vpop.xlane.xlu1 %3176 }
0x15dc   :  { %v3184_v0 = vsub.f32 %v3174_v3, %v3182_v4  ;;  %v3181_v7 = vmul.f32 0.03125, %v3177_v6 }
0x15de   :  { %v3183_v56 = vsub.f32 %v3173_v58, %v3181_v7  ;;  %v3186_v55 = vmul.f32 %v3184_v0, %v3184_v0 }
0x15e0   :  { %v3190_v8 = vsel %vm60_vm0, %v3186_v55, 0.0  ;;  %v3185_v51 = vmul.f32 %v3183_v56, %v3183_v56 }
0x15e1   :  { %3191 = vadd.xlane.f32.xlu0 %v3190_v8 }
0x15e2   :  { %v3187_v50 = vsel %vm60_vm0, %v3185_v51, 0.0 }
0x15e3   :  { %3188 = vadd.xlane.f32.xlu1 %v3187_v50 }
0x15f4   :  { %3324 = vrot.lane.b32.xlu1 %v6486_v59, %s7560_s21 }
0x15f7   :  { %3322 = vrot.lane.b32.xlu0 %v6485_v62, %s7560_s21 }
0x15f8   :  { %3320 = vrot.lane.b32.xlu1 %v6484_v54, %s7560_s21 }
0x15fb   :  { %3415 = vrot.lane.b32.xlu0 %v6486_v59, %s7562_s13 }
0x15fc   :  { %3318 = vrot.lane.b32.xlu1 %v6483_v1, %s7560_s21 }
0x15ff   :  { %3411 = vrot.lane.b32.xlu0 %v6484_v54, %s7562_s13  ;;  %v8256_v54 = vld [vmem:[%s8680_s2] sm:$0xff] }
0x1600   :  { %3413 = vrot.lane.b32.xlu1 %v6485_v62, %s7562_s13 }
0x1604   :  { %3409 = vrot.lane.b32.xlu1 %v6483_v1, %s7562_s13 }
0x166a   :  { %v3192_v9 = vpop.xlane.xlu0 %3191 }
0x166b   :  { %v3194_v61 = vmul.f32 0.03125, %v3192_v9 }
0x166c   :  { %v3189_v63 = vpop.xlane.xlu1 %3188 }
0x166d   :  { %v3196_v10 = vadd.f32 1e-06, %v3194_v61  ;;  %v3193_v15 = vmul.f32 0.03125, %v3189_v63 }
0x166e   :  { %v3323_v14 = vpop.permute.xlu0 %3322 }
0x166f   :  { %7452 = vrsqrt.f32 %v3196_v10  ;;  %v3195_v17 = vadd.f32 1e-06, %v3193_v15 }
0x1670   :  { %v3325_v5 = vpop.permute.xlu1 %3324 }
0x1671   :  { %7454 = vrsqrt.f32 %v3195_v17  ;;  %7135 = vmatprep.subr.mxu0 %v3325_v5 }
0x1672   :  { %v3416_v2 = vpop.permute.xlu0 %3415 }
0x1673   :  { %7146 = vmatprep.subr.mxu1 %v3416_v2 }
0x1674   :  { %v3321_v38 = vpop.permute.xlu1 %3320  ;;  %7147 = vmatpush3.msra.mxu1 %v3416_v2 }
0x1676   :  { %v3412_v37 = vpop.permute.xlu0 %3411 }
0x1678   :  { %v3319_v21 = vpop.permute.xlu1 %3318 }
0x167c   :  { %v7453_v23 = vpop.eup %7452  ;;  %v3414_v26 = vpop.permute.xlu1 %3413 }
0x167d   :  { %v3200_v27 = vmul.f32 %v7453_v23, %v3184_v0  ;;  %7148 = vmatprep.subr.mxu1 %v3414_v26 }
0x167e   :  { %v7455_v28 = vpop.eup %7454  ;;  %7149 = vmatpush3.msra.mxu1 %v3414_v26 }
0x167f   :  { %7150 = vmatprep.subr.mxu1 %v3412_v37  ;;  %v3199_v29 = vmul.f32 %v7455_v28, %v3183_v56  ;;  %v3206_v22 = vmul.f32 %v3204_v25, %v3200_v27 }
0x1680   :  { %7151 = vmatpush3.msra.mxu1 %v3412_v37  ;;  %v3410_v30 = vpop.permute.xlu1 %3409 }
0x1681   :  { %7152 = vmatprep.subr.mxu1 %v3410_v30  ;;  %v3205_v31 = vmul.f32 %v3204_v25, %v3199_v29  ;;  %v8194_v33 = vadd.f32 %v3210_v24, %v3206_v22  ;;  %v6487_v25 = vld [vmem:[%s8683_s5 + $0x40] sm:$0xff] }
0x1682   :  { %7153 = vmatpush3.msra.mxu1 %v3410_v30 }
0x1683   :  { %v8192_v32 = vadd.f32 %v3210_v24, %v3205_v31 }
0x1685   :  { %7132 = vmatprep.mubr.msk.f32.mxu0 %vm60_vm0, %v8192_v32  ;;  %7154 = vmatprep.mubr.msk.f32.mxu1 %vm60_vm0, %v8192_v32 }
0x1686   :  { %7133 = vmatmul.mubr.msk.f32.vlgmr.msra.gmra.mxu0 %vm60_vm0, %v8194_v33  ;;  %7155 = vmatmul.mubr.msk.f32.vlgmr.msra.gmra.mxu1 %vm60_vm0, %v8194_v33 }
0x1687   :  { %7136 = vmatpush3.msra.mxu0 %v3325_v5  ;;  %7143 = vmatprep.mubr.msk.f32.mxu0 %vm60_vm0, %v8192_v32 }
0x1688   :  { %7137 = vmatprep.subr.mxu0 %v3323_v14 }
0x1689   :  { %7138 = vmatpush3.msra.mxu0 %v3323_v14 }
0x168a   :  { %7139 = vmatprep.subr.mxu0 %v3321_v38 }
0x168b   :  { %7140 = vmatpush3.msra.mxu0 %v3321_v38 }
0x168c   :  { %7141 = vmatprep.subr.mxu0 %v3319_v21 }
0x168d   :  { %7142 = vmatpush3.msra.mxu0 %v3319_v21 }
0x168e   :  { %7144 = vmatmul.mubr.msk.f32.vlgmr.msra.gmra.mxu0 %vm60_vm0, %v8194_v33 }
0x1746   :  { %v7134_v35 = vpop.f32.mrf.mxu0  ;;  %v7156_v34 = vpop.f32.mrf.mxu1 }
0x1747   :  { %v8217_v39 = vadd.f32 %v7156_v34, %v3408_v11  ;;  %v8243_v53 = vadd.f32 %v7134_v35, %v3228_v36 }
0x1748   :  { %v3301_v60 = vpop.f32.mrf.mxu0  ;;  %v3487_v41 = vpop.f32.mrf.mxu1 }
0x1749   :  { %v8219_v42 = vadd.f32 %v3301_v60, %v3228_v36  ;;  %v8221_v44 = vadd.f32 %v3487_v41, %v3408_v11  ;;  %7164 = vmatprep.subr.mxu1 %v8217_v39 }
0x174a   :  { %7165 = vmatpush3.msra.mxu1 %v8217_v39 }
0x174b   :  { %7161 = vmatprep.mubr.msk.f32.mxu0 %vm328_vm1, %v8219_v42  ;;  %7166 = vmatprep.subr.mxu1 %v8221_v44 }
0x174c   :  { %7167 = vmatpush3.msra.mxu1 %v8221_v44 }
0x174e   :  { %v7145_v47 = vpop.f32.mrf.mxu0 }
0x174f   :  { %v8231_v48 = vadd.f32 %v7145_v47, %v3313_v46 }
0x1750   :  { %v3396_v49 = vpop.f32.mrf.mxu0 }
0x1751   :  { %v8233_v13 = vadd.f32 %v3396_v49, %v3313_v46  ;;  %7157 = vmatprep.subr.msk.mxu0 %vm328_vm1, %v8231_v48 }
0x1752   :  { %7158 = vmatpush3.xpose.msk.msra.mxu0 %vm328_vm1, %v8231_v48 }
0x1753   :  { %7159 = vmatprep.subr.msk.mxu0 %vm328_vm1, %v8233_v13 }
0x1756   :  { %7160 = vmatpush3.xpose.msk.msra.mxu0 %vm328_vm1, %v8233_v13 }
0x1759   :  { %7162 = vmatmul.mubr.msk.f32.vlgmr.msra.gmra.mxu0 %vm328_vm1, %v8243_v53 }
0x1819   :  { %v7163_v3 = vpop.f32.mrf.mxu0 }
0x181a   :  { %v3584_v16 = vmul.f32 0.35355338, %v7163_v3 }
0x181b   :  { %v3574_v58 = vpop.f32.mrf.mxu0 }
0x181c   :  { %v3586_v59 = vadd.f32 %v8250_v18, %v3584_v16  ;;  %v3583_v62 = vmul.f32 0.35355338, %v3574_v58 }
0x181e   :  { %v3585_v1 = vadd.f32 %v8256_v54, %v3583_v62  ;;  %v3590_v20 = vsel %vm420_vm2, %v3586_v59, -inf  ;;  %v6488_v62 = vld [vmem:[%s8683_s5 + $0x48] sm:$0xff] }
0x181f   :  { %3591 = vmax.xlane.f32.xlu1 %v3590_v20 }
0x1820   :  { %v3587_v4 = vsel %vm420_vm2, %v3585_v1, -inf }
0x1821   :  { %3588 = vmax.xlane.f32.xlu0 %v3587_v4 }
0x1830   :  { %3696 = vrot.lane.b32.xlu1 %v8231_v48, %s7561_s12 }
0x1834   :  { %3690 = vrot.lane.b32.xlu1 %v8219_v42, %s7561_s12 }
0x1838   :  { %3692 = vrot.lane.b32.xlu1 %v8243_v53, %s7561_s12 }
0x18a8   :  { %v3592_v6 = vpop.xlane.xlu1 %3591 }
0x18a9   :  { %v3594_v0 = vsub.f32 %v3586_v59, %v3592_v6 }
0x18aa   :  { %v3589_v7 = vpop.xlane.xlu0 %3588 }
0x18ab   :  { %v3593_v56 = vsub.f32 %v3585_v1, %v3589_v7  ;;  %v3597_v8 = vmul.f32 1.442695, %v3594_v0 }
0x18ac   :  { %v3697_v55 = vpop.permute.xlu1 %3696 }
0x18ad   :  { %v3595_v51 = vmul.f32 1.442695, %v3593_v56  ;;  %7171 = vmatprep.subr.msk.mxu1 %vm328_vm1, %v3697_v55 }
0x18af   :  { %7456 = vpow2.f32 %v3595_v51 }
0x18b0   :  { %7458 = vpow2.f32 %v3597_v8  ;;  %v3691_v38 = vpop.permute.xlu1 %3690 }
0x18b4   :  { %v3693_v23 = vpop.permute.xlu1 %3692 }
0x18bc   :  { %v7457_v50 = vpop.eup %7456 }
0x18bd   :  { %v3599_v9 = vsel %vm420_vm2, %v7457_v50, 0.0  ;;  %v7459_v61 = vpop.eup %7458 }
0x18be   :  { %3600 = vadd.xlane.f32.xlu0 %v3599_v9  ;;  %v3602_v63 = vsel %vm420_vm2, %v7459_v61, 0.0 }
0x18c2   :  { %3603 = vadd.xlane.f32.xlu0 %v3602_v63 }
0x18d8   :  { %3694 = vrot.lane.b32.xlu0 %v8233_v13, %s7561_s12 }
0x1947   :  { %v3601_v10 = vpop.xlane.xlu0 %3600 }
0x1948   :  { %7460 = vrcp.f32 %v3601_v10 }
0x194b   :  { %v3604_v15 = vpop.xlane.xlu0 %3603 }
0x194c   :  { %7462 = vrcp.f32 %v3604_v15 }
0x194f   :  { %v3695_v21 = vpop.permute.xlu0 %3694 }
0x1955   :  { %v7461_v14 = vpop.eup %7460 }
0x1956   :  { %v3606_v17 = vmul.f32 %v7461_v14, %v7457_v50 }
0x1958   :  { %7168 = vmatprep.mubr.msk.f32.mxu1 %vm420_vm2, %v3606_v17 }
0x1959   :  { %v7463_v5 = vpop.eup %7462 }
0x195a   :  { %v3608_v2 = vmul.f32 %v7463_v5, %v7459_v61 }
0x195c   :  { %7169 = vmatmul.mubr.msk.f32.vlgmr.msra.gmra.mxu1 %vm420_vm2, %v3608_v2 }
0x195d   :  { %7172 = vmatpush3.xpose.msk.msra.mxu1 %vm328_vm1, %v3697_v55  ;;  %7175 = vmatprep.mubr.msk.f32.mxu1 %vm328_vm1, %v3691_v38 }
0x195e   :  { %7173 = vmatprep.subr.msk.mxu1 %vm328_vm1, %v3695_v21 }
0x1961   :  { %7174 = vmatpush3.xpose.msk.msra.mxu1 %vm328_vm1, %v3695_v21 }
0x1962   :  { %7190 = vmatprep.subr.mxu1 %v6487_v25 }
0x1964   :  { %7176 = vmatmul.mubr.msk.f32.vlgmr.msra.gmra.mxu1 %vm328_vm1, %v3693_v23 }
0x1965   :  { %7191 = vmatpush3.msra.mxu1 %v6487_v25 }
0x1a1c   :  { %v7170_v26 = vpop.f32.mrf.mxu1 }
0x1a1e   :  { %v3681_v37 = vpop.f32.mrf.mxu1 }
0x1a1f   :  { %7192 = vmatprep.mubr.msk.f32.mxu1 %vm328_vm1, %v3681_v37 }
0x1a20   :  { %7193 = vmatmul.mubr.msk.f32.vlgmr.msra.gmra.mxu1 %vm328_vm1, %v7170_v26 }
0x1a24   :  { %v7177_v27 = vpop.f32.mrf.mxu1 }
0x1a25   :  { %v3782_v28 = vmul.f32 0.35355338, %v7177_v27 }
0x1a26   :  { %v3772_v29 = vpop.f32.mrf.mxu1 }
0x1a27   :  { %v3784_v24 = vadd.f32 %v8250_v18, %v3782_v28  ;;  %v3781_v30 = vmul.f32 0.35355338, %v3772_v29 }
0x1a29   :  { %v3783_v22 = vadd.f32 %v8256_v54, %v3781_v30  ;;  %v3788_v31 = vsel %vm420_vm2, %v3784_v24, -inf }
0x1a2a   :  { %3789 = vmax.xlane.f32.xlu1 %v3788_v31 }
0x1a2b   :  { %v3785_v11 = vsel %vm420_vm2, %v3783_v22, -inf }
0x1a2c   :  { %3786 = vmax.xlane.f32.xlu0 %v3785_v11 }
0x1a3b   :  { %3811 = vrot.lane.b32.xlu1 %v8217_v39, %s7561_s12 }
0x1a3f   :  { %4064 = vrot.lane.b32.xlu1 %v8231_v48, %s7563_s18 }
0x1a43   :  { %4062 = vrot.lane.b32.xlu1 %v8233_v13, %s7563_s18 }
0x1a47   :  { %4060 = vrot.lane.b32.xlu1 %v8243_v53, %s7563_s18 }
0x1a4b   :  { %4349 = vrot.lane.b32.xlu1 %v8233_v13, %s7564_s19 }
0x1a4f   :  { %4347 = vrot.lane.b32.xlu1 %v8243_v53, %s7564_s19 }
0x1ab3   :  { %v3790_v35 = vpop.xlane.xlu1 %3789 }
0x1ab4   :  { %v3792_v34 = vsub.f32 %v3784_v24, %v3790_v35 }
0x1ab5   :  { %v3787_v36 = vpop.xlane.xlu0 %3786 }
0x1ab6   :  { %v3795_v60 = vmul.f32 1.442695, %v3792_v34  ;;  %v3791_v41 = vsub.f32 %v3783_v22, %v3787_v36 }
0x1ab7   :  { %v3812_v46 = vpop.permute.xlu1 %3811 }
0x1ab8   :  { %7464 = vpow2.f32 %v3795_v60  ;;  %v3793_v47 = vmul.f32 1.442695, %v3791_v41  ;;  %7178 = vmatprep.subr.mxu0 %v3812_v46 }
0x1ab9   :  { %7179 = vmatpush3.msra.mxu0 %v3812_v46 }
0x1aba   :  { %7466 = vpow2.f32 %v3793_v47 }
0x1ac5   :  { %v7465_v49 = vpop.eup %7464 }
0x1ac6   :  { %v3800_v3 = vsel %vm420_vm2, %v7465_v49, 0.0 }
0x1ac7   :  { %v7467_v16 = vpop.eup %7466  ;;  %3801 = vadd.xlane.f32.xlu0 %v3800_v3 }
0x1ac8   :  { %v3797_v13 = vsel %vm420_vm2, %v7467_v16, 0.0 }
0x1acb   :  { %3798 = vadd.xlane.f32.xlu0 %v3797_v13 }
0x1ae1   :  { %3809 = vrot.lane.b32.xlu0 %v8221_v44, %s7561_s12 }
0x1ae5   :  { %4058 = vrot.lane.b32.xlu0 %v8219_v42, %s7563_s18 }
0x1ae9   :  { %4351 = vrot.lane.b32.xlu0 %v8231_v48, %s7564_s19 }
0x1aed   :  { %4345 = vrot.lane.b32.xlu0 %v8219_v42, %s7564_s19  ;;  %v4065_v42 = vpop.permute.xlu1 %4064 }
0x1af1   :  { %v4063_v7 = vpop.permute.xlu1 %4062 }
0x1af5   :  { %v4061_v8 = vpop.permute.xlu1 %4060 }
0x1af9   :  { %v4350_v50 = vpop.permute.xlu1 %4349 }
0x1afd   :  { %v4348_v9 = vpop.permute.xlu1 %4347 }
0x1b50   :  { %v3802_v53 = vpop.xlane.xlu0 %3801 }
0x1b51   :  { %7468 = vrcp.f32 %v3802_v53 }
0x1b54   :  { %v3799_v58 = vpop.xlane.xlu0 %3798 }
0x1b55   :  { %7470 = vrcp.f32 %v3799_v58 }
0x1b58   :  { %v3810_v59 = vpop.permute.xlu0 %3809 }
0x1b59   :  { %7180 = vmatprep.subr.mxu0 %v3810_v59 }
0x1b5a   :  { %7181 = vmatpush3.msra.mxu0 %v3810_v59 }
0x1b5b   :  { %7185 = vmatprep.subr.mxu0 %v6488_v62 }
0x1b5c   :  { %v4059_v48 = vpop.permute.xlu0 %4058 }
0x1b5e   :  { %v7469_v1 = vpop.eup %7468 }
0x1b5f   :  { %v3806_v6 = vmul.f32 %v7469_v1, %v7465_v49 }
0x1b60   :  { %v4352_v55 = vpop.permute.xlu0 %4351 }
0x1b62   :  { %v7471_v20 = vpop.eup %7470 }
0x1b63   :  { %v3804_v4 = vmul.f32 %v7471_v20, %v7467_v16 }
0x1b64   :  { %v4346_v51 = vpop.permute.xlu0 %4345 }
0x1b65   :  { %7182 = vmatprep.mubr.msk.f32.mxu0 %vm420_vm2, %v3804_v4 }
0x1b66   :  { %7183 = vmatmul.mubr.msk.f32.vlgmr.msra.gmra.mxu0 %vm420_vm2, %v3806_v6 }
0x1b67   :  { %7186 = vmatpush3.msra.mxu0 %v6488_v62  ;;  %v6489_v62 = vld [vmem:[%s8683_s5 + $0x50] sm:$0xff] }
0x1b68   :  { %7195 = vmatprep.subr.msk.mxu0 %vm328_vm1, %v4065_v42 }
0x1c26   :  { %v7184_v0 = vpop.f32.mrf.mxu0 }
0x1c28   :  { %v3887_v56 = vpop.f32.mrf.mxu0 }
0x1c29   :  { %7187 = vmatprep.mubr.msk.f32.mxu0 %vm328_vm1, %v3887_v56 }
0x1c2a   :  { %7188 = vmatmul.mubr.msk.f32.vlgmr.msra.gmra.mxu0 %vm328_vm1, %v7184_v0 }
0x1c2b   :  { %7196 = vmatpush3.xpose.msk.msra.mxu0 %vm328_vm1, %v4065_v42  ;;  %7199 = vmatprep.mubr.msk.f32.mxu0 %vm328_vm1, %v4059_v48 }
0x1c2c   :  { %7197 = vmatprep.subr.msk.mxu0 %vm328_vm1, %v4063_v7 }
0x1c2f   :  { %7198 = vmatpush3.xpose.msk.msra.mxu0 %vm328_vm1, %v4063_v7 }
0x1c30   :  { %7214 = vmatprep.subr.msk.mxu0 %vm328_vm1, %v4352_v55 }
0x1c32   :  { %7200 = vmatmul.mubr.msk.f32.vlgmr.msra.gmra.mxu0 %vm328_vm1, %v4061_v8 }
0x1c33   :  { %7215 = vmatpush3.xpose.msk.msra.mxu0 %vm328_vm1, %v4352_v55  ;;  %7218 = vmatprep.mubr.msk.f32.mxu0 %vm328_vm1, %v4346_v51  ;;  %v7194_v55 = vpop.f32.mrf.mxu1 }
0x1c34   :  { %7216 = vmatprep.subr.msk.mxu0 %vm328_vm1, %v4350_v50 }
0x1c35   :  { %v4049_v8 = vpop.f32.mrf.mxu1 }
0x1c37   :  { %7217 = vmatpush3.xpose.msk.msra.mxu0 %vm328_vm1, %v4350_v50 }
0x1c3a   :  { %7219 = vmatmul.mubr.msk.f32.vlgmr.msra.gmra.mxu0 %vm328_vm1, %v4348_v9 }
0x1cea   :  { %v8329_v61 = vpop.f32.mrf.mxu0 }
0x1cec   :  { %v8331_v63 = vpop.f32.mrf.mxu0 }
0x1cf2   :  { %v7201_v10 = vpop.f32.mrf.mxu0 }
0x1cf3   :  { %v4150_v15 = vmul.f32 0.35355338, %v7201_v10 }
0x1cf4   :  { %v4140_v14 = vpop.f32.mrf.mxu0 }
0x1cf5   :  { %v4152_v17 = vadd.f32 %v8250_v18, %v4150_v15  ;;  %v4149_v5 = vmul.f32 0.35355338, %v4140_v14 }
0x1cf7   :  { %v4151_v2 = vadd.f32 %v8256_v54, %v4149_v5  ;;  %v4156_v38 = vsel %vm420_vm2, %v4152_v17, -inf  ;;  %v6490_v5 = vld [vmem:[%s8683_s5 + $0x58] sm:$0xff] }
0x1cf8   :  { %4157 = vmax.xlane.f32.xlu1 %v4156_v38 }
0x1cf9   :  { %v4153_v21 = vsel %vm420_vm2, %v4151_v2, -inf }
0x1cfa   :  { %4154 = vmax.xlane.f32.xlu0 %v4153_v21  ;;  %v7220_v23 = vpop.f32.mrf.mxu0  ;;  %v4050_v21 = vadd.f32 %v4049_v8, %v8331_v63  ;;  %v4635_v63 = vrot.slane %v8211_v45, %v7862_v52 }
0x1cfb   :  { %v4437_v47 = vmul.f32 0.35355338, %v7220_v23 }
0x1cfc   :  { %v4427_v25 = vpop.f32.mrf.mxu0 }
0x1cfd   :  { %v4436_v26 = vmul.f32 0.35355338, %v4427_v25  ;;  %v4439_v3 = vadd.f32 %v8250_v18, %v4437_v47 }
0x1cff   :  { %v4438_v37 = vadd.f32 %v8256_v54, %v4436_v26  ;;  %v4443_v13 = vsel %vm420_vm2, %v4439_v3, -inf }
0x1d01   :  { %v4440_v27 = vsel %vm420_vm2, %v4438_v37, -inf }
0x1d09   :  { %4177 = vrot.lane.b32.xlu1 %v8217_v39, %s7563_s18 }
0x1d2d   :  { %4441 = vmax.xlane.f32.xlu1 %v4440_v27 }
0x1d81   :  { %v4158_v28 = vpop.xlane.xlu1 %4157 }
0x1d82   :  { %v4160_v29 = vsub.f32 %v4152_v17, %v4158_v28  ;;  %v8372_v28 = vld [vmem:[%s8679_s1] sm:$0xff] }
0x1d83   :  { %v4155_v24 = vpop.xlane.xlu0 %4154 }
0x1d84   :  { %v4163_v30 = vmul.f32 1.442695, %v4160_v29  ;;  %v4159_v22 = vsub.f32 %v4151_v2, %v4155_v24  ;;  %v4055_v2 = vadd.f32 %v7194_v55, %v8329_v61  ;;  %v8379_v61 = vld [vmem:[%s8682_s4 + $0x78] sm:$0xff]  ;;  %v4669_v55 = vrot.slane %v8211_v45, %v7913_v40 }
0x1d85   :  { %v4178_v31 = vpop.permute.xlu1 %4177  ;;  %7233 = vmatprep.subr.mxu0 %v8379_v61 }
0x1d86   :  { %7472 = vpow2.f32 %v4163_v30  ;;  %v4161_v11 = vmul.f32 1.442695, %v4159_v22  ;;  %7202 = vmatprep.subr.mxu1 %v4178_v31  ;;  %7234 = vmatpush3.msra.mxu0 %v8379_v61 }
0x1d87   :  { %7203 = vmatpush3.msra.mxu1 %v4178_v31 }
0x1d88   :  { %7474 = vpow2.f32 %v4161_v11 }
0x1d93   :  { %v7473_v35 = vpop.eup %7472 }
0x1d94   :  { %v4168_v34 = vsel %vm420_vm2, %v7473_v35, 0.0 }
0x1d95   :  { %v7475_v36 = vpop.eup %7474  ;;  %4169 = vadd.xlane.f32.xlu0 %v4168_v34 }
0x1d96   :  { %v4165_v54 = vsel %vm420_vm2, %v7475_v36, 0.0 }
0x1d99   :  { %4166 = vadd.xlane.f32.xlu0 %v4165_v54 }
0x1daf   :  { %4175 = vrot.lane.b32.xlu0 %v8221_v44, %s7563_s18 }
0x1db6   :  { %v4442_v60 = vpop.xlane.xlu1 %4441 }
0x1db7   :  { %v4446_v41 = vsub.f32 %v4438_v37, %v4442_v60  ;;  %v8394_v60 = vld [vmem:[%s8682_s4 + $0x70] sm:$0xff] }
0x1db8   :  { %7235 = vmatprep.subr.mxu0 %v8394_v60 }
0x1db9   :  { %v4448_v46 = vmul.f32 1.442695, %v4446_v41  ;;  %7236 = vmatpush3.msra.mxu0 %v8394_v60 }
0x1dbb   :  { %7476 = vpow2.f32 %v4448_v46 }
0x1dc8   :  { %v7477_v49 = vpop.eup %7476 }
0x1dc9   :  { %v4452_v16 = vsel %vm420_vm2, %v7477_v49, 0.0 }
0x1dca   :  { %4453 = vadd.xlane.f32.xlu1 %v4452_v16 }
0x1dce   :  { %4444 = vmax.xlane.f32.xlu0 %v4443_v13 }
0x1ddb   :  { %4464 = vrot.lane.b32.xlu1 %v8217_v39, %s7564_s19 }
0x1e1e   :  { %v4170_v53 = vpop.xlane.xlu0 %4169 }
0x1e1f   :  { %7478 = vrcp.f32 %v4170_v53 }
0x1e22   :  { %v4167_v58 = vpop.xlane.xlu0 %4166 }
0x1e23   :  { %7480 = vrcp.f32 %v4167_v58 }
0x1e26   :  { %v4176_v59 = vpop.permute.xlu0 %4175 }
0x1e27   :  { %7204 = vmatprep.subr.mxu1 %v4176_v59 }
0x1e28   :  { %7205 = vmatpush3.msra.mxu1 %v4176_v59 }
0x1e29   :  { %7209 = vmatprep.subr.mxu1 %v6489_v62 }
0x1e2c   :  { %v7479_v18 = vpop.eup %7478 }
0x1e2d   :  { %v4174_v4 = vmul.f32 %v7479_v18, %v7473_v35 }
0x1e30   :  { %v7481_v1 = vpop.eup %7480 }
0x1e31   :  { %v4172_v20 = vmul.f32 %v7481_v1, %v7475_v36 }
0x1e33   :  { %7206 = vmatprep.mubr.msk.f32.mxu1 %vm420_vm2, %v4172_v20 }
0x1e34   :  { %7207 = vmatmul.mubr.msk.f32.vlgmr.msra.gmra.mxu1 %vm420_vm2, %v4174_v4 }
0x1e35   :  { %7210 = vmatpush3.msra.mxu1 %v6489_v62 }
0x1e53   :  { %v4454_v39 = vpop.xlane.xlu1 %4453 }
0x1e57   :  { %v4465_v6 = vpop.permute.xlu1 %4464  ;;  %v4445_v42 = vpop.xlane.xlu0 %4444 }
0x1e58   :  { %v4447_v48 = vsub.f32 %v4439_v3, %v4445_v42  ;;  %7221 = vmatprep.subr.mxu1 %v4465_v6 }
0x1e5a   :  { %v4450_v0 = vmul.f32 1.442695, %v4447_v48 }
0x1e5c   :  { %7482 = vpow2.f32 %v4450_v0 }
0x1e5d   :  { %7484 = vrcp.f32 %v4454_v39 }
0x1e69   :  { %v7483_v7 = vpop.eup %7482 }
0x1e6a   :  { %v4455_v56 = vsel %vm420_vm2, %v7483_v7, 0.0  ;;  %v7485_v51 = vpop.eup %7484 }
0x1e6b   :  { %4456 = vadd.xlane.f32.xlu0 %v4455_v56  ;;  %v4459_v15 = vmul.f32 %v7485_v51, %v7477_v49 }
0x1e81   :  { %4462 = vrot.lane.b32.xlu0 %v8221_v44, %s7564_s19 }
0x1ef4   :  { %v7208_v50 = vpop.f32.mrf.mxu1  ;;  %v4457_v9 = vpop.xlane.xlu0 %4456 }
0x1ef5   :  { %7486 = vrcp.f32 %v4457_v9 }
0x1ef6   :  { %v4253_v10 = vpop.f32.mrf.mxu1 }
0x1ef7   :  { %7211 = vmatprep.mubr.msk.f32.mxu1 %vm328_vm1, %v4253_v10  ;;  %v4675_v10 = vrot.slane %v8211_v45, %v7918_v43 }
0x1ef8   :  { %7212 = vmatmul.mubr.msk.f32.vlgmr.msra.gmra.mxu1 %vm328_vm1, %v7208_v50  ;;  %v4463_v14 = vpop.permute.xlu0 %4462 }
0x1ef9   :  { %7222 = vmatpush3.msra.mxu1 %v4465_v6  ;;  %7225 = vmatprep.mubr.msk.f32.mxu1 %vm420_vm2, %v4459_v15 }
0x1efa   :  { %7223 = vmatprep.subr.mxu1 %v4463_v14 }
0x1efb   :  { %7224 = vmatpush3.msra.mxu1 %v4463_v14 }
0x1efc   :  { %7228 = vmatprep.subr.mxu1 %v6490_v5 }
0x1f02   :  { %v7487_v44 = vpop.eup %7486 }
0x1f03   :  { %v4461_v17 = vmul.f32 %v7487_v44, %v7483_v7  ;;  %v7535_v7 = vld [vmem:[%s8679_s1 + $0x8] sm:$0xff] }
0x1f05   :  { %7226 = vmatmul.mubr.msk.f32.vlgmr.msra.gmra.mxu1 %vm420_vm2, %v4461_v17  ;;  %v8441_v17 = vld [vmem:[%s8684_s6 + $0x18] sm:$0x3f] }
0x1f06   :  { %7229 = vmatpush3.msra.mxu1 %v6490_v5  ;;  %v4778_v45 = vrot.slane %v8441_v17, %v7693_v19 }
0x1fb8   :  { %v7213_v38 = vpop.f32.mrf.mxu1 }
0x1fb9   :  { %v4344_v23 = vadd.f32 %v7213_v38, %v4055_v2 }
0x1fba   :  { %v4334_v25 = vpop.f32.mrf.mxu1 }
0x1fbb   :  { %v4343_v26 = vadd.f32 %v4334_v25, %v4050_v21 }
0x1fc5   :  { %v7227_v37 = vpop.f32.mrf.mxu1 }
0x1fc7   :  { %v4540_v27 = vpop.f32.mrf.mxu1 }
0x1fc8   :  { %7230 = vmatprep.mubr.msk.f32.mxu1 %vm328_vm1, %v4540_v27 }
0x1fc9   :  { %7231 = vmatmul.mubr.msk.f32.vlgmr.msra.gmra.mxu1 %vm328_vm1, %v7227_v37 }
0x1fca   :  { %7252 = vmatprep.mubr.msk.f32.mxu1 %vm60_vm0, %v8372_v28 }
0x2089   :  { %v7232_v29 = vpop.f32.mrf.mxu1 }
0x208a   :  { %v4631_v24 = vadd.f32 %v7232_v29, %v4344_v23  ;;  %v4693_v23 = vrot.slane %v8441_v17, %v7677_v12 }
0x208b   :  { %v4621_v30 = vpop.f32.mrf.mxu1 }
0x208c   :  { %v4637_v22 = vadd.f32 %v4635_v63, %v4631_v24  ;;  %v4630_v31 = vadd.f32 %v4621_v30, %v4343_v26 }
0x208e   :  { %v4636_v11 = vadd.f32 %v4635_v63, %v4630_v31  ;;  %v4639_v35 = vadd.f32 %v4637_v22, %v8194_v33  ;;  %v8399_v33 = vld [vmem:[%s8682_s4 + $0x68] sm:$0xff] }
0x208f   :  { %7237 = vmatprep.subr.mxu0 %v8399_v33 }
0x2090   :  { %v4643_v34 = vsel %vm60_vm0, %v4639_v35, 0.0  ;;  %v4638_v36 = vadd.f32 %v4636_v11, %v8192_v32  ;;  %7238 = vmatpush3.msra.mxu0 %v8399_v33  ;;  %v8410_v32 = vld [vmem:[%s8682_s4 + $0x60] sm:$0xff] }
0x2091   :  { %4644 = vadd.xlane.f32.xlu0 %v4643_v34  ;;  %7239 = vmatprep.subr.mxu0 %v8410_v32 }
0x2092   :  { %v4640_v54 = vsel %vm60_vm0, %v4638_v36, 0.0  ;;  %7240 = vmatpush3.msra.mxu0 %v8410_v32 }
0x2093   :  { %4641 = vadd.xlane.f32.xlu1 %v4640_v54 }
0x20a4   :  { %4789 = vrot.lane.b32.xlu1 %v8379_v61, %s7560_s21 }
0x20a8   :  { %4785 = vrot.lane.b32.xlu1 %v8399_v33, %s7560_s21 }
0x211a   :  { %v4645_v41 = vpop.xlane.xlu0 %4644 }
0x211b   :  { %v4647_v46 = vmul.f32 0.03125, %v4645_v41 }
0x211c   :  { %v4642_v47 = vpop.xlane.xlu1 %4641 }
0x211d   :  { %v4649_v49 = vsub.f32 %v4639_v35, %v4647_v46  ;;  %v4646_v3 = vmul.f32 0.03125, %v4642_v47 }
0x211f   :  { %v4648_v16 = vsub.f32 %v4638_v36, %v4646_v3  ;;  %v4651_v13 = vmul.f32 %v4649_v49, %v4649_v49  ;;  %v8493_v36 = vld [vmem:[%s8681_s3 + $0x8] sm:$0xff] }
0x2120   :  { %v4790_v53 = vpop.permute.xlu1 %4789 }
0x2121   :  { %v4655_v58 = vsel %vm60_vm0, %v4651_v13, 0.0  ;;  %v4650_v59 = vmul.f32 %v4648_v16, %v4648_v16  ;;  %7244 = vmatprep.subr.mxu1 %v4790_v53 }
0x2122   :  { %4656 = vadd.xlane.f32.xlu0 %v4655_v58  ;;  %7245 = vmatpush3.msra.mxu1 %v4790_v53 }
0x2123   :  { %v4652_v62 = vsel %vm60_vm0, %v4650_v59, 0.0 }
0x2124   :  { %4653 = vadd.xlane.f32.xlu1 %v4652_v62  ;;  %v4786_v18 = vpop.permute.xlu1 %4785 }
0x2135   :  { %4783 = vrot.lane.b32.xlu1 %v8410_v32, %s7560_s21 }
0x2138   :  { %4787 = vrot.lane.b32.xlu0 %v8394_v60, %s7560_s21 }
0x21ab   :  { %v4657_v1 = vpop.xlane.xlu0 %4656 }
0x21ac   :  { %v4659_v20 = vmul.f32 0.03125, %v4657_v1 }
0x21ad   :  { %v4654_v4 = vpop.xlane.xlu1 %4653 }
0x21ae   :  { %v4661_v39 = vadd.f32 1e-06, %v4659_v20  ;;  %v4658_v6 = vmul.f32 0.03125, %v4654_v4 }
0x21af   :  { %v4788_v42 = vpop.permute.xlu0 %4787 }
0x21b0   :  { %7488 = vrsqrt.f32 %v4661_v39  ;;  %v4660_v48 = vadd.f32 1e-06, %v4658_v6  ;;  %7246 = vmatprep.subr.mxu1 %v4788_v42  ;;  %v4873_v6 = vrot.slane %v8441_v17, %v7752_v57 }
0x21b1   :  { %7247 = vmatpush3.msra.mxu1 %v4788_v42  ;;  %v4784_v0 = vpop.permute.xlu1 %4783 }
0x21b2   :  { %7490 = vrsqrt.f32 %v4660_v48  ;;  %7248 = vmatprep.subr.mxu1 %v4786_v18 }
0x21b3   :  { %7249 = vmatpush3.msra.mxu1 %v4786_v18 }
0x21b4   :  { %7250 = vmatprep.subr.mxu1 %v4784_v0 }
0x21b5   :  { %7251 = vmatpush3.msra.mxu1 %v4784_v0 }
0x21b6   :  { %7253 = vmatmul.mubr.msk.f32.vlgmr.msra.gmra.mxu1 %vm60_vm0, %v7535_v7 }
0x21bd   :  { %v7489_v56 = vpop.eup %7488 }
0x21be   :  { %v4665_v8 = vmul.f32 %v7489_v56, %v4649_v49 }
0x21bf   :  { %v7491_v51 = vpop.eup %7490 }
0x21c0   :  { %v4664_v50 = vmul.f32 %v7491_v51, %v4648_v16  ;;  %v4671_v9 = vmul.f32 %v4669_v55, %v4665_v8 }
0x21c2   :  { %v4670_v15 = vmul.f32 %v4669_v55, %v4664_v50  ;;  %v8430_v44 = vadd.f32 %v4675_v10, %v4671_v9 }
0x21c4   :  { %v8428_v14 = vadd.f32 %v4675_v10, %v4670_v15 }
0x21c6   :  { %7241 = vmatprep.mubr.msk.f32.mxu0 %vm60_vm0, %v8428_v14 }
0x21c7   :  { %7242 = vmatmul.mubr.msk.f32.vlgmr.msra.gmra.mxu0 %vm60_vm0, %v8430_v44 }
0x21c8   :  { %7263 = vmatprep.mubr.msk.f32.mxu0 %vm60_vm0, %v8372_v28 }
0x2276   :  { %v7254_v5 = vpop.f32.mrf.mxu1 }
0x2277   :  { %v8445_v2 = vadd.f32 %v7254_v5, %v4778_v45 }
0x2278   :  { %v4861_v38 = vpop.f32.mrf.mxu1 }
0x2279   :  { %5161 = vrot.lane.b32.xlu0 %v8445_v2, %s7561_s12  ;;  %7266 = vmatprep.subr.msk.mxu1 %vm328_vm1, %v8445_v2  ;;  %v8451_v21 = vadd.f32 %v4861_v38, %v4778_v45 }
0x227a   :  { %7267 = vmatpush3.xpose.msk.msra.mxu1 %vm328_vm1, %v8445_v2 }
0x227b   :  { %5159 = vrot.lane.b32.xlu1 %v8451_v21, %s7561_s12  ;;  %7268 = vmatprep.subr.msk.mxu1 %vm328_vm1, %v8451_v21 }
0x227e   :  { %7269 = vmatpush3.xpose.msk.msra.mxu1 %vm328_vm1, %v8451_v21 }
0x2287   :  { %v7243_v25 = vpop.f32.mrf.mxu0 }
0x2288   :  { %v8463_v26 = vadd.f32 %v7243_v25, %v4693_v23 }
0x2289   :  { %v4766_v37 = vpop.f32.mrf.mxu0 }
0x228a   :  { %v8465_v27 = vadd.f32 %v4766_v37, %v4693_v23  ;;  %5157 = vrot.lane.b32.xlu1 %v8463_v26, %s7561_s12 }
0x228c   :  { %7270 = vmatprep.mubr.msk.f32.mxu1 %vm328_vm1, %v8465_v27  ;;  %5155 = vrot.lane.b32.xlu0 %v8465_v27, %s7561_s12 }
0x228d   :  { %7271 = vmatmul.mubr.msk.f32.vlgmr.msra.gmra.mxu1 %vm328_vm1, %v8463_v26 }
0x228e   :  { %4878 = vrot.lane.b32.xlu1 %v8394_v60, %s7562_s13 }
0x2290   :  { %4880 = vrot.lane.b32.xlu0 %v8379_v61, %s7562_s13 }
0x2292   :  { %4874 = vrot.lane.b32.xlu1 %v8410_v32, %s7562_s13 }
0x2294   :  { %4876 = vrot.lane.b32.xlu0 %v8399_v33, %s7562_s13  ;;  %v8499_v33 = vld [vmem:[%s8681_s3] sm:$0xff] }
0x22eb   :  { %v5162_v28 = vpop.permute.xlu0 %5161 }
0x22ec   :  { %7280 = vmatprep.subr.msk.mxu1 %vm328_vm1, %v5162_v28 }
0x22ed   :  { %7281 = vmatpush3.xpose.msk.msra.mxu1 %vm328_vm1, %v5162_v28  ;;  %v5160_v63 = vpop.permute.xlu1 %5159 }
0x22ee   :  { %7282 = vmatprep.subr.msk.mxu1 %vm328_vm1, %v5160_v63 }
0x22f1   :  { %7283 = vmatpush3.xpose.msk.msra.mxu1 %vm328_vm1, %v5160_v63 }
0x22fc   :  { %v5158_v29 = vpop.permute.xlu1 %5157 }
0x22fe   :  { %v5156_v24 = vpop.permute.xlu0 %5155 }
0x22ff   :  { %7284 = vmatprep.mubr.msk.f32.mxu1 %vm328_vm1, %v5156_v24 }
0x2300   :  { %7285 = vmatmul.mubr.msk.f32.vlgmr.msra.gmra.mxu1 %vm328_vm1, %v5158_v29  ;;  %v4879_v61 = vpop.permute.xlu1 %4878 }
0x2302   :  { %v4881_v30 = vpop.permute.xlu0 %4880 }
0x2303   :  { %7255 = vmatprep.subr.mxu0 %v4881_v30 }
0x2304   :  { %7256 = vmatpush3.msra.mxu0 %v4881_v30  ;;  %v4875_v31 = vpop.permute.xlu1 %4874 }
0x2305   :  { %7257 = vmatprep.subr.mxu0 %v4879_v61 }
0x2306   :  { %v4877_v22 = vpop.permute.xlu0 %4876  ;;  %7258 = vmatpush3.msra.mxu0 %v4879_v61 }
0x2307   :  { %7259 = vmatprep.subr.mxu0 %v4877_v22 }
0x2308   :  { %7260 = vmatpush3.msra.mxu0 %v4877_v22 }
0x2309   :  { %7261 = vmatprep.subr.mxu0 %v4875_v31 }
0x230a   :  { %7262 = vmatpush3.msra.mxu0 %v4875_v31 }
0x230b   :  { %7264 = vmatmul.mubr.msk.f32.vlgmr.msra.gmra.mxu0 %vm60_vm0, %v7535_v7 }
0x234d   :  { %v7272_v11 = vpop.f32.mrf.mxu1 }
0x234e   :  { %v5049_v35 = vmul.f32 0.35355338, %v7272_v11 }
0x234f   :  { %v5039_v34 = vpop.f32.mrf.mxu1 }
0x2350   :  { %v5051_v54 = vadd.f32 %v8493_v36, %v5049_v35  ;;  %v5048_v60 = vmul.f32 0.35355338, %v5039_v34 }
0x2352   :  { %v5050_v32 = vadd.f32 %v8499_v33, %v5048_v60  ;;  %v5055_v41 = vsel %vm420_vm2, %v5051_v54, -inf }
0x2353   :  { %5056 = vmax.xlane.f32.xlu1 %v5055_v41 }
0x2354   :  { %v5052_v46 = vsel %vm420_vm2, %v5050_v32, -inf }
0x2355   :  { %5053 = vmax.xlane.f32.xlu0 %v5052_v46 }
0x23c0   :  { %v7286_v47 = vpop.f32.mrf.mxu1 }
0x23c1   :  { %v5247_v3 = vmul.f32 0.35355338, %v7286_v47 }
0x23c2   :  { %v5237_v49 = vpop.f32.mrf.mxu1 }
0x23c3   :  { %v5246_v16 = vmul.f32 0.35355338, %v5237_v49  ;;  %v5249_v53 = vadd.f32 %v8493_v36, %v5247_v3 }
0x23c5   :  { %v5248_v13 = vadd.f32 %v8499_v33, %v5246_v16  ;;  %v5253_v59 = vsel %vm420_vm2, %v5249_v53, -inf }
0x23c7   :  { %v5250_v58 = vsel %vm420_vm2, %v5248_v13, -inf }
0x23c8   :  { %5251 = vmax.xlane.f32.xlu0 %v5250_v58 }
0x23cb   :  { %v7265_v42 = vpop.f32.mrf.mxu0 }
0x23cc   :  { %5254 = vmax.xlane.f32.xlu0 %v5253_v59  ;;  %v8510_v48 = vadd.f32 %v7265_v42, %v4873_v6 }
0x23cd   :  { %v4952_v8 = vpop.f32.mrf.mxu0 }
0x23ce   :  { %7273 = vmatprep.subr.mxu0 %v8510_v48  ;;  %v8516_v51 = vadd.f32 %v4952_v8, %v4873_v6 }
0x23cf   :  { %7274 = vmatpush3.msra.mxu0 %v8510_v48 }
0x23d0   :  { %7275 = vmatprep.subr.mxu0 %v8516_v51 }
0x23d1   :  { %7276 = vmatpush3.msra.mxu0 %v8516_v51 }
0x23dc   :  { %v5057_v62 = vpop.xlane.xlu1 %5056 }
0x23dd   :  { %v5059_v18 = vsub.f32 %v5051_v54, %v5057_v62 }
0x23de   :  { %v5054_v1 = vpop.xlane.xlu0 %5053 }
0x23df   :  { %v5062_v20 = vmul.f32 1.442695, %v5059_v18  ;;  %v5058_v4 = vsub.f32 %v5050_v32, %v5054_v1 }
0x23e1   :  { %7492 = vpow2.f32 %v5062_v20  ;;  %v5060_v39 = vmul.f32 1.442695, %v5058_v4 }
0x23e3   :  { %7494 = vpow2.f32 %v5060_v39 }
0x23ee   :  { %v7493_v0 = vpop.eup %7492 }
0x23ef   :  { %v5067_v7 = vsel %vm420_vm2, %v7493_v0, 0.0 }
0x23f0   :  { %v7495_v56 = vpop.eup %7494  ;;  %5068 = vadd.xlane.f32.xlu0 %v5067_v7 }
0x23f1   :  { %v5064_v55 = vsel %vm420_vm2, %v7495_v56, 0.0 }
0x23f2   :  { %5065 = vadd.xlane.f32.xlu1 %v5064_v55 }
0x2451   :  { %v5252_v50 = vpop.xlane.xlu0 %5251 }
0x2452   :  { %v5256_v9 = vsub.f32 %v5248_v13, %v5252_v50 }
0x2454   :  { %v5258_v10 = vmul.f32 1.442695, %v5256_v9 }
0x2455   :  { %v5255_v15 = vpop.xlane.xlu0 %5254 }
0x2456   :  { %7496 = vpow2.f32 %v5258_v10  ;;  %v5257_v45 = vsub.f32 %v5249_v53, %v5255_v15 }
0x2458   :  { %v5260_v5 = vmul.f32 1.442695, %v5257_v45 }
0x245a   :  { %7498 = vpow2.f32 %v5260_v5 }
0x2463   :  { %v7497_v38 = vpop.eup %7496 }
0x2464   :  { %v5262_v23 = vsel %vm420_vm2, %v7497_v38, 0.0 }
0x2465   :  { %5263 = vadd.xlane.f32.xlu1 %v5262_v23 }
0x2467   :  { %v7499_v25 = vpop.eup %7498 }
0x2468   :  { %v5265_v37 = vsel %vm420_vm2, %v7499_v25, 0.0 }
0x2469   :  { %5266 = vadd.xlane.f32.xlu0 %v5265_v37 }
0x2476   :  { %5276 = vrot.lane.b32.xlu1 %v8510_v48, %s7561_s12 }
0x2479   :  { %v5069_v28 = vpop.xlane.xlu0 %5068 }
0x247a   :  { %5529 = vrot.lane.b32.xlu1 %v8445_v2, %s7563_s18  ;;  %7500 = vrcp.f32 %v5069_v28 }
0x247b   :  { %v5066_v63 = vpop.xlane.xlu1 %5065 }
0x247c   :  { %7502 = vrcp.f32 %v5066_v63 }
0x247e   :  { %5527 = vrot.lane.b32.xlu1 %v8451_v21, %s7563_s18 }
0x247f   :  { %5274 = vrot.lane.b32.xlu0 %v8516_v51, %s7561_s12 }
0x2482   :  { %5525 = vrot.lane.b32.xlu1 %v8463_v26, %s7563_s18 }
0x2483   :  { %5523 = vrot.lane.b32.xlu0 %v8465_v27, %s7563_s18 }
0x2486   :  { %5814 = vrot.lane.b32.xlu1 %v8451_v21, %s7564_s19  ;;  %v6534_v21 = vld [vmem:[%s8683_s5 + $0x60] sm:$0xff] }
0x2487   :  { %5816 = vrot.lane.b32.xlu0 %v8445_v2, %s7564_s19  ;;  %v7501_v29 = vpop.eup %7500  ;;  %7299 = vmatprep.subr.mxu1 %v6534_v21 }
0x2488   :  { %v5073_v30 = vmul.f32 %v7501_v29, %v7493_v0  ;;  %7300 = vmatpush3.msra.mxu1 %v6534_v21 }
0x2489   :  { %v7503_v24 = vpop.eup %7502 }
0x248a   :  { %5812 = vrot.lane.b32.xlu1 %v8463_v26, %s7564_s19  ;;  %v5071_v61 = vmul.f32 %v7503_v24, %v7495_v56 }
0x248b   :  { %5810 = vrot.lane.b32.xlu0 %v8465_v27, %s7564_s19  ;;  %v6535_v27 = vld [vmem:[%s8683_s5 + $0x68] sm:$0xff] }
0x248c   :  { %7277 = vmatprep.mubr.msk.f32.mxu0 %vm420_vm2, %v5071_v61 }
0x248d   :  { %7278 = vmatmul.mubr.msk.f32.vlgmr.msra.gmra.mxu0 %vm420_vm2, %v5073_v30 }
0x24ee   :  { %v5264_v2 = vpop.xlane.xlu1 %5263 }
0x24ef   :  { %7504 = vrcp.f32 %v5264_v2 }
0x24f2   :  { %v5277_v22 = vpop.permute.xlu1 %5276  ;;  %v5267_v31 = vpop.xlane.xlu0 %5266 }
0x24f3   :  { %7506 = vrcp.f32 %v5267_v31  ;;  %7287 = vmatprep.subr.mxu0 %v5277_v22 }
0x24f4   :  { %7288 = vmatpush3.msra.mxu0 %v5277_v22 }
0x24f6   :  { %v5275_v26 = vpop.permute.xlu0 %5274  ;;  %v5530_v60 = vpop.permute.xlu1 %5529 }
0x24f7   :  { %7289 = vmatprep.subr.mxu0 %v5275_v26 }
0x24f8   :  { %7290 = vmatpush3.msra.mxu0 %v5275_v26 }
0x24f9   :  { %7294 = vmatprep.subr.mxu0 %v6535_v27 }
0x24fa   :  { %v5524_v46 = vpop.permute.xlu0 %5523  ;;  %v5528_v49 = vpop.permute.xlu1 %5527 }
0x24fc   :  { %v7505_v11 = vpop.eup %7504 }
0x24fd   :  { %v5269_v35 = vmul.f32 %v7505_v11, %v7497_v38 }
0x24fe   :  { %v5817_v16 = vpop.permute.xlu0 %5816  ;;  %v5526_v13 = vpop.permute.xlu1 %5525 }
0x24ff   :  { %7291 = vmatprep.mubr.msk.f32.mxu0 %vm420_vm2, %v5269_v35  ;;  %v6536_v35 = vld [vmem:[%s8683_s5 + $0x70] sm:$0xff] }
0x2500   :  { %v7507_v34 = vpop.eup %7506 }
0x2501   :  { %v5271_v54 = vmul.f32 %v7507_v34, %v7499_v25 }
0x2502   :  { %v5811_v53 = vpop.permute.xlu0 %5810  ;;  %v5815_v58 = vpop.permute.xlu1 %5814 }
0x2503   :  { %7292 = vmatmul.mubr.msk.f32.vlgmr.msra.gmra.mxu0 %vm420_vm2, %v5271_v54 }
0x2504   :  { %7295 = vmatpush3.msra.mxu0 %v6535_v27 }
0x2505   :  { %7304 = vmatprep.subr.msk.mxu0 %vm328_vm1, %v5530_v60 }
0x2506   :  { %v5813_v59 = vpop.permute.xlu1 %5812 }
0x254d   :  { %v7279_v32 = vpop.f32.mrf.mxu0 }
0x254f   :  { %v5146_v41 = vpop.f32.mrf.mxu0 }
0x2550   :  { %7301 = vmatprep.mubr.msk.f32.mxu1 %vm328_vm1, %v5146_v41 }
0x2551   :  { %7302 = vmatmul.mubr.msk.f32.vlgmr.msra.gmra.mxu1 %vm328_vm1, %v7279_v32 }
0x25c3   :  { %v7293_v47 = vpop.f32.mrf.mxu0 }
0x25c5   :  { %v5352_v3 = vpop.f32.mrf.mxu0 }
0x25c6   :  { %7296 = vmatprep.mubr.msk.f32.mxu0 %vm328_vm1, %v5352_v3 }
0x25c7   :  { %7297 = vmatmul.mubr.msk.f32.vlgmr.msra.gmra.mxu0 %vm328_vm1, %v7293_v47 }
0x25c8   :  { %7305 = vmatpush3.xpose.msk.msra.mxu0 %vm328_vm1, %v5530_v60  ;;  %7308 = vmatprep.mubr.msk.f32.mxu0 %vm328_vm1, %v5524_v46 }
0x25c9   :  { %7306 = vmatprep.subr.msk.mxu0 %vm328_vm1, %v5528_v49 }
0x25cc   :  { %7307 = vmatpush3.xpose.msk.msra.mxu0 %vm328_vm1, %v5528_v49 }
0x25cd   :  { %7323 = vmatprep.subr.msk.mxu0 %vm328_vm1, %v5817_v16 }
0x25cf   :  { %7309 = vmatmul.mubr.msk.f32.vlgmr.msra.gmra.mxu0 %vm328_vm1, %v5526_v13 }
0x25d0   :  { %7324 = vmatpush3.xpose.msk.msra.mxu0 %vm328_vm1, %v5817_v16  ;;  %7327 = vmatprep.mubr.msk.f32.mxu0 %vm328_vm1, %v5811_v53 }
0x25d1   :  { %7325 = vmatprep.subr.msk.mxu0 %vm328_vm1, %v5815_v58 }
0x25d4   :  { %7326 = vmatpush3.xpose.msk.msra.mxu0 %vm328_vm1, %v5815_v58 }
0x25d7   :  { %7328 = vmatmul.mubr.msk.f32.vlgmr.msra.gmra.mxu0 %vm328_vm1, %v5813_v59 }
0x2611   :  { %v7303_v16 = vpop.f32.mrf.mxu1 }
0x2613   :  { %v5514_v13 = vpop.f32.mrf.mxu1 }
0x2687   :  { %v8568_v62 = vpop.f32.mrf.mxu0 }
0x2689   :  { %v8570_v18 = vpop.f32.mrf.mxu0 }
0x268f   :  { %v7310_v1 = vpop.f32.mrf.mxu0 }
0x2690   :  { %v5615_v20 = vmul.f32 0.35355338, %v7310_v1 }
0x2691   :  { %v5605_v4 = vpop.f32.mrf.mxu0 }
0x2692   :  { %v5617_v39 = vadd.f32 %v8493_v36, %v5615_v20  ;;  %v5614_v6 = vmul.f32 0.35355338, %v5605_v4 }
0x2694   :  { %v5616_v42 = vadd.f32 %v8499_v33, %v5614_v6  ;;  %v5621_v0 = vsel %vm420_vm2, %v5617_v39, -inf  ;;  %v6537_v6 = vld [vmem:[%s8683_s5 + $0x78] sm:$0xff] }
0x2695   :  { %5622 = vmax.xlane.f32.xlu1 %v5621_v0 }
0x2696   :  { %v5618_v7 = vsel %vm420_vm2, %v5616_v42, -inf }
0x2697   :  { %5619 = vmax.xlane.f32.xlu0 %v5618_v7  ;;  %v7329_v56 = vpop.f32.mrf.mxu0  ;;  %v5515_v7 = vadd.f32 %v5514_v13, %v8570_v18 }
0x2698   :  { %v5902_v30 = vmul.f32 0.35355338, %v7329_v56 }
0x2699   :  { %v5892_v55 = vpop.f32.mrf.mxu0 }
0x269a   :  { %v5901_v8 = vmul.f32 0.35355338, %v5892_v55  ;;  %v5904_v2 = vadd.f32 %v8493_v36, %v5902_v30 }
0x269c   :  { %v5903_v50 = vadd.f32 %v8499_v33, %v5901_v8  ;;  %v5908_v31 = vsel %vm420_vm2, %v5904_v2, -inf }
0x269e   :  { %v5905_v9 = vsel %vm420_vm2, %v5903_v50, -inf }
0x26a6   :  { %5642 = vrot.lane.b32.xlu1 %v8510_v48, %s7563_s18 }
0x26ca   :  { %5906 = vmax.xlane.f32.xlu1 %v5905_v9 }
0x271e   :  { %v5623_v10 = vpop.xlane.xlu1 %5622 }
0x271f   :  { %v5625_v15 = vsub.f32 %v5617_v39, %v5623_v10  ;;  %v6100_v10 = vrot.slane %v8441_v17, %v7862_v52 }
0x2720   :  { %v5620_v45 = vpop.xlane.xlu0 %5619 }
0x2721   :  { %v5628_v5 = vmul.f32 1.442695, %v5625_v15  ;;  %v5624_v38 = vsub.f32 %v5616_v42, %v5620_v45  ;;  %v5520_v42 = vadd.f32 %v7303_v16, %v8568_v62 }
0x2722   :  { %v5643_v23 = vpop.permute.xlu1 %5642 }
0x2723   :  { %7508 = vpow2.f32 %v5628_v5  ;;  %v5626_v25 = vmul.f32 1.442695, %v5624_v38  ;;  %7311 = vmatprep.subr.mxu1 %v5643_v23 }
0x2724   :  { %7312 = vmatpush3.msra.mxu1 %v5643_v23 }
0x2725   :  { %7510 = vpow2.f32 %v5626_v25 }
0x2730   :  { %v7509_v37 = vpop.eup %7508 }
0x2731   :  { %v5633_v28 = vsel %vm420_vm2, %v7509_v37, 0.0 }
0x2732   :  { %v7511_v63 = vpop.eup %7510  ;;  %5634 = vadd.xlane.f32.xlu0 %v5633_v28 }
0x2733   :  { %v5630_v33 = vsel %vm420_vm2, %v7511_v63, 0.0 }
0x2736   :  { %5631 = vadd.xlane.f32.xlu0 %v5630_v33 }
0x274c   :  { %5640 = vrot.lane.b32.xlu0 %v8516_v51, %s7563_s18 }
0x2753   :  { %v5907_v29 = vpop.xlane.xlu1 %5906 }
0x2754   :  { %v5911_v24 = vsub.f32 %v5903_v50, %v5907_v29 }
0x2756   :  { %v5913_v61 = vmul.f32 1.442695, %v5911_v24 }
0x2758   :  { %7512 = vpow2.f32 %v5913_v61 }
0x2765   :  { %v7513_v21 = vpop.eup %7512 }
0x2766   :  { %v5917_v22 = vsel %vm420_vm2, %v7513_v21, 0.0 }
0x2767   :  { %5918 = vadd.xlane.f32.xlu1 %v5917_v22  ;;  %v6579_v22 = vld [vmem:[%s8685_s7 + $0x30] sm:$0xff] }
0x276b   :  { %5909 = vmax.xlane.f32.xlu0 %v5908_v31  ;;  %v6578_v31 = vld [vmem:[%s8685_s7 + $0x28] sm:$0xff] }
0x2778   :  { %5929 = vrot.lane.b32.xlu1 %v8510_v48, %s7564_s19 }
0x27bb   :  { %v5635_v26 = vpop.xlane.xlu0 %5634 }
0x27bc   :  { %7514 = vrcp.f32 %v5635_v26  ;;  %v6577_v26 = vld [vmem:[%s8685_s7 + $0x20] sm:$0xff] }
0x27bf   :  { %v5632_v27 = vpop.xlane.xlu0 %5631 }
0x27c0   :  { %7516 = vrcp.f32 %v5632_v27  ;;  %v6593_v27 = vld [vmem:[%s8686_s8 + $0x78] sm:$0xff] }
0x27c3   :  { %v5641_v11 = vpop.permute.xlu0 %5640 }
0x27c4   :  { %7313 = vmatprep.subr.mxu1 %v5641_v11 }
0x27c5   :  { %7314 = vmatpush3.msra.mxu1 %v5641_v11  ;;  %v6592_v11 = vld [vmem:[%s8686_s8 + $0x70] sm:$0xff] }
0x27c6   :  { %7318 = vmatprep.subr.mxu1 %v6536_v35 }
0x27c9   :  { %v7515_v36 = vpop.eup %7514 }
0x27ca   :  { %v5639_v60 = vmul.f32 %v7515_v36, %v7509_v37  ;;  %v6590_v36 = vld [vmem:[%s8686_s8 + $0x60] sm:$0xff] }
0x27cd   :  { %v7517_v34 = vpop.eup %7516 }
0x27ce   :  { %v5637_v54 = vmul.f32 %v7517_v34, %v7511_v63 }
0x27d0   :  { %7315 = vmatprep.mubr.msk.f32.mxu1 %vm420_vm2, %v5637_v54 }
0x27d1   :  { %7316 = vmatmul.mubr.msk.f32.vlgmr.msra.gmra.mxu1 %vm420_vm2, %v5639_v60 }
0x27d2   :  { %7319 = vmatpush3.msra.mxu1 %v6536_v35  ;;  %v6591_v35 = vld [vmem:[%s8686_s8 + $0x68] sm:$0xff] }
0x27f0   :  { %v5919_v48 = vpop.xlane.xlu1 %5918 }
0x27f4   :  { %v5930_v32 = vpop.permute.xlu1 %5929  ;;  %v5910_v41 = vpop.xlane.xlu0 %5909 }
0x27f5   :  { %v5912_v46 = vsub.f32 %v5904_v2, %v5910_v41  ;;  %7330 = vmatprep.subr.mxu1 %v5930_v32 }
0x27f7   :  { %v5915_v47 = vmul.f32 1.442695, %v5912_v46 }
0x27f9   :  { %7518 = vpow2.f32 %v5915_v47  ;;  %v6134_v47 = vrot.slane %v8441_v17, %v7913_v40  ;;  %v6588_v40 = vld [vmem:[%s8686_s8 + $0x50] sm:$0xff] }
0x27fa   :  { %7520 = vrcp.f32 %v5919_v48 }
0x2806   :  { %v7519_v49 = vpop.eup %7518 }
0x2807   :  { %v5920_v3 = vsel %vm420_vm2, %v7519_v49, 0.0  ;;  %v7521_v53 = vpop.eup %7520 }
0x2808   :  { %5921 = vadd.xlane.f32.xlu0 %v5920_v3  ;;  %v5924_v20 = vmul.f32 %v7521_v53, %v7513_v21  ;;  %v6140_v53 = vrot.slane %v8441_v17, %v7918_v43  ;;  %v6587_v43 = vld [vmem:[%s8686_s8 + $0x48] sm:$0xff]  ;;  %v6586_v17 = vld [vmem:[%s8686_s8 + $0x40] sm:$0xff] }
0x281e   :  { %5927 = vrot.lane.b32.xlu0 %v8516_v51, %s7564_s19 }
0x2891   :  { %v7317_v58 = vpop.f32.mrf.mxu1  ;;  %v5922_v59 = vpop.xlane.xlu0 %5921 }
0x2892   :  { %7522 = vrcp.f32 %v5922_v59 }
0x2893   :  { %v5718_v1 = vpop.f32.mrf.mxu1 }
0x2894   :  { %7320 = vmatprep.mubr.msk.f32.mxu1 %vm328_vm1, %v5718_v1 }
0x2895   :  { %7321 = vmatmul.mubr.msk.f32.vlgmr.msra.gmra.mxu1 %vm328_vm1, %v7317_v58  ;;  %v5928_v4 = vpop.permute.xlu0 %5927 }
0x2896   :  { %7331 = vmatpush3.msra.mxu1 %v5930_v32  ;;  %7334 = vmatprep.mubr.msk.f32.mxu1 %vm420_vm2, %v5924_v20  ;;  %v6589_v20 = vld [vmem:[%s8686_s8 + $0x58] sm:$0xff]  ;;  %s7565_s8 = smov [#allocation2]  }
0x2897   :  { %7332 = vmatprep.subr.mxu1 %v5928_v4 }
0x2898   :  { %7333 = vmatpush3.msra.mxu1 %v5928_v4  ;;  %v6582_v4 = vld [vmem:[%s8687_s9 + $0x1] ss:$0 sm:$0xff]  ;;  %s6382_s9 = sshll.u32 %s7565_s8, 4  ;;  %s6383_s9 = int_to_ptr.vmem [resolvable:$true] %s6382_s9 }
0x2899   :  { %7337 = vmatprep.subr.mxu1 %v6537_v6  ;;  %p7543_p1 = scmp.lt.s32.totalorder %s6383_s9, %s6383_s9 }
0x289f   :  { %v7523_v51 = vpop.eup %7522 }
0x28a0   :  { %v5926_v39 = vmul.f32 %v7523_v51, %v7519_v49 }
0x28a2   :  { %7335 = vmatmul.mubr.msk.f32.vlgmr.msra.gmra.mxu1 %vm420_vm2, %v5926_v39 }
0x28a3   :  { %7338 = vmatpush3.msra.mxu1 %v6537_v6 }
0x28a4   :  { %7353 = vmatprep.subr.mxu1 %v6593_v27 }
0x2955   :  { %v7322_v0 = vpop.f32.mrf.mxu1 }
0x2956   :  { %v5809_v56 = vadd.f32 %v7322_v0, %v5520_v42 }
0x2957   :  { %v5799_v55 = vpop.f32.mrf.mxu1 }
0x2958   :  { %v5808_v8 = vadd.f32 %v5799_v55, %v5515_v7 }
0x2962   :  { %v7336_v50 = vpop.f32.mrf.mxu1 }
0x2964   :  { %v6005_v9 = vpop.f32.mrf.mxu1 }
0x2965   :  { %7339 = vmatprep.mubr.msk.f32.mxu1 %vm328_vm1, %v6005_v9 }
0x2966   :  { %7340 = vmatmul.mubr.msk.f32.vlgmr.msra.gmra.mxu1 %vm328_vm1, %v7336_v50 }
0x2967   :  { %7354 = vmatpush3.msra.mxu1 %v6593_v27 }
0x2968   :  { %7355 = vmatprep.subr.mxu1 %v6592_v11 }
0x2969   :  { %7356 = vmatpush3.msra.mxu1 %v6592_v11 }
0x296a   :  { %7357 = vmatprep.subr.mxu1 %v6591_v35 }
0x296b   :  { %7358 = vmatpush3.msra.mxu1 %v6591_v35 }
0x296c   :  { %7359 = vmatprep.subr.mxu1 %v6590_v36 }
0x296d   :  { %7360 = vmatpush3.msra.mxu1 %v6590_v36 }
0x296e   :  { %7361 = vmatprep.subr.mxu1 %v6589_v20 }
0x296f   :  { %7362 = vmatpush3.msra.mxu1 %v6589_v20 }
0x2970   :  { %7363 = vmatprep.subr.mxu1 %v6588_v40 }
0x2971   :  { %7364 = vmatpush3.msra.mxu1 %v6588_v40 }
0x2972   :  { %7365 = vmatprep.subr.mxu1 %v6587_v43 }
0x2973   :  { %7366 = vmatpush3.msra.mxu1 %v6587_v43 }
0x2974   :  { %7367 = vmatprep.subr.mxu1 %v6586_v17 }
0x2975   :  { %7368 = vmatpush3.msra.mxu1 %v6586_v17 }
0x2a26   :  { %v7341_v15 = vpop.f32.mrf.mxu1 }
0x2a27   :  { %v6096_v45 = vadd.f32 %v7341_v15, %v5809_v56  ;;  %v6585_v56 = vld [vmem:[%s8688_s10 + $0x4] sm:$0x7]  ;;  %s7538_s10 = scalar_lea.vmem %s6383_s9, 256 }
0x2a28   :  { %v6086_v5 = vpop.f32.mrf.mxu1  ;;  %v6253_v55 = vrot.slane %v6585_v56, %v7677_v12  ;;  %p7539_p0 = scmp.ne.s32.totalorder %s6383_s9, %s7538_s10  ;;  %p7544_p2 = scmp.lt.s32.totalorder %s7538_s10, %s7538_s10 }
0x2a29   :  { %v6102_v38 = vadd.f32 %v6100_v10, %v6096_v45  ;;  %v6095_v62 = vadd.f32 %v6086_v5, %v5808_v8 }
0x2a2a   :  { %p7545_p3 = por %p7544_p2, %p7543_p1 }
0x2a2b   :  { %v6101_v23 = vadd.f32 %v6100_v10, %v6095_v62  ;;  %v6104_v18 = vadd.f32 %v6102_v38, %v8430_v44 }
0x2a2c   :  { %p7546_p4 = pnand %p7545_p3, %p7539_p0 }
0x2a2d   :  { %v6108_v25 = vsel %vm60_vm0, %v6104_v18, 0.0  ;;  %v6103_v37 = vadd.f32 %v6101_v23, %v8428_v14  ;;  %v6580_v14 = vld [vmem:[%s8685_s7 + $0x38] sm:$0xff] }
0x2a2e   :  { %6109 = vadd.xlane.f32.xlu0 %v6108_v25  ;;  %7342 = vmatprep.subr.mxu0 %v6580_v14 }
0x2a2f   :  { %v6105_v28 = vsel %vm60_vm0, %v6103_v37, 0.0  ;;  %7343 = vmatpush3.msra.mxu0 %v6580_v14 }
0x2a30   :  { %6106 = vadd.xlane.f32.xlu1 %v6105_v28  ;;  %7344 = vmatprep.subr.mxu0 %v6579_v22 }
0x2a31   :  { %7345 = vmatpush3.msra.mxu0 %v6579_v22  ;;  %v6372_v22 = vrot.slane %v6585_v56, %v7752_v57 }
0x2a32   :  { %7346 = vmatprep.subr.mxu0 %v6578_v31 }
0x2a33   :  { %7347 = vmatpush3.msra.mxu0 %v6578_v31 }
0x2a34   :  { %7348 = vmatprep.subr.mxu0 %v6577_v26 }
0x2a35   :  { %7349 = vmatpush3.msra.mxu0 %v6577_v26 }
0x2ab7   :  { %v6110_v63 = vpop.xlane.xlu0 %6109 }
0x2ab8   :  { %v6112_v33 = vmul.f32 0.03125, %v6110_v63 }
0x2ab9   :  { %v6107_v29 = vpop.xlane.xlu1 %6106 }
0x2aba   :  { %v6114_v52 = vsub.f32 %v6104_v18, %v6112_v33  ;;  %v6111_v24 = vmul.f32 0.03125, %v6107_v29 }
0x2abc   :  { %v6113_v61 = vsub.f32 %v6103_v37, %v6111_v24  ;;  %v6116_v30 = vmul.f32 %v6114_v52, %v6114_v52 }
0x2abe   :  { %v6120_v21 = vsel %vm60_vm0, %v6116_v30, 0.0  ;;  %v6115_v2 = vmul.f32 %v6113_v61, %v6113_v61 }
0x2abf   :  { %6121 = vadd.xlane.f32.xlu0 %v6120_v21 }
0x2ac0   :  { %v6117_v44 = vsel %vm60_vm0, %v6115_v2, 0.0 }
0x2ac1   :  { %6118 = vadd.xlane.f32.xlu1 %v6117_v44  ;;  %v6366_v44 = vrot.slane %v6585_v56, %v7693_v19 }
0x2b48   :  { %v6122_v34 = vpop.xlane.xlu0 %6121 }
0x2b49   :  { %v6124_v54 = vmul.f32 0.03125, %v6122_v34 }
0x2b4a   :  { %v6119_v60 = vpop.xlane.xlu1 %6118 }
0x2b4b   :  { %v6126_v48 = vadd.f32 1e-06, %v6124_v54  ;;  %v6123_v32 = vmul.f32 0.03125, %v6119_v60 }
0x2b4d   :  { %7524 = vrsqrt.f32 %v6126_v48  ;;  %v6125_v41 = vadd.f32 1e-06, %v6123_v32 }
0x2b4f   :  { %7526 = vrsqrt.f32 %v6125_v41 }
0x2b5a   :  { %v7525_v46 = vpop.eup %7524 }
0x2b5b   :  { %v6130_v49 = vmul.f32 %v7525_v46, %v6114_v52 }
0x2b5c   :  { %v7527_v3 = vpop.eup %7526 }
0x2b5d   :  { %v6129_v16 = vmul.f32 %v7527_v3, %v6113_v61  ;;  %v6136_v13 = vmul.f32 %v6134_v47, %v6130_v49 }
0x2b5f   :  { %v6135_v58 = vmul.f32 %v6134_v47, %v6129_v16  ;;  %v6142_v1 = vadd.f32 %v6140_v53, %v6136_v13 }
0x2b61   :  { %v6141_v59 = vadd.f32 %v6140_v53, %v6135_v58 }
0x2b63   :  { %7350 = vmatprep.mubr.msk.f32.mxu0 %vm60_vm0, %v6141_v59 }
0x2b64   :  { %7351 = vmatmul.mubr.msk.f32.vlgmr.msra.gmra.mxu0 %vm60_vm0, %v6142_v1 }
0x2c24   :  { %v7352_v51 = vpop.f32.mrf.mxu0 }
0x2c25   :  { %v6234_v39 = vadd.f32 %v7352_v51, %v6582_v4 }
0x2c26   :  { %v6228_v6 = vpop.f32.mrf.mxu0 }
0x2c27   :  { %v6229_v42 = vadd.f32 %v6582_v4, %v6228_v6  ;;  %v6238_v7 = vmax.f32 %v6234_v39, 0.0 }
0x2c29   :  { %v6237_v0 = vmax.f32 %v6229_v42, 0.0 }
0x2c2b   :  { %7369 = vmatprep.mubr.msk.f32.mxu1 %vm3091_vm3, %v6237_v0 }
0x2c2c   :  { %7370 = vmatmul.mubr.msk.f32.vlgmr.msra.gmra.mxu1 %vm3091_vm3, %v6238_v7 }
0x2cec   :  { %v7371_v8 = vpop.f32.mrf.mxu1 }
0x2ced   :  { %v6332_v50 = vadd.f32 %v7371_v8, %v6253_v55 }
0x2cee   :  { %v6326_v9 = vpop.f32.mrf.mxu1 }
0x2cef   :  { %v6336_v10 = vadd.f32 %v6332_v50, %v6142_v1  ;;  %v6327_v15 = vadd.f32 %v6326_v9, %v6253_v55 }
0x2cf1   :  { %v6335_v45 = vadd.f32 %v6327_v15, %v6141_v59  ;;  %v6340_v5 = vsel %vm60_vm0, %v6336_v10, 0.0 }
0x2cf2   :  { %6341 = vadd.xlane.f32.xlu0 %v6340_v5 }
0x2cf3   :  { %v6337_v38 = vsel %vm60_vm0, %v6335_v45, 0.0 }
0x2cf4   :  { %6338 = vadd.xlane.f32.xlu1 %v6337_v38 }
0x2d7b   :  { %v6342_v62 = vpop.xlane.xlu0 %6341 }
0x2d7c   :  { %v6344_v23 = vmul.f32 0.03125, %v6342_v62 }
0x2d7d   :  { %v6339_v18 = vpop.xlane.xlu1 %6338 }
0x2d7e   :  { %v6346_v25 = vsub.f32 %v6336_v10, %v6344_v23  ;;  %v6343_v37 = vmul.f32 0.03125, %v6339_v18 }
0x2d80   :  { %v6345_v28 = vsub.f32 %v6335_v45, %v6343_v37  ;;  %v6348_v63 = vmul.f32 %v6346_v25, %v6346_v25 }
0x2d82   :  { %v6352_v12 = vsel %vm60_vm0, %v6348_v63, 0.0  ;;  %v6347_v33 = vmul.f32 %v6345_v28, %v6345_v28 }
0x2d83   :  { %6353 = vadd.xlane.f32.xlu0 %v6352_v12 }
0x2d84   :  { %v6349_v29 = vsel %vm60_vm0, %v6347_v33, 0.0 }
0x2d85   :  { %6350 = vadd.xlane.f32.xlu1 %v6349_v29 }
0x2e0c   :  { %v6354_v52 = vpop.xlane.xlu0 %6353 }
0x2e0d   :  { %v6356_v24 = vmul.f32 0.03125, %v6354_v52 }
0x2e0e   :  { %v6351_v61 = vpop.xlane.xlu1 %6350 }
0x2e0f   :  { %v6358_v30 = vadd.f32 1e-06, %v6356_v24  ;;  %v6355_v21 = vmul.f32 0.03125, %v6351_v61 }
0x2e11   :  { %7528 = vrsqrt.f32 %v6358_v30  ;;  %v6357_v2 = vadd.f32 1e-06, %v6355_v21 }
0x2e13   :  { %7530 = vrsqrt.f32 %v6357_v2 }
0x2e1e   :  { %v7529_v14 = vpop.eup %7528 }
0x2e1f   :  { %v6362_v31 = vmul.f32 %v7529_v14, %v6346_v25 }
0x2e20   :  { %v7531_v26 = vpop.eup %7530 }
0x2e21   :  { %v6361_v27 = vmul.f32 %v7531_v26, %v6345_v28  ;;  %v6368_v11 = vmul.f32 %v6366_v44, %v6362_v31 }
0x2e23   :  { %v6367_v35 = vmul.f32 %v6366_v44, %v6361_v27  ;;  %v6374_v36 = vadd.f32 %v6372_v22, %v6368_v11 }
0x2e25   :  { %v6373_v34 = vadd.f32 %v6372_v22, %v6367_v35  ;;  %6376 = vst.msk [vmem:[#allocation2 + $0x8] sm:$0xff] %vm60_vm0, %v6374_v36 }
0x2e27   :  { %6375 = vst.msk [vmem:[#allocation2] sm:$0xff] %vm60_vm0, %v6373_v34 }
0x2e28   :  { %7549 = shalt.err (!%p7546_p4)
}
0x2e29   :  { %s7566_s0 = smov 128   ;;  %s7567_s30 = smov 8  }
0x2e2a   :  { %6388 = dma.vmem_to_hbm [thread:$0]  %s6383_s9, 256, %s8689_s11, [#allocation3], %s7566_s0, %s7566_s0, %s7567_s30  }
0x2e2b   :  { %7558 = dma.done.wait [#allocation3], 256  }
0x2e2c   :  { %7559 = vsyncadd [#allocation3], 4294967040 }
0x2e2d   :  { %6392 = vsyncpa [#allocation3], 1 }

</bundles_post_ra>
